<compile_context>
chip_gen: v7x
topology: tpu7x:2x2x1
jax: 0.10.0
libtpu: 0.0.40
codegen_flags: <defaults>
</compile_context>

<pallas_src>
import jax
import jax.numpy as jnp
from jax.experimental import pallas as pl
from jax.experimental.pallas import tpu as pltpu

NEG_SLOPE = 0.01     # nn.LeakyReLU() default
OUT_PAD = 128        # lane-dense padded width for the 2-wide final layer


def _leaky_relu(x):
    return jnp.where(x > 0, x, NEG_SLOPE * x)


def ib_disc_kernel(z_ref, w1_ref, b1_ref, w2_ref, b2_ref, w3_ref, b3_ref, o_ref):
    # z tile: (TB, 256); matmuls run in the weights' dtype (f32 or bf16),
    # accumulate in f32; bias add + LeakyReLU stay f32.
    z = z_ref[...]

    # Linear(256, 512) + LeakyReLU
    h1 = jnp.dot(z, w1_ref[...], preferred_element_type=jnp.float32) + b1_ref[...]
    h1 = _leaky_relu(h1)

    # Linear(512, 256) + LeakyReLU
    h2 = jnp.dot(h1.astype(w2_ref.dtype), w2_ref[...],
                 preferred_element_type=jnp.float32) + b2_ref[...]
    h2 = _leaky_relu(h2)

    # Linear(256, 2) zero-padded to (256, 128): lane-dense output store.
    out = jnp.dot(h2.astype(w3_ref.dtype), w3_ref[...],
                  preferred_element_type=jnp.float32) + b3_ref[...]
    o_ref[...] = out.astype(o_ref.dtype)


def ib_discriminator_forward(z, params, *, tb=256, use_bf16=False):
    """z: (B, 256) float32. params: dict of w1,b1,w2,b2,w3,b3. Returns (B, 2) float32."""
    B, D_in = z.shape
    assert D_in == 256

    w1, b1 = params["w1"], params["b1"]  # (256, 512), (1, 512)
    w2, b2 = params["w2"], params["b2"]  # (512, 256), (1, 256)
    w3, b3 = params["w3"], params["b3"]  # (256, 2),   (1, 2)

    # Zero-pad the last layer to a lane-dense (multiple-of-128) output width.
    n_out = w3.shape[1]
    w3p = jnp.pad(w3, ((0, 0), (0, OUT_PAD - n_out)))
    b3p = jnp.pad(b3, ((0, 0), (0, OUT_PAD - n_out)))

    # Pad the batch to a multiple of tb so the fast tile works for any B.
    B_pad = ((B + tb - 1) // tb) * tb
    if B_pad != B:
        z = jnp.pad(z, ((0, B_pad - B), (0, 0)))

    # Optional bf16 matmul operands (halves MXU passes + weight DMA on v6e/v7x).
    mm_dtype = jnp.bfloat16 if use_bf16 else z.dtype
    z_in = z.astype(mm_dtype)
    w1_in = w1.astype(mm_dtype)
    w2_in = w2.astype(mm_dtype)
    w3_in = w3p.astype(mm_dtype)

    grid = (B_pad // tb,)

    # Grid-invariant (replicated) specs: index_map always (0, 0), so weights stay
    # resident in VMEM across grid steps (no per-step re-DMA).
    def full_spec(shape):
        return pl.BlockSpec(shape, lambda i: (0, 0))

    out = pl.pallas_call(
        ib_disc_kernel,
        out_shape=jax.ShapeDtypeStruct((B_pad, OUT_PAD), jnp.float32),
        grid_spec=pltpu.PrefetchScalarGridSpec(
            num_scalar_prefetch=0,
            grid=grid,
            in_specs=[
                pl.BlockSpec((tb, 256), lambda i: (i, 0)),  # z tile
                full_spec(w1_in.shape), full_spec(b1.shape),
                full_spec(w2_in.shape), full_spec(b2.shape),
                full_spec(w3_in.shape), full_spec(b3p.shape),
            ],
            out_specs=pl.BlockSpec((tb, OUT_PAD), lambda i: (i, 0)),
        ),
        compiler_params=pltpu.CompilerParams(
            dimension_semantics=("parallel",),  # shards across TCs on v7x when grid >= 2
        ),
    )(z_in, w1_in, b1, w2_in, b2, w3_in, b3p)

    # Drop the batch padding and the lane padding of the final layer.
    return out[:B, :n_out]


def init_params(key):
    """Deterministic init mimicking PyTorch nn.Linear default (uniform(+-1/sqrt(fan_in)))."""
    def linear(k, fan_in, fan_out):
        kw, kb = jax.random.split(k)
        bound = 1.0 / jnp.sqrt(fan_in)
        w = jax.random.uniform(kw, (fan_in, fan_out), jnp.float32, -bound, bound)
        b = jax.random.uniform(kb, (1, fan_out), jnp.float32, -bound, bound)
        return w, b

    k1, k2, k3 = jax.random.split(key, 3)
    w1, b1 = linear(k1, 256, 512)
    w2, b2 = linear(k2, 512, 256)
    w3, b3 = linear(k3, 256, 2)
    return {"w1": w1, "b1": b1, "w2": w2, "b2": b2, "w3": w3, "b3": b3}


def reference_forward(z, p):
    h = jnp.dot(z, p["w1"]) + p["b1"]
    h = jnp.where(h > 0, h, NEG_SLOPE * h)
    h = jnp.dot(h, p["w2"]) + p["b2"]
    h = jnp.where(h > 0, h, NEG_SLOPE * h)
    return jnp.dot(h, p["w3"]) + p["b3"]


if __name__ == "__main__":
    key = jax.random.PRNGKey(0)
    k_params, k_z = jax.random.split(key)

    params = init_params(k_params)

    B = 16  # small batch; wrapper pads to the 256-row tile and slices back
    z = jax.random.normal(k_z, (B, 256), dtype=jnp.float32)

    out = ib_discriminator_forward(z, params)  # default: tb=256, f32 matmuls
    out = jax.block_until_ready(out)

    ref = reference_forward(z, params)
    assert out.shape == (B, 2)
    assert jnp.allclose(out, ref, atol=1e-4, rtol=1e-4), "mismatch vs JAX reference"

    print("KERNEL_OK")
</pallas_src>

<mosaic_0001>
module attributes {stable_mosaic.version = 11 : i64} {
  func.func @ib_disc_kernel(%arg0: i32, %arg1: memref<256x256xf32, #tpu.memory_space<vmem>>, %arg2: memref<256x512xf32, #tpu.memory_space<vmem>>, %arg3: memref<1x512xf32, #tpu.memory_space<vmem>>, %arg4: memref<512x256xf32, #tpu.memory_space<vmem>>, %arg5: memref<1x256xf32, #tpu.memory_space<vmem>>, %arg6: memref<256x128xf32, #tpu.memory_space<vmem>>, %arg7: memref<1x128xf32, #tpu.memory_space<vmem>>, %arg8: memref<256x128xf32, #tpu.memory_space<vmem>>) attributes {dimension_semantics = [#tpu.dimension_semantics<parallel>], iteration_bounds = array<i64: 1>, scalar_prefetch = 0 : i64, scratch_operands = 0 : i64, tpu.core_type = #tpu.core_type<tc>, window_params = [{transform_indices = @transform_0, window_bounds = array<i64: 256, 256>}, {pipeline_mode = #tpu.pipeline_mode<synchronous>, transform_indices = @transform_1, window_bounds = array<i64: 256, 512>}, {pipeline_mode = #tpu.pipeline_mode<synchronous>, transform_indices = @transform_2, window_bounds = array<i64: 1, 512>}, {pipeline_mode = #tpu.pipeline_mode<synchronous>, transform_indices = @transform_3, window_bounds = array<i64: 512, 256>}, {pipeline_mode = #tpu.pipeline_mode<synchronous>, transform_indices = @transform_4, window_bounds = array<i64: 1, 256>}, {pipeline_mode = #tpu.pipeline_mode<synchronous>, transform_indices = @transform_5, window_bounds = array<i64: 256, 128>}, {pipeline_mode = #tpu.pipeline_mode<synchronous>, transform_indices = @transform_6, window_bounds = array<i64: 1, 128>}, {transform_indices = @transform_7, window_bounds = array<i64: 256, 128>}]} {
    %c0 = arith.constant 0 : index
    %c0_0 = arith.constant 0 : index
    %0 = vector.load %arg1[%c0, %c0_0] : memref<256x256xf32, #tpu.memory_space<vmem>>, vector<256x256xf32>
    %c0_1 = arith.constant 0 : index
    %c0_2 = arith.constant 0 : index
    %1 = vector.load %arg2[%c0_1, %c0_2] : memref<256x512xf32, #tpu.memory_space<vmem>>, vector<256x512xf32>
    %cst = arith.constant dense<0.000000e+00> : vector<256x512xf32>
    %2 = tpu.matmul %0, %1, %cst {dimension_numbers = #tpu.dot_dimension_numbers<[1], [0], [0], [1], [0, 0, 1, 1], [], []>} : vector<256x256xf32>, vector<256x512xf32>, vector<256x512xf32> -> vector<256x512xf32>
    %c0_3 = arith.constant 0 : index
    %c0_4 = arith.constant 0 : index
    %3 = vector.load %arg3[%c0_3, %c0_4] : memref<1x512xf32, #tpu.memory_space<vmem>>, vector<1x512xf32>
    %4 = vector.broadcast %3 : vector<1x512xf32> to vector<256x512xf32>
    %5 = arith.addf %2, %4 : vector<256x512xf32>
    %cst_5 = arith.constant 0.000000e+00 : f32
    %6 = vector.broadcast %cst_5 : f32 to vector<256x512xf32>
    %7 = arith.cmpf ogt, %5, %6 : vector<256x512xf32>
    %cst_6 = arith.constant 0.00999999977 : f32
    %8 = vector.broadcast %cst_6 : f32 to vector<256x512xf32>
    %9 = arith.mulf %8, %5 : vector<256x512xf32>
    %10 = arith.select %7, %5, %9 : vector<256x512xi1>, vector<256x512xf32>
    %c0_7 = arith.constant 0 : index
    %c0_8 = arith.constant 0 : index
    %11 = vector.load %arg4[%c0_7, %c0_8] : memref<512x256xf32, #tpu.memory_space<vmem>>, vector<512x256xf32>
    %cst_9 = arith.constant dense<0.000000e+00> : vector<256x256xf32>
    %12 = tpu.matmul %10, %11, %cst_9 {dimension_numbers = #tpu.dot_dimension_numbers<[1], [0], [0], [1], [0, 0, 1, 1], [], []>} : vector<256x512xf32>, vector<512x256xf32>, vector<256x256xf32> -> vector<256x256xf32>
    %c0_10 = arith.constant 0 : index
    %c0_11 = arith.constant 0 : index
    %13 = vector.load %arg5[%c0_10, %c0_11] : memref<1x256xf32, #tpu.memory_space<vmem>>, vector<1x256xf32>
    %14 = vector.broadcast %13 : vector<1x256xf32> to vector<256x256xf32>
    %15 = arith.addf %12, %14 : vector<256x256xf32>
    %cst_12 = arith.constant 0.000000e+00 : f32
    %16 = vector.broadcast %cst_12 : f32 to vector<256x256xf32>
    %17 = arith.cmpf ogt, %15, %16 : vector<256x256xf32>
    %cst_13 = arith.constant 0.00999999977 : f32
    %18 = vector.broadcast %cst_13 : f32 to vector<256x256xf32>
    %19 = arith.mulf %18, %15 : vector<256x256xf32>
    %20 = arith.select %17, %15, %19 : vector<256x256xi1>, vector<256x256xf32>
    %c0_14 = arith.constant 0 : index
    %c0_15 = arith.constant 0 : index
    %21 = vector.load %arg6[%c0_14, %c0_15] : memref<256x128xf32, #tpu.memory_space<vmem>>, vector<256x128xf32>
    %cst_16 = arith.constant dense<0.000000e+00> : vector<256x128xf32>
    %22 = tpu.matmul %20, %21, %cst_16 {dimension_numbers = #tpu.dot_dimension_numbers<[1], [0], [0], [1], [0, 0, 1, 1], [], []>} : vector<256x256xf32>, vector<256x128xf32>, vector<256x128xf32> -> vector<256x128xf32>
    %c0_17 = arith.constant 0 : index
    %c0_18 = arith.constant 0 : index
    %23 = vector.load %arg7[%c0_17, %c0_18] : memref<1x128xf32, #tpu.memory_space<vmem>>, vector<1x128xf32>
    %24 = vector.broadcast %23 : vector<1x128xf32> to vector<256x128xf32>
    %25 = arith.addf %22, %24 : vector<256x128xf32>
    %c0_19 = arith.constant 0 : index
    %c0_20 = arith.constant 0 : index
    %26 = vector.load %arg8[%c0_19, %c0_20] : memref<256x128xf32, #tpu.memory_space<vmem>>, vector<256x128xf32>
    tpu.vector_store %arg8[%c0_19, %c0_20], %25 {strides = array<i32>} : memref<256x128xf32, #tpu.memory_space<vmem>>, vector<256x128xf32>,
    return
  }
  func.func @transform_0(%arg0: i32) -> (i32, i32) {
    %c0_i32 = arith.constant 0 : i32
    %c0_i32_0 = arith.constant 0 : i32
    return %arg0, %c0_i32 : i32, i32
  }
  func.func @transform_1(%arg0: i32) -> (i32, i32) {
    %c0_i32 = arith.constant 0 : i32
    %c0_i32_0 = arith.constant 0 : i32
    %c0_i32_1 = arith.constant 0 : i32
    return %c0_i32, %c0_i32_0 : i32, i32
  }
  func.func @transform_2(%arg0: i32) -> (i32, i32) {
    %c0_i32 = arith.constant 0 : i32
    %c0_i32_0 = arith.constant 0 : i32
    %c0_i32_1 = arith.constant 0 : i32
    return %c0_i32, %c0_i32_0 : i32, i32
  }
  func.func @transform_3(%arg0: i32) -> (i32, i32) {
    %c0_i32 = arith.constant 0 : i32
    %c0_i32_0 = arith.constant 0 : i32
    %c0_i32_1 = arith.constant 0 : i32
    return %c0_i32, %c0_i32_0 : i32, i32
  }
  func.func @transform_4(%arg0: i32) -> (i32, i32) {
    %c0_i32 = arith.constant 0 : i32
    %c0_i32_0 = arith.constant 0 : i32
    %c0_i32_1 = arith.constant 0 : i32
    return %c0_i32, %c0_i32_0 : i32, i32
  }
  func.func @transform_5(%arg0: i32) -> (i32, i32) {
    %c0_i32 = arith.constant 0 : i32
    %c0_i32_0 = arith.constant 0 : i32
    %c0_i32_1 = arith.constant 0 : i32
    return %c0_i32, %c0_i32_0 : i32, i32
  }
  func.func @transform_6(%arg0: i32) -> (i32, i32) {
    %c0_i32 = arith.constant 0 : i32
    %c0_i32_0 = arith.constant 0 : i32
    %c0_i32_1 = arith.constant 0 : i32
    return %c0_i32, %c0_i32_0 : i32, i32
  }
  func.func @transform_7(%arg0: i32) -> (i32, i32) {
    %c0_i32 = arith.constant 0 : i32
    %c0_i32_0 = arith.constant 0 : i32
    return %arg0, %c0_i32 : i32, i32
  }
}

</mosaic_0001>

<bundles_post_ra>
// kernel: tpu_custom_call.1
= control target key start
LH: loop header
LB: loop body
LE: loop exit
PB: predicated region body
PF: predicated region fallthrough
CT: control target
= control target key end

     0   :  { %12 = vsyncpa [#allocation3], 0  ;;  %s3976_s0 = inlined_call_operand.hbm [shape: f32[256,256], index: 0, kind: input, shape index: {}]   ;;  %s3977_s1 = inlined_call_operand.hbm [shape: f32[256,512], index: 1, kind: input, shape index: {}]   ;;  %s3978_s2 = inlined_call_operand.vmem [shape: f32[1,512], index: 2, kind: input, shape index: {}]   ;;  %s3979_s3 = inlined_call_operand.hbm [shape: f32[512,256], index: 3, kind: input, shape index: {}]   ;;  %s3980_s4 = inlined_call_operand.vmem [shape: f32[1,256], index: 4, kind: input, shape index: {}]   ;;  %s3981_s5 = inlined_call_operand.hbm [shape: f32[256,128], index: 5, kind: input, shape index: {}]   ;;  %s3982_s6 = inlined_call_operand.vmem [shape: f32[1,128], index: 6, kind: input, shape index: {}]   ;;  %s3983_s7 = inlined_call_operand.hbm [shape: f32[256,128], index: 7, kind: output, shape index: {}]  }
   0x1   :  { %13 = vsyncpa [#allocation6], 0 }
   0x2   :  { %14 = vsyncpa [#allocation9], 0 }
   0x3   :  { %15 = vsyncpa [#allocation4], 0  ;;  %s2951_s24 = smov [#allocation5]   ;;  %s2833_s28 = scalar_lea.hbm %s3977_s1, 16384 }
   0x4   :  { %s33_s25 = sshll.u32 %s2951_s24, 4  ;;  %p2834_p0 = scmp.ne.s32.totalorder %s3977_s1, %s2833_s28  ;;  %s34_s25 = int_to_ptr.vmem [resolvable:$true] %s33_s25 }
   0x5   :  { %p2837_p1 = scmp.lt.u32.totalorder %s2833_s28, %s3977_s1 }
   0x7   :  { %p2839_p2 = pnand %p2837_p1, %p2834_p0 }
   0x9   :  { %2842 = shalt.err (!%p2839_p2)
}
   0xa   :  { %s2843_s10 = scalar_lea.vmem %s34_s25, 16384  ;;  %p2848_p4 = scmp.lt.s32.totalorder %s34_s25, %s34_s25 }
   0xb   :  { %p2844_p3 = scmp.ne.s32.totalorder %s34_s25, %s2843_s10  ;;  %p2849_p5 = scmp.lt.s32.totalorder %s2843_s10, %s2843_s10 }
   0xd   :  { %p2850_p6 = por %p2849_p5, %p2848_p4 }
   0xf   :  { %p2851_p7 = pnand %p2850_p6, %p2844_p3 }
  0x11   :  { %2854 = shalt.err (!%p2851_p7)
}
  0x12   :  { %s2952_s11 = smov 512   ;;  %s2953_s12 = smov 32  }
  0x13   :  { %39 = dma.hbm_to_vmem [thread:$0]  %s3977_s1, 16384, %s34_s25, [#allocation6], %s2952_s11, %s2952_s11, %s2953_s12  }
  0x14   :  { %s2954_s15 = smov [#allocation2]   ;;  %s2855_s19 = scalar_lea.hbm %s3976_s0, 8192 }
  0x15   :  { %s21_s16 = sshll.u32 %s2954_s15, 4  ;;  %p2856_p8 = scmp.ne.s32.totalorder %s3976_s0, %s2855_s19  ;;  %s22_s16 = int_to_ptr.vmem [resolvable:$true] %s21_s16 }
  0x16   :  { %p2859_p9 = scmp.lt.u32.totalorder %s2855_s19, %s3976_s0 }
  0x18   :  { %p2861_p10 = pnand %p2859_p9, %p2856_p8 }
  0x1a   :  { %2864 = shalt.err (!%p2861_p10)
}
  0x1b   :  { %s2865_s24 = scalar_lea.vmem %s22_s16, 8192  ;;  %p2870_p12 = scmp.lt.s32.totalorder %s22_s16, %s22_s16 }
  0x1c   :  { %p2866_p11 = scmp.ne.s32.totalorder %s22_s16, %s2865_s24  ;;  %p2871_p13 = scmp.lt.s32.totalorder %s2865_s24, %s2865_s24 }
  0x1e   :  { %p2872_p0 = por %p2871_p13, %p2870_p12 }
  0x20   :  { %p2873_p1 = pnand %p2872_p0, %p2866_p11 }
  0x22   :  { %2876 = shalt.err (!%p2873_p1)
}
  0x23   :  { %s2955_s1 = smov 256   ;;  %s2956_s25 = smov 16  }
  0x24   :  { %27 = dma.hbm_to_vmem [thread:$0]  %s3976_s0, 8192, %s22_s16, [#allocation3], %s2955_s1, %s2955_s1, %s2956_s25  }
  0x25   :  { %s2957_s28 = smov [#allocation7]   ;;  %s2958_s30 = smov [#allocation8]  }
  0x26   :  { %s47_s29 = sshll.u32 %s2957_s28, 4  ;;  %s61_s8 = sshll.u32 %s2958_s30, 4  ;;  %s48_s29 = int_to_ptr.vmem [resolvable:$true] %s47_s29  ;;  %s3027_s8 = int_to_ptr.vmem [resolvable:$true] %s61_s8 }
  0x27   :  { %s2877_s11 = scalar_lea.hbm %s3979_s3, 16384 }
  0x28   :  { %p2878_p2 = scmp.ne.s32.totalorder %s3979_s3, %s2877_s11  ;;  %p2881_p3 = scmp.lt.u32.totalorder %s2877_s11, %s3979_s3 }
  0x2a   :  { %p2883_p4 = pnand %p2881_p3, %p2878_p2 }
  0x2c   :  { %2886 = shalt.err (!%p2883_p4)
}
  0x2d   :  { %s2887_s0 = scalar_lea.vmem %s48_s29, 16384  ;;  %p2892_p6 = scmp.lt.s32.totalorder %s48_s29, %s48_s29 }
  0x2e   :  { %p2888_p5 = scmp.ne.s32.totalorder %s48_s29, %s2887_s0  ;;  %p2893_p7 = scmp.lt.s32.totalorder %s2887_s0, %s2887_s0 }
  0x30   :  { %p2894_p8 = por %p2893_p7, %p2892_p6 }
  0x32   :  { %p2895_p9 = pnand %p2894_p8, %p2888_p5 }
  0x34   :  { %2898 = shalt.err (!%p2895_p9)
}
  0x35   :  { %53 = dma.hbm_to_vmem [thread:$0]  %s3979_s3, 16384, %s48_s29, [#allocation6], %s2955_s1, %s2955_s1, %s2956_s25  }
  0x36   :  { %s2899_s20 = scalar_lea.hbm %s3981_s5, 4096 }
  0x37   :  { %p2900_p10 = scmp.ne.s32.totalorder %s3981_s5, %s2899_s20  ;;  %p2903_p11 = scmp.lt.u32.totalorder %s2899_s20, %s3981_s5 }
  0x39   :  { %p2905_p12 = pnand %p2903_p11, %p2900_p10 }
  0x3b   :  { %2908 = shalt.err (!%p2905_p12)
}
  0x3c   :  { %s2909_s26 = scalar_lea.vmem %s3027_s8, 4096  ;;  %p2914_p0 = scmp.lt.s32.totalorder %s3027_s8, %s3027_s8 }
  0x3d   :  { %p2910_p13 = scmp.ne.s32.totalorder %s3027_s8, %s2909_s26  ;;  %p2915_p1 = scmp.lt.s32.totalorder %s2909_s26, %s2909_s26 }
  0x3f   :  { %p2916_p2 = por %p2915_p1, %p2914_p0 }
  0x41   :  { %p2917_p3 = pnand %p2916_p2, %p2910_p13 }
  0x43   :  { %2920 = shalt.err (!%p2917_p3)
}
  0x44   :  { %s2959_s3 = smov 128   ;;  %s2960_s1 = smov 8  }
  0x45   :  { %67 = dma.hbm_to_vmem [thread:$0]  %s3981_s5, 4096, %s3027_s8, [#allocation9], %s2959_s3, %s2959_s3, %s2960_s1  }
  0x46   :  { %2943 = dma.done.wait [#allocation3], 8192  }
  0x47   :  { %2944 = vsyncadd [#allocation3], 4294959104 }
  0x48   :  { %2945 = dma.done.wait [#allocation6], 32768  }
  0x49   :  { %2946 = vsyncadd [#allocation6], 4294934528 }
  0x4a   :  { %2947 = dma.done.wait [#allocation9], 4096  }
  0x4b   :  { %2948 = vsyncadd [#allocation9], 4294963200  ;;  %v147_v0 = vld [vmem:[#allocation5 + $0x8] sm:$0xff]  ;;  %v146_v2 = vld [vmem:[#allocation5] sm:$0xff] }
  0x4c   :  { %v151_v1 = vld [vmem:[#allocation5 + $0x28] sm:$0xff]  ;;  %v150_v4 = vld [vmem:[#allocation5 + $0x20] sm:$0xff] }
  0x4d   :  { %v2356_v3 = vpack.c.bf16 %v151_v1, %v147_v0  ;;  %v155_v5 = vld [vmem:[#allocation5 + $0x48] sm:$0xff]  ;;  %v2358_v7 = vpack.c.bf16 %v150_v4, %v146_v2  ;;  %v154_v9 = vld [vmem:[#allocation5 + $0x40] sm:$0xff] }
  0x4e   :  { %v159_v6 = vld [vmem:[#allocation5 + $0x68] sm:$0xff]  ;;  %v158_v10 = vld [vmem:[#allocation5 + $0x60] sm:$0xff] }
  0x4f   :  { %v2360_v8 = vpack.c.bf16 %v159_v6, %v155_v5  ;;  %v163_v11 = vld [vmem:[#allocation5 + $0x88] sm:$0xff]  ;;  %2357 = vmatprep.subr.bf16.mxu0 %v2356_v3  ;;  %2660 = vmatprep.subr.bf16.mxu1 %v2356_v3  ;;  %v2362_v13 = vpack.c.bf16 %v158_v10, %v154_v9  ;;  %v162_v15 = vld [vmem:[#allocation5 + $0x80] sm:$0xff] }
  0x50   :  { %v167_v12 = vld [vmem:[#allocation5 + $0xa8] sm:$0xff]  ;;  %2359 = vmatpush1.bf16.msra.mxu0 %v2358_v7  ;;  %2676 = vmatpush1.bf16.msra.mxu1 %v2358_v7  ;;  %v166_v16 = vld [vmem:[#allocation5 + $0xa0] sm:$0xff] }
  0x51   :  { %2361 = vmatprep.subr.bf16.mxu0 %v2360_v8  ;;  %v2364_v14 = vpack.c.bf16 %v167_v12, %v163_v11  ;;  %2661 = vmatprep.subr.bf16.mxu1 %v2360_v8  ;;  %v171_v17 = vld [vmem:[#allocation5 + $0xc8] sm:$0xff]  ;;  %v2366_v19 = vpack.c.bf16 %v166_v16, %v162_v15  ;;  %v170_v21 = vld [vmem:[#allocation5 + $0xc0] sm:$0xff] }
  0x52   :  { %v175_v18 = vld [vmem:[#allocation5 + $0xe8] sm:$0xff]  ;;  %v174_v22 = vld [vmem:[#allocation5 + $0xe0] sm:$0xff] }
  0x53   :  { %v2368_v20 = vpack.c.bf16 %v175_v18, %v171_v17  ;;  %v179_v23 = vld [vmem:[#allocation5 + $0x108] sm:$0xff]  ;;  %v2370_v25 = vpack.c.bf16 %v174_v22, %v170_v21  ;;  %v178_v27 = vld [vmem:[#allocation5 + $0x100] sm:$0xff] }
  0x54   :  { %2363 = vmatpush1.bf16.msra.mxu0 %v2362_v13  ;;  %2677 = vmatpush1.bf16.msra.mxu1 %v2362_v13  ;;  %v183_v24 = vld [vmem:[#allocation5 + $0x128] sm:$0xff]  ;;  %v182_v28 = vld [vmem:[#allocation5 + $0x120] sm:$0xff] }
  0x55   :  { %2365 = vmatprep.subr.bf16.mxu0 %v2364_v14  ;;  %2662 = vmatprep.subr.bf16.mxu1 %v2364_v14  ;;  %v2372_v26 = vpack.c.bf16 %v183_v24, %v179_v23  ;;  %v187_v29 = vld [vmem:[#allocation5 + $0x148] sm:$0xff]  ;;  %v2374_v31 = vpack.c.bf16 %v182_v28, %v178_v27  ;;  %v186_v33 = vld [vmem:[#allocation5 + $0x140] sm:$0xff] }
  0x56   :  { %v191_v30 = vld [vmem:[#allocation5 + $0x168] sm:$0xff]  ;;  %v190_v34 = vld [vmem:[#allocation5 + $0x160] sm:$0xff] }
  0x57   :  { %v2376_v32 = vpack.c.bf16 %v191_v30, %v187_v29  ;;  %v195_v35 = vld [vmem:[#allocation5 + $0x188] sm:$0xff]  ;;  %v2378_v37 = vpack.c.bf16 %v190_v34, %v186_v33  ;;  %v194_v39 = vld [vmem:[#allocation5 + $0x180] sm:$0xff]  ;;  %v149_v33 = vld [vmem:[#allocation5 + $0x18] sm:$0xff] }
  0x58   :  { %2367 = vmatpush1.bf16.msra.mxu0 %v2366_v19  ;;  %2678 = vmatpush1.bf16.msra.mxu1 %v2366_v19  ;;  %v199_v36 = vld [vmem:[#allocation5 + $0x1a8] sm:$0xff]  ;;  %v198_v40 = vld [vmem:[#allocation5 + $0x1a0] sm:$0xff]  ;;  %v153_v34 = vld [vmem:[#allocation5 + $0x38] sm:$0xff] }
  0x59   :  { %2369 = vmatprep.subr.bf16.mxu0 %v2368_v20  ;;  %2663 = vmatprep.subr.bf16.mxu1 %v2368_v20  ;;  %v2380_v38 = vpack.c.bf16 %v199_v36, %v195_v35  ;;  %v3061_v41 = vld [vmem:[#allocation2 + $0x8] sm:$0xff]  ;;  %v2382_v44 = vpack.c.bf16 %v198_v40, %v194_v39  ;;  %v202_v46 = vld [vmem:[#allocation5 + $0x1c0] sm:$0xff]  ;;  %v2420_v36 = vpack.c.bf16 %v153_v34, %v149_v33  ;;  %v157_v39 = vld [vmem:[#allocation5 + $0x58] sm:$0xff] }
  0x5a   :  { %v203_v42 = vld [vmem:[#allocation5 + $0x1c8] sm:$0xff]  ;;  %360 = vmatprep.mubr.f32.mxu0 %v3061_v41  ;;  %v206_v47 = vld [vmem:[#allocation5 + $0x1e0] sm:$0xff]  ;;  %v161_v40 = vld [vmem:[#allocation5 + $0x78] sm:$0xff] }
  0x5b   :  { %v207_v43 = vld [vmem:[#allocation5 + $0x1e8] sm:$0xff]  ;;  %v2386_v50 = vpack.c.bf16 %v206_v47, %v202_v46  ;;  %v210_v52 = vld [vmem:[#allocation5 + $0x200] sm:$0xff]  ;;  %v1197_v46 = vld [vmem:[#allocation7 + $0x18] sm:$0xff] }
  0x5c   :  { %2371 = vmatpush1.bf16.msra.mxu0 %v2370_v25  ;;  %2679 = vmatpush1.bf16.msra.mxu1 %v2370_v25  ;;  %v2384_v45 = vpack.c.bf16 %v207_v43, %v203_v42  ;;  %v211_v48 = vld [vmem:[#allocation5 + $0x208] sm:$0xff]  ;;  %v214_v53 = vld [vmem:[#allocation5 + $0x220] sm:$0xff]  ;;  %v3071_v47 = vld [vmem:[#allocation2 + $0x18] sm:$0xff] }
  0x5d   :  { %2373 = vmatprep.subr.bf16.mxu0 %v2372_v26  ;;  %2664 = vmatprep.subr.bf16.mxu1 %v2372_v26  ;;  %v215_v49 = vld [vmem:[#allocation5 + $0x228] sm:$0xff]  ;;  %v2390_v56 = vpack.c.bf16 %v214_v53, %v210_v52  ;;  %v218_v59 = vld [vmem:[#allocation5 + $0x240] sm:$0xff]  ;;  %v165_v52 = vld [vmem:[#allocation5 + $0x98] sm:$0xff] }
  0x5e   :  { %v2388_v51 = vpack.c.bf16 %v215_v49, %v211_v48  ;;  %v219_v54 = vld [vmem:[#allocation5 + $0x248] sm:$0xff]  ;;  %v222_v60 = vld [vmem:[#allocation5 + $0x260] sm:$0xff]  ;;  %v2424_v48 = vpack.c.bf16 %v161_v40, %v157_v39  ;;  %v156_v49 = vld [vmem:[#allocation5 + $0x50] sm:$0xff] }
  0x5f   :  { %v223_v55 = vld [vmem:[#allocation5 + $0x268] sm:$0xff]  ;;  %v2394_v63 = vpack.c.bf16 %v222_v60, %v218_v59  ;;  %v226_v1 = vld [vmem:[#allocation5 + $0x280] sm:$0xff]  ;;  %v169_v53 = vld [vmem:[#allocation5 + $0xb8] sm:$0xff] }
  0x60   :  { %2375 = vmatpush1.bf16.msra.mxu0 %v2374_v31  ;;  %2680 = vmatpush1.bf16.msra.mxu1 %v2374_v31  ;;  %v3064_v57 = vld [vmem:[#allocation2 + $0x108] sm:$0xff]  ;;  %v2392_v58 = vpack.c.bf16 %v223_v55, %v219_v54  ;;  %v230_v2 = vld [vmem:[#allocation5 + $0x2a0] sm:$0xff]  ;;  %v3080_v59 = vld [vmem:[#allocation2 + $0x110] sm:$0xff] }
  0x61   :  { %2377 = vmatprep.subr.bf16.mxu0 %v2376_v32  ;;  %2665 = vmatprep.subr.bf16.mxu1 %v2376_v32  ;;  %v227_v61 = vld [vmem:[#allocation5 + $0x288] sm:$0xff]  ;;  %v2398_v5 = vpack.c.bf16 %v230_v2, %v226_v1  ;;  %v234_v7 = vld [vmem:[#allocation5 + $0x2c0] sm:$0xff]  ;;  %v173_v2 = vld [vmem:[#allocation5 + $0xd8] sm:$0xff] }
  0x62   :  { %v231_v62 = vld [vmem:[#allocation5 + $0x2a8] sm:$0xff]  ;;  %456 = vmatprep.mubr.f32.mxu1 %v3064_v57  ;;  %v238_v8 = vld [vmem:[#allocation5 + $0x2e0] sm:$0xff]  ;;  %v192_v39 = vld [vmem:[#allocation5 + $0x170] sm:$0xff] }
  0x63   :  { %v2396_v0 = vpack.c.bf16 %v231_v62, %v227_v61  ;;  %v235_v3 = vld [vmem:[#allocation5 + $0x2c8] sm:$0xff]  ;;  %v2402_v11 = vpack.c.bf16 %v238_v8, %v234_v7  ;;  %v242_v13 = vld [vmem:[#allocation5 + $0x300] sm:$0xff]  ;;  %v2428_v62 = vpack.c.bf16 %v169_v53, %v165_v52  ;;  %v3121_v40 = vld [vmem:[#allocation2 + $0x158] sm:$0xff] }
  0x64   :  { %2379 = vmatpush1.bf16.msra.mxu0 %v2378_v37  ;;  %2681 = vmatpush1.bf16.msra.mxu1 %v2378_v37  ;;  %v239_v4 = vld [vmem:[#allocation5 + $0x2e8] sm:$0xff]  ;;  %v246_v14 = vld [vmem:[#allocation5 + $0x320] sm:$0xff]  ;;  %v148_v37 = vld [vmem:[#allocation5 + $0x10] sm:$0xff] }
  0x65   :  { %2381 = vmatprep.subr.bf16.mxu0 %v2380_v38  ;;  %2666 = vmatprep.subr.bf16.mxu1 %v2380_v38  ;;  %v2400_v6 = vpack.c.bf16 %v239_v4, %v235_v3  ;;  %v243_v9 = vld [vmem:[#allocation5 + $0x308] sm:$0xff]  ;;  %v2406_v17 = vpack.c.bf16 %v246_v14, %v242_v13  ;;  %v250_v19 = vld [vmem:[#allocation5 + $0x340] sm:$0xff]  ;;  %v152_v38 = vld [vmem:[#allocation5 + $0x30] sm:$0xff] }
  0x66   :  { %v247_v10 = vld [vmem:[#allocation5 + $0x328] sm:$0xff]  ;;  %v254_v20 = vld [vmem:[#allocation5 + $0x360] sm:$0xff]  ;;  %v177_v3 = vld [vmem:[#allocation5 + $0xf8] sm:$0xff] }
  0x67   :  { %v2404_v12 = vpack.c.bf16 %v247_v10, %v243_v9  ;;  %v251_v15 = vld [vmem:[#allocation5 + $0x348] sm:$0xff]  ;;  %v2410_v23 = vpack.c.bf16 %v254_v20, %v250_v19  ;;  %v258_v25 = vld [vmem:[#allocation5 + $0x380] sm:$0xff]  ;;  %v3094_v10 = vld [vmem:[#allocation2 + $0x38] sm:$0xff] }
  0x68   :  { %2383 = vmatpush1.bf16.msra.mxu0 %v2382_v44  ;;  %2682 = vmatpush1.bf16.msra.mxu1 %v2382_v44  ;;  %v255_v16 = vld [vmem:[#allocation5 + $0x368] sm:$0xff]  ;;  %v262_v26 = vld [vmem:[#allocation5 + $0x3a0] sm:$0xff]  ;;  %v2422_v44 = vpack.c.bf16 %v152_v38, %v148_v37  ;;  %v176_v13 = vld [vmem:[#allocation5 + $0xf0] sm:$0xff] }
  0x69   :  { %2385 = vmatprep.subr.bf16.mxu0 %v2384_v45  ;;  %2667 = vmatprep.subr.bf16.mxu1 %v2384_v45  ;;  %v2408_v18 = vpack.c.bf16 %v255_v16, %v251_v15  ;;  %v259_v21 = vld [vmem:[#allocation5 + $0x388] sm:$0xff]  ;;  %v2414_v29 = vpack.c.bf16 %v262_v26, %v258_v25  ;;  %v266_v31 = vld [vmem:[#allocation5 + $0x3c0] sm:$0xff]  ;;  %v3097_v14 = vld [vmem:[#allocation2 + $0x138] sm:$0xff] }
  0x6a   :  { %v263_v22 = vld [vmem:[#allocation5 + $0x3a8] sm:$0xff]  ;;  %v270_v32 = vld [vmem:[#allocation5 + $0x3e0] sm:$0xff]  ;;  %v181_v15 = vld [vmem:[#allocation5 + $0x118] sm:$0xff] }
  0x6b   :  { %v2412_v24 = vpack.c.bf16 %v263_v22, %v259_v21  ;;  %v267_v27 = vld [vmem:[#allocation5 + $0x3c8] sm:$0xff]  ;;  %v2418_v35 = vpack.c.bf16 %v270_v32, %v266_v31  ;;  %v3067_v42 = vld [vmem:[#allocation2] sm:$0xff]  ;;  %v185_v16 = vld [vmem:[#allocation5 + $0x138] sm:$0xff] }
  0x6c   :  { %2387 = vmatpush1.bf16.msra.mxu0 %v2386_v50  ;;  %2683 = vmatpush1.bf16.msra.mxu1 %v2386_v50  ;;  %v271_v28 = vld [vmem:[#allocation5 + $0x3e8] sm:$0xff]  ;;  %v3069_v43 = vld [vmem:[#allocation2 + $0x100] sm:$0xff]  ;;  %v160_v50 = vld [vmem:[#allocation5 + $0x70] sm:$0xff] }
  0x6d   :  { %2389 = vmatprep.subr.bf16.mxu0 %v2388_v51  ;;  %2668 = vmatprep.subr.bf16.mxu1 %v2388_v51  ;;  %v2416_v30 = vpack.c.bf16 %v271_v28, %v267_v27  ;;  %v1195_v45 = vld [vmem:[#allocation7 + $0x8] sm:$0xff]  ;;  %v3073_v51 = vld [vmem:[#allocation2 + $0x118] sm:$0xff]  ;;  %v1194_v55 = vld [vmem:[#allocation7] sm:$0xff]  ;;  %v2426_v60 = vpack.c.bf16 %v160_v50, %v156_v49 }
  0x6e   :  { %v2484_v54 = vpack.c.bf16 %v1197_v46, %v1195_v45  ;;  %v3082_v61 = vld [vmem:[#allocation2 + $0x28] sm:$0xff]  ;;  %v3090_v7 = vld [vmem:[#allocation2 + $0x20] sm:$0xff]  ;;  %v1200_v19 = vld [vmem:[#allocation7 + $0x30] sm:$0xff] }
  0x6f   :  { %v3085_v1 = vld [vmem:[#allocation2 + $0x128] sm:$0xff]  ;;  %v3092_v8 = vld [vmem:[#allocation2 + $0x120] sm:$0xff]  ;;  %v3102_v20 = vld [vmem:[#allocation2 + $0x30] sm:$0xff] }
  0x70   :  { %2391 = vmatpush1.bf16.msra.mxu0 %v2390_v56  ;;  %2684 = vmatpush1.bf16.msra.mxu1 %v2390_v56  ;;  %v1196_v56 = vld [vmem:[#allocation7 + $0x10] sm:$0xff]  ;;  %v3109_v27 = vld [vmem:[#allocation2 + $0x148] sm:$0xff]  ;;  %v189_v28 = vld [vmem:[#allocation5 + $0x158] sm:$0xff] }
  0x71   :  { %2393 = vmatprep.subr.bf16.mxu0 %v2392_v58  ;;  %2669 = vmatprep.subr.bf16.mxu1 %v2392_v58  ;;  %v3078_v58 = vld [vmem:[#allocation2 + $0x10] sm:$0xff]  ;;  %v2486_v4 = vpack.c.bf16 %v1196_v56, %v1194_v55  ;;  %v1203_v31 = vld [vmem:[#allocation7 + $0x48] sm:$0xff]  ;;  %v1205_v32 = vld [vmem:[#allocation7 + $0x58] sm:$0xff] }
  0x72   :  { %v3104_v21 = vld [vmem:[#allocation2 + $0x130] sm:$0xff]  ;;  %v3114_v33 = vld [vmem:[#allocation2 + $0x40] sm:$0xff]  ;;  %v201_v45 = vld [vmem:[#allocation5 + $0x1b8] sm:$0xff]  ;;  %v2492_v46 = vpack.c.bf16 %v1205_v32, %v1203_v31 }
  0x73   :  { %v180_v25 = vld [vmem:[#allocation5 + $0x110] sm:$0xff]  ;;  %v3116_v34 = vld [vmem:[#allocation2 + $0x140] sm:$0xff] }
  0x74   :  { %2395 = vmatpush1.bf16.msra.mxu0 %v2394_v63  ;;  %2685 = vmatpush1.bf16.msra.mxu1 %v2394_v63  ;;  %v164_v63 = vld [vmem:[#allocation5 + $0x90] sm:$0xff] }
  0x75   :  { %2397 = vmatprep.subr.bf16.mxu0 %v2396_v0  ;;  %2670 = vmatprep.subr.bf16.mxu1 %v2396_v0  ;;  %v168_v0 = vld [vmem:[#allocation5 + $0xb0] sm:$0xff] }
  0x76   :  { %v2430_v9 = vpack.c.bf16 %v168_v0, %v164_v63  ;;  %v184_v26 = vld [vmem:[#allocation5 + $0x130] sm:$0xff]  ;;  %v205_v63 = vld [vmem:[#allocation5 + $0x1d8] sm:$0xff] }
  0x77   :  { %v188_v38 = vld [vmem:[#allocation5 + $0x150] sm:$0xff]  ;;  %v209_v0 = vld [vmem:[#allocation5 + $0x1f8] sm:$0xff] }
  0x78   :  { %2399 = vmatpush1.bf16.msra.mxu0 %v2398_v5  ;;  %2686 = vmatpush1.bf16.msra.mxu1 %v2398_v5  ;;  %v1199_v5 = vld [vmem:[#allocation7 + $0x28] sm:$0xff]  ;;  %v1204_v49 = vld [vmem:[#allocation7 + $0x50] sm:$0xff]  ;;  %v2442_v53 = vpack.c.bf16 %v192_v39, %v188_v38  ;;  %v225_v38 = vld [vmem:[#allocation5 + $0x278] sm:$0xff] }
  0x79   :  { %2401 = vmatprep.subr.bf16.mxu0 %v2400_v6  ;;  %2671 = vmatprep.subr.bf16.mxu1 %v2400_v6  ;;  %v1201_v6 = vld [vmem:[#allocation7 + $0x38] sm:$0xff]  ;;  %v3126_v50 = vld [vmem:[#allocation2 + $0x50] sm:$0xff] }
  0x7a   :  { %v3128_v52 = vld [vmem:[#allocation2 + $0x150] sm:$0xff] }
  0x7b   :  { %v196_v56 = vld [vmem:[#allocation5 + $0x190] sm:$0xff] }
  0x7c   :  { %2403 = vmatpush1.bf16.msra.mxu0 %v2402_v11  ;;  %2687 = vmatpush1.bf16.msra.mxu1 %v2402_v11  ;;  %v2432_v11 = vpack.c.bf16 %v177_v3, %v173_v2  ;;  %v1207_v3 = vld [vmem:[#allocation7 + $0x68] sm:$0xff]  ;;  %v212_v31 = vld [vmem:[#allocation5 + $0x210] sm:$0xff] }
  0x7d   :  { %2405 = vmatprep.subr.bf16.mxu0 %v2404_v12  ;;  %2672 = vmatprep.subr.bf16.mxu1 %v2404_v12  ;;  %v172_v12 = vld [vmem:[#allocation5 + $0xd0] sm:$0xff] }
  0x7e   :  { %v2434_v22 = vpack.c.bf16 %v176_v13, %v172_v12  ;;  %v2448_v12 = vpack.c.bf16 %v209_v0, %v205_v63  ;;  %v204_v13 = vld [vmem:[#allocation5 + $0x1d0] sm:$0xff]  ;;  %v3169_v63 = vld [vmem:[#allocation2 + $0x198] sm:$0xff] }
  0x7f   :  { %v216_v32 = vld [vmem:[#allocation5 + $0x230] sm:$0xff]  ;;  %4004 = vst [vmem:[#allocation19_spill] sm:$0xff] %v3169_v63  ;;  %v229_v0 = vld [vmem:[#allocation5 + $0x298] sm:$0xff] }
  0x80   :  { %2407 = vmatpush1.bf16.msra.mxu0 %v2406_v17  ;;  %2688 = vmatpush1.bf16.msra.mxu1 %v2406_v17  ;;  %v2488_v17 = vpack.c.bf16 %v1201_v6, %v1199_v5  ;;  %v3138_v5 = vld [vmem:[#allocation2 + $0x60] sm:$0xff] }
  0x81   :  { %2409 = vmatprep.subr.bf16.mxu0 %v2408_v18  ;;  %2673 = vmatprep.subr.bf16.mxu1 %v2408_v18  ;;  %v1198_v18 = vld [vmem:[#allocation7 + $0x20] sm:$0xff] }
  0x82   :  { %v3140_v6 = vld [vmem:[#allocation2 + $0x160] sm:$0xff] }
  0x84   :  { %2411 = vmatpush1.bf16.msra.mxu0 %v2410_v23  ;;  %2689 = vmatpush1.bf16.msra.mxu1 %v2410_v23  ;;  %v3106_v23 = vld [vmem:[#allocation2 + $0x48] sm:$0xff] }
  0x85   :  { %2413 = vmatprep.subr.bf16.mxu0 %v2412_v24  ;;  %2674 = vmatprep.subr.bf16.mxu1 %v2412_v24  ;;  %v2436_v24 = vpack.c.bf16 %v185_v16, %v181_v15  ;;  %v208_v15 = vld [vmem:[#allocation5 + $0x1f0] sm:$0xff]  ;;  %v3145_v16 = vld [vmem:[#allocation2 + $0x178] sm:$0xff] }
  0x86   :  { %4000 = vst [vmem:[#allocation15_spill] sm:$0xff] %v3145_v16 }
  0x88   :  { %2415 = vmatpush1.bf16.msra.mxu0 %v2414_v29  ;;  %2690 = vmatpush1.bf16.msra.mxu1 %v2414_v29  ;;  %v193_v29 = vld [vmem:[#allocation5 + $0x178] sm:$0xff] }
  0x89   :  { %2417 = vmatprep.subr.bf16.mxu0 %v2416_v30  ;;  %2675 = vmatprep.subr.bf16.mxu1 %v2416_v30  ;;  %v2490_v30 = vpack.c.bf16 %v1200_v19, %v1198_v18  ;;  %v2440_v37 = vpack.c.bf16 %v193_v29, %v189_v28  ;;  %v217_v18 = vld [vmem:[#allocation5 + $0x238] sm:$0xff]  ;;  %v2450_v28 = vpack.c.bf16 %v208_v15, %v204_v13  ;;  %v3154_v29 = vld [vmem:[#allocation2 + $0x88] sm:$0xff]  ;;  %v3176_v13 = vld [vmem:[#allocation2 + $0x190] sm:$0xff] }
  0x8a   :  { %4005 = vst [vmem:[#allocation20_spill] sm:$0xff] %v3176_v13 }
  0x8c   :  { %2419 = vmatpush1.bf16.msra.mxu0 %v2418_v35  ;;  %2691 = vmatpush1.bf16.msra.mxu1 %v2418_v35  ;;  %v2438_v35 = vpack.c.bf16 %v184_v26, %v180_v25  ;;  %v3150_v25 = vld [vmem:[#allocation2 + $0x70] sm:$0xff] }
  0x8d   :  { %2421 = vmatprep.subr.bf16.mxu1 %v2420_v36  ;;  %2485 = vmatprep.subr.bf16.mxu0 %v2484_v54  ;;  %v3118_v36 = vld [vmem:[#allocation2 + $0x58] sm:$0xff]  ;;  %v3130_v54 = vld [vmem:[#allocation2 + $0x68] sm:$0xff]  ;;  %v3152_v26 = vld [vmem:[#allocation2 + $0x170] sm:$0xff] }
  0x8e   :  { %4001 = vst [vmem:[#allocation16_spill] sm:$0xff] %v3152_v26 }
  0x8f   :  { %361 = vmatmul.mubr.f32.vlgmr.msra.gmra.mrb[0].mxu0 %v3067_v42  ;;  %457 = vmatmul.mubr.f32.vlgmr.msra.gmra.mrb[0].mxu1 %v3069_v43 }
  0x90   :  { %366 = vmatprep.mubr.f32.mxu0 %v3071_v47  ;;  %2423 = vmatpush1.bf16.msra.mxu1 %v2422_v44  ;;  %v197_v44 = vld [vmem:[#allocation5 + $0x198] sm:$0xff] }
  0x91   :  { %462 = vmatprep.mubr.f32.mxu1 %v3073_v51  ;;  %2425 = vmatprep.subr.bf16.mxu1 %v2424_v48  ;;  %v1202_v48 = vld [vmem:[#allocation7 + $0x40] sm:$0xff]  ;;  %v2444_v55 = vpack.c.bf16 %v201_v45, %v197_v44  ;;  %v1211_v44 = vld [vmem:[#allocation7 + $0x88] sm:$0xff]  ;;  %v1213_v45 = vld [vmem:[#allocation7 + $0x98] sm:$0xff] }
  0x92   :  { %2487 = vmatpush1.bf16.msra.mxu0 %v2486_v4  ;;  %v2494_v2 = vpack.c.bf16 %v1204_v49, %v1202_v48  ;;  %v1209_v4 = vld [vmem:[#allocation7 + $0x78] sm:$0xff]  ;;  %v3164_v48 = vld [vmem:[#allocation2 + $0x180] sm:$0xff]  ;;  %v2454_v49 = vpack.c.bf16 %v216_v32, %v212_v31  ;;  %v1215_v32 = vld [vmem:[#allocation7 + $0xa8] sm:$0xff] }
  0x93   :  { %367 = vmatmul.mubr.f32.gmra.mrb[2].mxu0 %v3078_v58  ;;  %463 = vmatmul.mubr.f32.gmra.mrb[2].mxu1 %v3080_v59  ;;  %v2496_v19 = vpack.c.bf16 %v1209_v4, %v1207_v3  ;;  %4003 = vst [vmem:[#allocation18_spill] sm:$0xff] %v3164_v48  ;;  %v2500_v3 = vpack.c.bf16 %v1213_v45, %v1211_v44  ;;  %v1210_v4 = vld [vmem:[#allocation7 + $0x80] sm:$0xff]  ;;  %v3190_v45 = vld [vmem:[#allocation2 + $0xb8] sm:$0xff] }
  0x94   :  { %372 = vmatprep.mubr.f32.mxu0 %v3082_v61  ;;  %2427 = vmatpush1.bf16.msra.mxu1 %v2426_v60  ;;  %v200_v60 = vld [vmem:[#allocation5 + $0x1b0] sm:$0xff] }
  0x95   :  { %468 = vmatprep.mubr.f32.mxu1 %v3085_v1  ;;  %2429 = vmatprep.subr.bf16.mxu1 %v2428_v62  ;;  %v3133_v62 = vld [vmem:[#allocation2 + $0x168] sm:$0xff] }
  0x96   :  { %2489 = vmatprep.subr.bf16.mxu0 %v2488_v17  ;;  %v213_v17 = vld [vmem:[#allocation5 + $0x218] sm:$0xff] }
  0x97   :  { %373 = vmatmul.mubr.f32.gmra.mrb[4].mxu0 %v3090_v7  ;;  %469 = vmatmul.mubr.f32.gmra.mrb[4].mxu1 %v3092_v8 }
  0x98   :  { %378 = vmatprep.mubr.f32.mxu0 %v3094_v10  ;;  %2431 = vmatpush1.bf16.msra.mxu1 %v2430_v9  ;;  %v2446_v9 = vpack.c.bf16 %v200_v60, %v196_v56  ;;  %v220_v56 = vld [vmem:[#allocation5 + $0x250] sm:$0xff] }
  0x99   :  { %474 = vmatprep.mubr.f32.mxu1 %v3097_v14  ;;  %2433 = vmatprep.subr.bf16.mxu1 %v2432_v11  ;;  %v3142_v11 = vld [vmem:[#allocation2 + $0x78] sm:$0xff]  ;;  %v224_v60 = vld [vmem:[#allocation5 + $0x270] sm:$0xff] }
  0x9a   :  { %2491 = vmatpush1.bf16.msra.mxu0 %v2490_v30  ;;  %v2452_v30 = vpack.c.bf16 %v217_v18, %v213_v17  ;;  %v2458_v15 = vpack.c.bf16 %v224_v60, %v220_v56  ;;  %v3178_v17 = vld [vmem:[#allocation2 + $0xa8] sm:$0xff]  ;;  %v240_v56 = vld [vmem:[#allocation5 + $0x2f0] sm:$0xff]  ;;  %v3193_v60 = vld [vmem:[#allocation2 + $0x1b8] sm:$0xff] }
  0x9b   :  { %379 = vmatmul.mubr.f32.gmra.mrb[6].mxu0 %v3102_v20  ;;  %475 = vmatmul.mubr.f32.gmra.mrb[6].mxu1 %v3104_v21  ;;  %4008 = vst [vmem:[#allocation23_spill] sm:$0xff] %v3193_v60 }
  0x9c   :  { %384 = vmatprep.mubr.f32.mxu0 %v3106_v23  ;;  %2435 = vmatpush1.bf16.msra.mxu1 %v2434_v22  ;;  %v1206_v22 = vld [vmem:[#allocation7 + $0x60] sm:$0xff] }
  0x9d   :  { %480 = vmatprep.mubr.f32.mxu1 %v3109_v27  ;;  %2437 = vmatprep.subr.bf16.mxu1 %v2436_v24  ;;  %v1208_v24 = vld [vmem:[#allocation7 + $0x70] sm:$0xff] }
  0x9e   :  { %2493 = vmatprep.subr.bf16.mxu0 %v2492_v46  ;;  %v2498_v39 = vpack.c.bf16 %v1208_v24, %v1206_v22  ;;  %v3162_v46 = vld [vmem:[#allocation2 + $0x80] sm:$0xff]  ;;  %v232_v22 = vld [vmem:[#allocation5 + $0x2b0] sm:$0xff]  ;;  %v3181_v24 = vld [vmem:[#allocation2 + $0x1a8] sm:$0xff] }
  0x9f   :  { %385 = vmatmul.mubr.f32.gmra.mrb[8].mxu0 %v3114_v33  ;;  %481 = vmatmul.mubr.f32.gmra.mrb[8].mxu1 %v3116_v34  ;;  %4006 = vst [vmem:[#allocation21_spill] sm:$0xff] %v3181_v24 }
  0xa0   :  { %390 = vmatprep.mubr.f32.mxu0 %v3118_v36  ;;  %2439 = vmatpush1.bf16.msra.mxu1 %v2438_v35  ;;  %v3157_v35 = vld [vmem:[#allocation2 + $0x188] sm:$0xff] }
  0xa1   :  { %486 = vmatprep.mubr.f32.mxu1 %v3121_v40  ;;  %2441 = vmatprep.subr.bf16.mxu1 %v2440_v37  ;;  %4002 = vst [vmem:[#allocation17_spill] sm:$0xff] %v3157_v35  ;;  %v221_v37 = vld [vmem:[#allocation5 + $0x258] sm:$0xff] }
  0xa2   :  { %2495 = vmatpush1.bf16.msra.mxu0 %v2494_v2  ;;  %v233_v2 = vld [vmem:[#allocation5 + $0x2b8] sm:$0xff] }
  0xa3   :  { %391 = vmatmul.mubr.f32.gmra.mrb[10].mxu0 %v3126_v50  ;;  %487 = vmatmul.mubr.f32.gmra.mrb[10].mxu1 %v3128_v52  ;;  %v2460_v18 = vpack.c.bf16 %v233_v2, %v229_v0  ;;  %v245_v0 = vld [vmem:[#allocation5 + $0x318] sm:$0xff] }
  0xa4   :  { %396 = vmatprep.mubr.f32.mxu0 %v3130_v54  ;;  %2443 = vmatpush1.bf16.msra.mxu1 %v2442_v53  ;;  %v3166_v53 = vld [vmem:[#allocation2 + $0x98] sm:$0xff] }
  0xa5   :  { %492 = vmatprep.mubr.f32.mxu1 %v3133_v62  ;;  %2445 = vmatprep.subr.bf16.mxu1 %v2444_v55  ;;  %v2456_v55 = vpack.c.bf16 %v225_v38, %v221_v37  ;;  %v1217_v37 = vld [vmem:[#allocation7 + $0xb8] sm:$0xff]  ;;  %v3186_v38 = vld [vmem:[#allocation2 + $0xa0] sm:$0xff] }
  0xa6   :  { %2497 = vmatprep.subr.bf16.mxu0 %v2496_v19  ;;  %v228_v19 = vld [vmem:[#allocation5 + $0x290] sm:$0xff]  ;;  %v249_v2 = vld [vmem:[#allocation5 + $0x338] sm:$0xff] }
  0xa7   :  { %397 = vmatmul.mubr.f32.gmra.mrb[12].mxu0 %v3138_v5  ;;  %493 = vmatmul.mubr.f32.gmra.mrb[12].mxu1 %v3140_v6  ;;  %v2462_v44 = vpack.c.bf16 %v232_v22, %v228_v19  ;;  %v3202_v22 = vld [vmem:[#allocation2 + $0xc8] sm:$0xff] }
  0xa8   :  { %402 = vmatprep.mubr.f32.mxu0 %v3142_v11  ;;  %2447 = vmatpush1.bf16.msra.mxu1 %v2446_v9  ;;  %v1212_v9 = vld [vmem:[#allocation7 + $0x90] sm:$0xff] }
  0xa9   :  { %498 = vmatprep.mubr.f32.mxu1 %v3145_v16  ;;  %2449 = vmatprep.subr.bf16.mxu1 %v2448_v12  ;;  %v3174_v12 = vld [vmem:[#allocation2 + $0x90] sm:$0xff]  ;;  %v2502_v31 = vpack.c.bf16 %v1212_v9, %v1210_v4  ;;  %v1214_v4 = vld [vmem:[#allocation7 + $0xa0] sm:$0xff] }
  0xaa   :  { %2499 = vmatpush1.bf16.msra.mxu0 %v2498_v39  ;;  %v3188_v39 = vld [vmem:[#allocation2 + $0x1a0] sm:$0xff]  ;;  %v1216_v9 = vld [vmem:[#allocation7 + $0xb0] sm:$0xff] }
  0xab   :  { %403 = vmatmul.mubr.f32.gmra.mrb[14].mxu0 %v3150_v25  ;;  %499 = vmatmul.mubr.f32.gmra.mrb[14].mxu1 %v3152_v26  ;;  %4007 = vst [vmem:[#allocation22_spill] sm:$0xff] %v3188_v39  ;;  %v1222_v26 = vld [vmem:[#allocation7 + $0xe0] sm:$0xff]  ;;  %v1224_v16 = vld [vmem:[#allocation7 + $0xf0] sm:$0xff] }
  0xac   :  { %408 = vmatprep.mubr.f32.mxu0 %v3154_v29  ;;  %2451 = vmatpush1.bf16.msra.mxu1 %v2450_v28  ;;  %v237_v28 = vld [vmem:[#allocation5 + $0x2d8] sm:$0xff] }
  0xad   :  { %504 = vmatprep.mubr.f32.mxu1 %v3157_v35  ;;  %2453 = vmatprep.subr.bf16.mxu1 %v2452_v30  ;;  %v241_v30 = vld [vmem:[#allocation5 + $0x2f8] sm:$0xff] }
  0xae   :  { %2501 = vmatprep.subr.bf16.mxu0 %v2500_v3  ;;  %v2504_v3 = vpack.c.bf16 %v1217_v37, %v1215_v32  ;;  %v3205_v32 = vld [vmem:[#allocation2 + $0x1c8] sm:$0xff]  ;;  %v253_v37 = vld [vmem:[#allocation5 + $0x358] sm:$0xff] }
  0xaf   :  { %409 = vmatmul.mubr.f32.gmra.mrb[16].mxu0 %v3162_v46  ;;  %505 = vmatmul.mubr.f32.gmra.mrb[16].mxu1 %v3164_v48  ;;  %4010 = vst [vmem:[#allocation25_spill] sm:$0xff] %v3205_v32  ;;  %v273_v48 = vld [vmem:[#allocation5 + $0x3f8] sm:$0xff] }
  0xb0   :  { %414 = vmatprep.mubr.f32.mxu0 %v3166_v53  ;;  %2455 = vmatpush1.bf16.msra.mxu1 %v2454_v49  ;;  %v2464_v49 = vpack.c.bf16 %v241_v30, %v237_v28  ;;  %v2468_v28 = vpack.c.bf16 %v249_v2, %v245_v0  ;;  %v244_v30 = vld [vmem:[#allocation5 + $0x310] sm:$0xff]  ;;  %v3214_v2 = vld [vmem:[#allocation2 + $0xd8] sm:$0xff] }
  0xb1   :  { %510 = vmatprep.mubr.f32.mxu1 %v3169_v63  ;;  %2457 = vmatprep.subr.bf16.mxu1 %v2456_v55  ;;  %v236_v55 = vld [vmem:[#allocation5 + $0x2d0] sm:$0xff] }
  0xb2   :  { %2503 = vmatpush1.bf16.msra.mxu0 %v2502_v31  ;;  %v2466_v19 = vpack.c.bf16 %v240_v56, %v236_v55  ;;  %v248_v31 = vld [vmem:[#allocation5 + $0x330] sm:$0xff]  ;;  %v1221_v55 = vld [vmem:[#allocation7 + $0xd8] sm:$0xff]  ;;  %v3210_v56 = vld [vmem:[#allocation2 + $0xc0] sm:$0xff] }
  0xb3   :  { %415 = vmatmul.mubr.f32.gmra.mrb[18].mxu0 %v3174_v12  ;;  %511 = vmatmul.mubr.f32.gmra.mrb[18].mxu1 %v3176_v13  ;;  %v2470_v0 = vpack.c.bf16 %v248_v31, %v244_v30  ;;  %v265_v13 = vld [vmem:[#allocation5 + $0x3b8] sm:$0xff]  ;;  %v1220_v30 = vld [vmem:[#allocation7 + $0xd0] sm:$0xff] }
  0xb4   :  { %420 = vmatprep.mubr.f32.mxu0 %v3178_v17  ;;  %2459 = vmatpush1.bf16.msra.mxu1 %v2458_v15  ;;  %v3198_v15 = vld [vmem:[#allocation2 + $0xb0] sm:$0xff] }
  0xb5   :  { %516 = vmatprep.mubr.f32.mxu1 %v3181_v24  ;;  %2461 = vmatprep.subr.bf16.mxu1 %v2460_v18  ;;  %v3200_v18 = vld [vmem:[#allocation2 + $0x1b0] sm:$0xff]  ;;  %v2506_v24 = vpack.c.bf16 %v1216_v9, %v1214_v4 }
  0xb6   :  { %4009 = vst [vmem:[#allocation24_spill] sm:$0xff] %v3200_v18  ;;  %2505 = vmatprep.subr.bf16.mxu0 %v2504_v3  ;;  %v252_v4 = vld [vmem:[#allocation5 + $0x350] sm:$0xff] }
  0xb7   :  { %421 = vmatmul.mubr.f32.gmra.mrb[20].mxu0 %v3186_v38  ;;  %517 = vmatmul.mubr.f32.gmra.mrb[20].mxu1 %v3188_v39  ;;  %v257_v39 = vld [vmem:[#allocation5 + $0x378] sm:$0xff]  ;;  %v256_v9 = vld [vmem:[#allocation5 + $0x370] sm:$0xff] }
  0xb8   :  { %426 = vmatprep.mubr.f32.mxu0 %v3190_v45  ;;  %2463 = vmatpush1.bf16.msra.mxu1 %v2462_v44  ;;  %v1219_v44 = vld [vmem:[#allocation7 + $0xc8] sm:$0xff]  ;;  %v2472_v3 = vpack.c.bf16 %v257_v39, %v253_v37  ;;  %v3222_v31 = vld [vmem:[#allocation2 + $0xd0] sm:$0xff] }
  0xb9   :  { %522 = vmatprep.mubr.f32.mxu1 %v3193_v60  ;;  %2465 = vmatprep.subr.bf16.mxu1 %v2464_v49  ;;  %v3212_v49 = vld [vmem:[#allocation2 + $0x1c0] sm:$0xff]  ;;  %v3217_v60 = vld [vmem:[#allocation2 + $0x1d8] sm:$0xff]  ;;  %v2508_v63 = vpack.c.bf16 %v1221_v55, %v1219_v44  ;;  %v3224_v39 = vld [vmem:[#allocation2 + $0x1d0] sm:$0xff] }
  0xba   :  { %4011 = vst [vmem:[#allocation26_spill] sm:$0xff] %v3212_v49  ;;  %4012 = vst [vmem:[#allocation27_spill] sm:$0xff] %v3217_v60  ;;  %2507 = vmatpush1.bf16.msra.mxu0 %v2506_v24  ;;  %v3226_v37 = vld [vmem:[#allocation2 + $0xe8] sm:$0xff]  ;;  %v260_v44 = vld [vmem:[#allocation5 + $0x390] sm:$0xff] }
  0xbb   :  { %427 = vmatmul.mubr.f32.gmra.mrb[22].mxu0 %v3198_v15  ;;  %523 = vmatmul.mubr.f32.gmra.mrb[22].mxu1 %v3200_v18  ;;  %v261_v18 = vld [vmem:[#allocation5 + $0x398] sm:$0xff]  ;;  %4013 = vst [vmem:[#allocation28_spill] sm:$0xff] %v3224_v39  ;;  %v264_v55 = vld [vmem:[#allocation5 + $0x3b0] sm:$0xff] }
  0xbc   :  { %432 = vmatprep.mubr.f32.mxu0 %v3202_v22  ;;  %2467 = vmatpush1.bf16.msra.mxu1 %v2466_v19  ;;  %v1218_v19 = vld [vmem:[#allocation7 + $0xc0] sm:$0xff]  ;;  %v2476_v24 = vpack.c.bf16 %v265_v13, %v261_v18  ;;  %v2478_v18 = vpack.c.bf16 %v264_v55, %v260_v44  ;;  %v1229_v44 = vld [vmem:[#allocation7 + $0x118] sm:$0xff]  ;;  %v3246_v55 = vld [vmem:[#allocation2 + $0xf0] sm:$0xff] }
  0xbd   :  { %528 = vmatprep.mubr.f32.mxu1 %v3205_v32  ;;  %2469 = vmatprep.subr.bf16.mxu1 %v2468_v28  ;;  %v2474_v28 = vpack.c.bf16 %v256_v9, %v252_v4  ;;  %v3229_v32 = vld [vmem:[#allocation2 + $0x1e8] sm:$0xff]  ;;  %v2510_v35 = vpack.c.bf16 %v1220_v30, %v1218_v19  ;;  %v1225_v4 = vld [vmem:[#allocation7 + $0xf8] sm:$0xff]  ;;  %v3234_v9 = vld [vmem:[#allocation2 + $0xe0] sm:$0xff] }
  0xbe   :  { %4014 = vst [vmem:[#allocation29_spill] sm:$0xff] %v3229_v32  ;;  %2509 = vmatprep.subr.bf16.mxu0 %v2508_v63  ;;  %v3236_v13 = vld [vmem:[#allocation2 + $0x1e0] sm:$0xff]  ;;  %v268_v19 = vld [vmem:[#allocation5 + $0x3d0] sm:$0xff] }
  0xbf   :  { %433 = vmatmul.mubr.f32.gmra.mrb[24].mxu0 %v3210_v56  ;;  %529 = vmatmul.mubr.f32.gmra.mrb[24].mxu1 %v3212_v49  ;;  %v269_v49 = vld [vmem:[#allocation5 + $0x3d8] sm:$0xff]  ;;  %4015 = vst [vmem:[#allocation30_spill] sm:$0xff] %v3236_v13  ;;  %v272_v30 = vld [vmem:[#allocation5 + $0x3f0] sm:$0xff] }
  0xc0   :  { %438 = vmatprep.mubr.f32.mxu0 %v3214_v2  ;;  %2471 = vmatpush1.bf16.msra.mxu1 %v2470_v0  ;;  %v1223_v0 = vld [vmem:[#allocation7 + $0xe8] sm:$0xff]  ;;  %v2480_v63 = vpack.c.bf16 %v273_v48, %v269_v49  ;;  %v3248_v48 = vld [vmem:[#allocation2 + $0x1f0] sm:$0xff]  ;;  %v2482_v49 = vpack.c.bf16 %v272_v30, %v268_v19  ;;  %v1230_v30 = vld [vmem:[#allocation7 + $0x120] sm:$0xff] }
  0xc1   :  { %534 = vmatprep.mubr.f32.mxu1 %v3217_v60  ;;  %2473 = vmatprep.subr.bf16.mxu1 %v2472_v3  ;;  %v3238_v3 = vld [vmem:[#allocation2 + $0xf8] sm:$0xff] }
  0xc2   :  { %v3241_v60 = vld [vmem:[#allocation2 + $0x1f8] sm:$0xff]  ;;  %2511 = vmatpush1.bf16.msra.mxu0 %v2510_v35  ;;  %v2514_v35 = vpack.c.bf16 %v1224_v16, %v1222_v26  ;;  %v1235_v16 = vld [vmem:[#allocation7 + $0x148] sm:$0xff] }
  0xc3   :  { %439 = vmatmul.mubr.f32.gmra.mrb[26].mxu0 %v3222_v31  ;;  %535 = vmatmul.mubr.f32.gmra.mrb[26].mxu1 %v3224_v39  ;;  %v2512_v39 = vpack.c.bf16 %v1225_v4, %v1223_v0  ;;  %v1226_v0 = vld [vmem:[#allocation7 + $0x100] sm:$0xff]  ;;  %v1228_v4 = vld [vmem:[#allocation7 + $0x110] sm:$0xff]  ;;  %v1237_v26 = vld [vmem:[#allocation7 + $0x158] sm:$0xff] }
  0xc4   :  { %444 = vmatprep.mubr.f32.mxu0 %v3226_v37  ;;  %2475 = vmatpush1.bf16.msra.mxu1 %v2474_v28  ;;  %v1227_v28 = vld [vmem:[#allocation7 + $0x108] sm:$0xff] }
  0xc5   :  { %540 = vmatprep.mubr.f32.mxu1 %v3229_v32  ;;  %2477 = vmatprep.subr.bf16.mxu1 %v2476_v24  ;;  %v2516_v24 = vpack.c.bf16 %v1229_v44, %v1227_v28  ;;  %v1233_v32 = vld [vmem:[#allocation7 + $0x138] sm:$0xff]  ;;  %v2524_v28 = vpack.c.bf16 %v1237_v26, %v1235_v16  ;;  %v1234_v44 = vld [vmem:[#allocation7 + $0x140] sm:$0xff]  ;;  %v1248_v26 = vld [vmem:[#allocation7 + $0x1b0] sm:$0xff] }
  0xc6   :  { %2513 = vmatprep.subr.bf16.mxu0 %v2512_v39  ;;  %v1246_v16 = vld [vmem:[#allocation7 + $0x1a0] sm:$0xff] }
  0xc7   :  { %445 = vmatmul.mubr.f32.gmra.mrb[28].mxu0 %v3234_v9  ;;  %541 = vmatmul.mubr.f32.gmra.mrb[28].mxu1 %v3236_v13  ;;  %v1231_v13 = vld [vmem:[#allocation7 + $0x128] sm:$0xff] }
  0xc8   :  { %450 = vmatprep.mubr.f32.mxu0 %v3238_v3  ;;  %2479 = vmatpush1.bf16.msra.mxu1 %v2478_v18  ;;  %v2518_v18 = vpack.c.bf16 %v1228_v4, %v1226_v0  ;;  %v2520_v19 = vpack.c.bf16 %v1233_v32, %v1231_v13  ;;  %v1238_v13 = vld [vmem:[#allocation7 + $0x160] sm:$0xff]  ;;  %v1245_v0 = vld [vmem:[#allocation7 + $0x198] sm:$0xff] }
  0xc9   :  { %546 = vmatprep.mubr.f32.mxu1 %v3241_v60  ;;  %2481 = vmatprep.subr.bf16.mxu1 %v2480_v63  ;;  %v1232_v63 = vld [vmem:[#allocation7 + $0x130] sm:$0xff] }
  0xca   :  { %2515 = vmatpush1.bf16.msra.mxu0 %v2514_v35  ;;  %v2522_v39 = vpack.c.bf16 %v1232_v63, %v1230_v30  ;;  %v1241_v35 = vld [vmem:[#allocation7 + $0x178] sm:$0xff] }
  0xcb   :  { %451 = vmatmul.mubr.f32.gmra.mrb[30].mxu0 %v3246_v55  ;;  %547 = vmatmul.mubr.f32.gmra.mrb[30].mxu1 %v3248_v48  ;;  %v1249_v30 = vld [vmem:[#allocation7 + $0x1b8] sm:$0xff] }
  0xcc   :  { %2483 = vmatpush1.bf16.msra.mxu1 %v2482_v49  ;;  %617 = vmatprep.mubr.f32.mxu1 %v3061_v41  ;;  %v1236_v49 = vld [vmem:[#allocation7 + $0x150] sm:$0xff]  ;;  %v1239_v41 = vld [vmem:[#allocation7 + $0x168] sm:$0xff] }
  0xcd   :  { %2517 = vmatprep.subr.bf16.mxu0 %v2516_v24  ;;  %v2526_v32 = vpack.c.bf16 %v1236_v49, %v1234_v44  ;;  %v1240_v24 = vld [vmem:[#allocation7 + $0x170] sm:$0xff]  ;;  %v1250_v44 = vld [vmem:[#allocation7 + $0x1c0] sm:$0xff] }
  0xce   :  { %2519 = vmatpush1.bf16.msra.mxu0 %v2518_v18  ;;  %v2530_v4 = vpack.c.bf16 %v1240_v24, %v1238_v13  ;;  %v1242_v18 = vld [vmem:[#allocation7 + $0x180] sm:$0xff]  ;;  %v1252_v49 = vld [vmem:[#allocation7 + $0x1d0] sm:$0xff]  ;;  %v1259_v13 = vld [vmem:[#allocation7 + $0x208] sm:$0xff] }
  0xcf   :  { %618 = vmatmul.mubr.f32.vlgmr.msra.gmra.mrb[32].mxu1 %v3067_v42  ;;  %2521 = vmatprep.subr.bf16.mxu0 %v2520_v19  ;;  %v2528_v42 = vpack.c.bf16 %v1241_v35, %v1239_v41  ;;  %v1244_v19 = vld [vmem:[#allocation7 + $0x190] sm:$0xff]  ;;  %v1257_v41 = vld [vmem:[#allocation7 + $0x1f8] sm:$0xff]  ;;  %v2542_v35 = vpack.c.bf16 %v1252_v49, %v1250_v44 }
  0xd0   :  { %623 = vmatprep.mubr.f32.mxu1 %v3071_v47  ;;  %v1243_v47 = vld [vmem:[#allocation7 + $0x188] sm:$0xff]  ;;  %v2534_v63 = vpack.c.bf16 %v1244_v19, %v1242_v18  ;;  %v1261_v24 = vld [vmem:[#allocation7 + $0x218] sm:$0xff] }
  0xd2   :  { %2523 = vmatpush1.bf16.msra.mxu0 %v2522_v39  ;;  %v1253_v39 = vld [vmem:[#allocation7 + $0x1d8] sm:$0xff] }
  0xd3   :  { %624 = vmatmul.mubr.f32.gmra.mrb[34].mxu1 %v3078_v58  ;;  %2525 = vmatprep.subr.bf16.mxu0 %v2524_v28  ;;  %v2532_v58 = vpack.c.bf16 %v1245_v0, %v1243_v47  ;;  %v2538_v28 = vpack.c.bf16 %v1248_v26, %v1246_v16 }
  0xd4   :  { %629 = vmatprep.mubr.f32.mxu1 %v3082_v61  ;;  %v1247_v61 = vld [vmem:[#allocation7 + $0x1a8] sm:$0xff] }
  0xd6   :  { %2527 = vmatpush1.bf16.msra.mxu0 %v2526_v32  ;;  %v1254_v32 = vld [vmem:[#allocation7 + $0x1e0] sm:$0xff] }
  0xd7   :  { %630 = vmatmul.mubr.f32.gmra.mrb[36].mxu1 %v3090_v7  ;;  %2529 = vmatprep.subr.bf16.mxu0 %v2528_v42  ;;  %v2536_v7 = vpack.c.bf16 %v1249_v30, %v1247_v61  ;;  %v1256_v42 = vld [vmem:[#allocation7 + $0x1f0] sm:$0xff] }
  0xd8   :  { %635 = vmatprep.mubr.f32.mxu1 %v3094_v10  ;;  %v1251_v10 = vld [vmem:[#allocation7 + $0x1c8] sm:$0xff] }
  0xda   :  { %2531 = vmatpush1.bf16.msra.mxu0 %v2530_v4 }
  0xdb   :  { %636 = vmatmul.mubr.f32.gmra.mrb[38].mxu1 %v3102_v20  ;;  %2533 = vmatprep.subr.bf16.mxu0 %v2532_v58  ;;  %v2540_v20 = vpack.c.bf16 %v1253_v39, %v1251_v10 }
  0xdc   :  { %641 = vmatprep.mubr.f32.mxu1 %v3106_v23  ;;  %v1255_v23 = vld [vmem:[#allocation7 + $0x1e8] sm:$0xff] }
  0xde   :  { %2535 = vmatpush1.bf16.msra.mxu0 %v2534_v63  ;;  %v1262_v63 = vld [vmem:[#allocation7 + $0x220] sm:$0xff] }
  0xdf   :  { %642 = vmatmul.mubr.f32.gmra.mrb[40].mxu1 %v3114_v33  ;;  %2537 = vmatprep.subr.bf16.mxu0 %v2536_v7  ;;  %v2544_v33 = vpack.c.bf16 %v1257_v41, %v1255_v23  ;;  %v1264_v7 = vld [vmem:[#allocation7 + $0x230] sm:$0xff] }
  0xe0   :  { %647 = vmatprep.mubr.f32.mxu1 %v3118_v36  ;;  %v2546_v36 = vpack.c.bf16 %v1256_v42, %v1254_v32 }
  0xe2   :  { %2539 = vmatpush1.bf16.msra.mxu0 %v2538_v28  ;;  %v1267_v28 = vld [vmem:[#allocation7 + $0x248] sm:$0xff] }
  0xe3   :  { %648 = vmatmul.mubr.f32.gmra.mrb[42].mxu1 %v3126_v50  ;;  %2541 = vmatprep.subr.bf16.mxu0 %v2540_v20  ;;  %v2548_v50 = vpack.c.bf16 %v1261_v24, %v1259_v13  ;;  %v1269_v20 = vld [vmem:[#allocation7 + $0x258] sm:$0xff]  ;;  %v1266_v24 = vld [vmem:[#allocation7 + $0x240] sm:$0xff] }
  0xe4   :  { %653 = vmatprep.mubr.f32.mxu1 %v3130_v54  ;;  %v4028_v54 = vld [vmem:[#allocation27_spill] sm:$0xff]  ;;  %v2556_v13 = vpack.c.bf16 %v1269_v20, %v1267_v28 }
  0xe6   :  { %2543 = vmatpush1.bf16.msra.mxu0 %v2542_v35 }
  0xe7   :  { %654 = vmatmul.mubr.f32.gmra.mrb[44].mxu1 %v3138_v5  ;;  %2545 = vmatprep.subr.bf16.mxu0 %v2544_v33  ;;  %v4030_v5 = vld [vmem:[#allocation29_spill] sm:$0xff]  ;;  %v2554_v33 = vpack.c.bf16 %v1264_v7, %v1262_v63 }
  0xe8   :  { %659 = vmatprep.mubr.f32.mxu1 %v3142_v11  ;;  %v276_v11 = vlaneseq }
  0xea   :  { %2547 = vmatpush1.bf16.msra.mxu0 %v2546_v36 }
  0xeb   :  { %660 = vmatmul.mubr.f32.gmra.mrb[46].mxu1 %v3150_v25  ;;  %2549 = vmatprep.subr.bf16.mxu0 %v2548_v50  ;;  %v3317_v25 = vshrl.u32 %v276_v11, 7  ;;  %v1268_v50 = vld [vmem:[#allocation7 + $0x250] sm:$0xff]  ;;  %v1270_v11 = vld [vmem:[#allocation7 + $0x260] sm:$0xff] }
  0xec   :  { %665 = vmatprep.mubr.f32.mxu1 %v3154_v29 }
  0xed   :  { %v278_v29 = vsub.s32 0, %v3317_v25 }
  0xef   :  { %666 = vmatmul.mubr.f32.gmra.mrb[48].mxu1 %v3162_v46  ;;  %v274_v46 = vld [vmem:[%s3978_s2] sm:$0xf] }
  0xf0   :  { %671 = vmatprep.mubr.f32.mxu1 %v3166_v53  ;;  %v282_v53 = vsub.s32 1, %v3317_v25 }
  0xf3   :  { %672 = vmatmul.mubr.f32.gmra.mrb[50].mxu1 %v3174_v12  ;;  %v3326_v12 = vrot.slane %v274_v46, %v278_v29 }
  0xf4   :  { %677 = vmatprep.mubr.f32.mxu1 %v3178_v17  ;;  %v3330_v17 = vrot.slane %v274_v46, %v282_v53  ;;  %v1272_v46 = vld [vmem:[#allocation7 + $0x270] sm:$0xff] }
  0xf7   :  { %678 = vmatmul.mubr.f32.gmra.mrb[52].mxu1 %v3186_v38 }
  0xf8   :  { %683 = vmatprep.mubr.f32.mxu1 %v3190_v45 }
  0xfb   :  { %684 = vmatmul.mubr.f32.gmra.mrb[54].mxu1 %v3198_v15 }
  0xfc   :  { %689 = vmatprep.mubr.f32.mxu1 %v3202_v22 }
  0xff   :  { %690 = vmatmul.mubr.f32.gmra.mrb[56].mxu1 %v3210_v56 }
 0x100   :  { %695 = vmatprep.mubr.f32.mxu1 %v3214_v2 }
 0x103   :  { %696 = vmatmul.mubr.f32.gmra.mrb[58].mxu1 %v3222_v31  ;;  %v1258_v31 = vld [vmem:[#allocation7 + $0x200] sm:$0xff] }
 0x104   :  { %701 = vmatprep.mubr.f32.mxu1 %v3226_v37  ;;  %v1260_v37 = vld [vmem:[#allocation7 + $0x210] sm:$0xff] }
 0x105   :  { %v2550_v58 = vpack.c.bf16 %v1260_v37, %v1258_v31  ;;  %v1277_v31 = vld [vmem:[#allocation7 + $0x298] sm:$0xff] }
 0x107   :  { %702 = vmatmul.mubr.f32.gmra.mrb[60].mxu1 %v3234_v9 }
 0x108   :  { %707 = vmatprep.mubr.f32.mxu1 %v3238_v3  ;;  %v1263_v3 = vld [vmem:[#allocation7 + $0x228] sm:$0xff] }
 0x10b   :  { %708 = vmatmul.mubr.f32.gmra.mrb[62].mxu1 %v3246_v55  ;;  %v1265_v55 = vld [vmem:[#allocation7 + $0x238] sm:$0xff] }
 0x10c   :  { %713 = vmatprep.mubr.f32.mxu1 %v3064_v57  ;;  %v4016_v57 = vld [vmem:[#allocation15_spill] sm:$0xff]  ;;  %v2552_v30 = vpack.c.bf16 %v1265_v55, %v1263_v3 }
 0x10f   :  { %714 = vmatmul.mubr.f32.gmra.mrb[64].mxu1 %v3069_v43  ;;  %v4017_v43 = vld [vmem:[#allocation16_spill] sm:$0xff] }
 0x110   :  { %719 = vmatprep.mubr.f32.mxu1 %v3073_v51  ;;  %v4018_v51 = vld [vmem:[#allocation17_spill] sm:$0xff] }
 0x113   :  { %720 = vmatmul.mubr.f32.gmra.mrb[66].mxu1 %v3080_v59  ;;  %v4019_v59 = vld [vmem:[#allocation18_spill] sm:$0xff] }
 0x114   :  { %725 = vmatprep.mubr.f32.mxu1 %v3085_v1  ;;  %v4020_v1 = vld [vmem:[#allocation19_spill] sm:$0xff] }
 0x117   :  { %726 = vmatmul.mubr.f32.gmra.mrb[68].mxu1 %v3092_v8  ;;  %v4021_v8 = vld [vmem:[#allocation20_spill] sm:$0xff] }
 0x118   :  { %731 = vmatprep.mubr.f32.mxu1 %v3097_v14  ;;  %v4022_v14 = vld [vmem:[#allocation21_spill] sm:$0xff] }
 0x11b   :  { %732 = vmatmul.mubr.f32.gmra.mrb[70].mxu1 %v3104_v21  ;;  %v4023_v21 = vld [vmem:[#allocation22_spill] sm:$0xff] }
 0x11c   :  { %737 = vmatprep.mubr.f32.mxu1 %v3109_v27  ;;  %v4024_v27 = vld [vmem:[#allocation23_spill] sm:$0xff] }
 0x11f   :  { %738 = vmatmul.mubr.f32.gmra.mrb[72].mxu1 %v3116_v34  ;;  %v4025_v34 = vld [vmem:[#allocation24_spill] sm:$0xff] }
 0x120   :  { %743 = vmatprep.mubr.f32.mxu1 %v3121_v40  ;;  %v4026_v40 = vld [vmem:[#allocation25_spill] sm:$0xff] }
 0x123   :  { %744 = vmatmul.mubr.f32.gmra.mrb[74].mxu1 %v3128_v52  ;;  %v4027_v52 = vld [vmem:[#allocation26_spill] sm:$0xff] }
 0x124   :  { %749 = vmatprep.mubr.f32.mxu1 %v3133_v62  ;;  %v4029_v62 = vld [vmem:[#allocation28_spill] sm:$0xff] }
 0x127   :  { %750 = vmatmul.mubr.f32.gmra.mrb[76].mxu1 %v3140_v6  ;;  %v4031_v6 = vld [vmem:[#allocation30_spill] sm:$0xff] }
 0x128   :  { %755 = vmatprep.mubr.f32.mxu1 %v4016_v57 }
 0x12b   :  { %756 = vmatmul.mubr.f32.gmra.mrb[78].mxu1 %v4017_v43 }
 0x12c   :  { %761 = vmatprep.mubr.f32.mxu1 %v4018_v51 }
 0x12f   :  { %762 = vmatmul.mubr.f32.gmra.mrb[80].mxu1 %v4019_v59 }
 0x130   :  { %767 = vmatprep.mubr.f32.mxu1 %v4020_v1  ;;  %v1271_v1 = vld [vmem:[#allocation7 + $0x268] sm:$0xff] }
 0x133   :  { %768 = vmatmul.mubr.f32.gmra.mrb[82].mxu1 %v4021_v8  ;;  %v1273_v8 = vld [vmem:[#allocation7 + $0x278] sm:$0xff] }
 0x134   :  { %773 = vmatprep.mubr.f32.mxu1 %v4022_v14 }
 0x137   :  { %774 = vmatmul.mubr.f32.gmra.mrb[84].mxu1 %v4023_v21 }
 0x138   :  { %779 = vmatprep.mubr.f32.mxu1 %v4024_v27 }
 0x13b   :  { %780 = vmatmul.mubr.f32.gmra.mrb[86].mxu1 %v4025_v34 }
 0x13c   :  { %785 = vmatprep.mubr.f32.mxu1 %v4026_v40 }
 0x13f   :  { %786 = vmatmul.mubr.f32.gmra.mrb[88].mxu1 %v4027_v52  ;;  %v2558_v52 = vpack.c.bf16 %v1268_v50, %v1266_v24  ;;  %v1280_v24 = vld [vmem:[#allocation7 + $0x2b0] sm:$0xff] }
 0x140   :  { %791 = vmatprep.mubr.f32.mxu1 %v4028_v54 }
 0x143   :  { %792 = vmatmul.mubr.f32.gmra.mrb[90].mxu1 %v4029_v62 }
 0x144   :  { %797 = vmatprep.mubr.f32.mxu1 %v4030_v5 }
 0x147   :  { %798 = vmatmul.mubr.f32.gmra.mrb[92].mxu1 %v4031_v6  ;;  %v2560_v6 = vpack.c.bf16 %v1273_v8, %v1271_v1  ;;  %v1283_v1 = vld [vmem:[#allocation7 + $0x2c8] sm:$0xff]  ;;  %v1285_v8 = vld [vmem:[#allocation7 + $0x2d8] sm:$0xff] }
 0x148   :  { %803 = vmatprep.mubr.f32.mxu1 %v3241_v60 }
 0x14b   :  { %804 = vmatmul.mubr.f32.gmra.mrb[94].mxu1 %v3248_v48 }
 0x162   :  { %v362_v38 = vpop.f32.mrb[0].mxu0  ;;  %v458_v45 = vpop.f32.mrb[0].mxu1 }
 0x163   :  { %v363_v60 = vadd.f32 %v362_v38, %v3326_v12  ;;  %v364_v15 = vpop.f32.mrb[1].mxu0  ;;  %v3334_v22 = vadd.f32 %v458_v45, %v3326_v12  ;;  %v3336_v56 = vpop.f32.mrb[1].mxu1 }
 0x164   :  { %v365_v2 = vadd.f32 %v364_v15, %v3330_v17 }
 0x165   :  { %v938_v9 = vmul.f32 0.01, %v363_v60  ;;  %vm810_vm0 = vcmp.gt.f32.partialorder %v363_v60, 0.0 }
 0x166   :  { %v939_v48 = vmul.f32 0.01, %v365_v2  ;;  %v368_v47 = vpop.f32.mrb[2].mxu0  ;;  %vm811_vm1 = vcmp.gt.f32.partialorder %v365_v2, 0.0  ;;  %v464_v18 = vpop.f32.mrb[2].mxu1 }
 0x167   :  { %v369_v0 = vadd.f32 %v368_v47, %v3326_v12  ;;  %v370_v4 = vpop.f32.mrb[3].mxu0  ;;  %v3342_v16 = vadd.f32 %v464_v18, %v3326_v12  ;;  %v466_v26 = vpop.f32.mrb[3].mxu1  ;;  %v1066_v10 = vsel %vm810_vm0, %v363_v60, %v938_v9  ;;  %v2562_v47 = vpack.c.bf16 %v1272_v46, %v1270_v11  ;;  %v1282_v46 = vld [vmem:[#allocation7 + $0x2c0] sm:$0xff] }
 0x168   :  { %v371_v19 = vadd.f32 %v370_v4, %v3330_v17  ;;  %v1067_v61 = vsel %vm811_vm1, %v365_v2, %v939_v48  ;;  %v3345_v44 = vadd.f32 %v466_v26, %v3330_v17  ;;  %v1275_v2 = vld [vmem:[#allocation7 + $0x288] sm:$0xff]  ;;  %v2572_v11 = vpack.c.bf16 %v1285_v8, %v1283_v1  ;;  %v1290_v1 = vld [vmem:[#allocation7 + $0x300] sm:$0xff]  ;;  %v1292_v8 = vld [vmem:[#allocation7 + $0x310] sm:$0xff] }
 0x169   :  { %v942_v39 = vmul.f32 0.01, %v369_v0  ;;  %1398 = vmatprep.mubr.f32.mxu0 %v1067_v61  ;;  %vm814_vm3 = vcmp.gt.f32.partialorder %v369_v0, 0.0  ;;  %v2564_v18 = vpack.c.bf16 %v1277_v31, %v1275_v2  ;;  %v1276_v61 = vld [vmem:[#allocation7 + $0x290] sm:$0xff] }
 0x16a   :  { %v943_v49 = vmul.f32 0.01, %v371_v19  ;;  %v374_v23 = vpop.f32.mrb[4].mxu0  ;;  %1399 = vmatmul.mubr.f32.vlgmr.msra.gmra.mrb[32].mxu0 %v1066_v10  ;;  %vm815_vm2 = vcmp.gt.f32.partialorder %v371_v19, 0.0  ;;  %v470_v32 = vpop.f32.mrb[4].mxu1  ;;  %v1279_v10 = vld [vmem:[#allocation7 + $0x2a8] sm:$0xff] }
 0x16b   :  { %v375_v41 = vadd.f32 %v374_v23, %v3326_v12  ;;  %2551 = vmatpush1.bf16.msra.mxu0 %v2550_v58  ;;  %v376_v35 = vpop.f32.mrb[5].mxu0  ;;  %v3350_v57 = vadd.f32 %v470_v32, %v3326_v12  ;;  %v472_v43 = vpop.f32.mrb[5].mxu1  ;;  %v1070_v59 = vsel %vm814_vm3, %v369_v0, %v942_v39  ;;  %v1281_v39 = vld [vmem:[#allocation7 + $0x2b8] sm:$0xff] }
 0x16c   :  { %v377_v42 = vadd.f32 %v376_v35, %v3330_v17  ;;  %v1071_v36 = vsel %vm815_vm2, %v371_v19, %v943_v49  ;;  %2553 = vmatprep.subr.bf16.mxu0 %v2552_v30  ;;  %v3354_v14 = vadd.f32 %v472_v43, %v3330_v17  ;;  %v1274_v19 = vld [vmem:[#allocation7 + $0x280] sm:$0xff] }
 0x16d   :  { %v946_v51 = vmul.f32 0.01, %v375_v41  ;;  %1404 = vmatprep.mubr.f32.mxu0 %v1071_v36  ;;  %vm818_vm5 = vcmp.gt.f32.partialorder %v375_v41, 0.0  ;;  %v2566_v35 = vpack.c.bf16 %v1276_v61, %v1274_v19  ;;  %v2568_v36 = vpack.c.bf16 %v1281_v39, %v1279_v10 }
 0x16e   :  { %v947_v21 = vmul.f32 0.01, %v377_v42  ;;  %v380_v27 = vpop.f32.mrb[6].mxu0  ;;  %1405 = vmatmul.mubr.f32.gmra.mrb[34].mxu0 %v1070_v59  ;;  %vm819_vm4 = vcmp.gt.f32.partialorder %v377_v42, 0.0  ;;  %v476_v54 = vpop.f32.mrb[6].mxu1 }
 0x16f   :  { %v381_v34 = vadd.f32 %v380_v27, %v3326_v12  ;;  %v382_v40 = vpop.f32.mrb[7].mxu0  ;;  %2555 = vmatpush1.bf16.msra.mxu0 %v2554_v33  ;;  %v3359_v38 = vadd.f32 %v476_v54, %v3326_v12  ;;  %v478_v45 = vpop.f32.mrb[7].mxu1  ;;  %v1074_v15 = vsel %vm818_vm5, %v375_v41, %v946_v51 }
 0x170   :  { %v383_v62 = vadd.f32 %v382_v40, %v3330_v17  ;;  %v1075_v5 = vsel %vm819_vm4, %v377_v42, %v947_v21  ;;  %2557 = vmatprep.subr.bf16.mxu0 %v2556_v13  ;;  %v3363_v37 = vadd.f32 %v478_v45, %v3330_v17  ;;  %v1278_v13 = vld [vmem:[#allocation7 + $0x2a0] sm:$0xff]  ;;  %v1284_v45 = vld [vmem:[#allocation7 + $0x2d0] sm:$0xff] }
 0x171   :  { %v950_v60 = vmul.f32 0.01, %v381_v34  ;;  %1410 = vmatprep.mubr.f32.mxu0 %v1075_v5  ;;  %vm822_vm7 = vcmp.gt.f32.partialorder %v381_v34, 0.0  ;;  %v2570_v54 = vpack.c.bf16 %v1280_v24, %v1278_v13 }
 0x172   :  { %v951_v9 = vmul.f32 0.01, %v383_v62  ;;  %v386_v3 = vpop.f32.mrb[8].mxu0  ;;  %1411 = vmatmul.mubr.f32.gmra.mrb[36].mxu0 %v1074_v15  ;;  %vm823_vm6 = vcmp.gt.f32.partialorder %v383_v62, 0.0  ;;  %v482_v0 = vpop.f32.mrb[8].mxu1 }
 0x173   :  { %v387_v55 = vadd.f32 %v386_v3, %v3326_v12  ;;  %v388_v48 = vpop.f32.mrb[9].mxu0  ;;  %2559 = vmatpush1.bf16.msra.mxu0 %v2558_v52  ;;  %v3368_v30 = vadd.f32 %v482_v0, %v3326_v12  ;;  %v484_v63 = vpop.f32.mrb[9].mxu1  ;;  %v1078_v26 = vsel %vm822_vm7, %v381_v34, %v950_v60  ;;  %v1289_v3 = vld [vmem:[#allocation7 + $0x2f8] sm:$0xff] }
 0x174   :  { %v389_v4 = vadd.f32 %v388_v48, %v3330_v17  ;;  %v1079_v58 = vsel %vm823_vm6, %v383_v62, %v951_v9  ;;  %2561 = vmatprep.subr.bf16.mxu0 %v2560_v6  ;;  %v3372_v28 = vadd.f32 %v484_v63, %v3330_v17  ;;  %v1287_v9 = vld [vmem:[#allocation7 + $0x2e8] sm:$0xff] }
 0x175   :  { %v954_v7 = vmul.f32 0.01, %v387_v55  ;;  %1416 = vmatprep.mubr.f32.mxu0 %v1079_v58  ;;  %vm826_vm9 = vcmp.gt.f32.partialorder %v387_v55, 0.0  ;;  %v2574_v58 = vpack.c.bf16 %v1284_v45, %v1282_v46  ;;  %v2576_v63 = vpack.c.bf16 %v1289_v3, %v1287_v9 }
 0x176   :  { %v955_v20 = vmul.f32 0.01, %v389_v4  ;;  %v392_v49 = vpop.f32.mrb[10].mxu0  ;;  %1417 = vmatmul.mubr.f32.gmra.mrb[38].mxu0 %v1078_v26  ;;  %vm827_vm8 = vcmp.gt.f32.partialorder %v389_v4, 0.0  ;;  %v488_v33 = vpop.f32.mrb[10].mxu1  ;;  %v1288_v26 = vld [vmem:[#allocation7 + $0x2f0] sm:$0xff] }
 0x177   :  { %v393_v23 = vadd.f32 %v392_v49, %v3326_v12  ;;  %v394_v41 = vpop.f32.mrb[11].mxu0  ;;  %2563 = vmatpush1.bf16.msra.mxu0 %v2562_v47  ;;  %v3377_v50 = vadd.f32 %v488_v33, %v3326_v12  ;;  %v490_v43 = vpop.f32.mrb[11].mxu1  ;;  %v1082_v59 = vsel %vm826_vm9, %v387_v55, %v954_v7  ;;  %v1286_v7 = vld [vmem:[#allocation7 + $0x2e0] sm:$0xff] }
 0x178   :  { %v395_v32 = vadd.f32 %v394_v41, %v3330_v17  ;;  %v1083_v42 = vsel %vm827_vm8, %v389_v4, %v955_v20  ;;  %2565 = vmatprep.subr.bf16.mxu0 %v2564_v18  ;;  %v3381_v21 = vadd.f32 %v490_v43, %v3330_v17  ;;  %v1293_v41 = vld [vmem:[#allocation7 + $0x318] sm:$0xff]  ;;  %v2578_v13 = vpack.c.bf16 %v1288_v26, %v1286_v7 }
 0x179   :  { %v958_v51 = vmul.f32 0.01, %v393_v23  ;;  %1422 = vmatprep.mubr.f32.mxu0 %v1083_v42  ;;  %vm830_vm11 = vcmp.gt.f32.partialorder %v393_v23, 0.0 }
 0x17a   :  { %v959_v27 = vmul.f32 0.01, %v395_v32  ;;  %v398_v34 = vpop.f32.mrb[12].mxu0  ;;  %1423 = vmatmul.mubr.f32.gmra.mrb[40].mxu0 %v1082_v59  ;;  %vm831_vm10 = vcmp.gt.f32.partialorder %v395_v32, 0.0  ;;  %v494_v62 = vpop.f32.mrb[12].mxu1 }
 0x17b   :  { %v399_v40 = vadd.f32 %v398_v34, %v3326_v12  ;;  %v400_v52 = vpop.f32.mrb[13].mxu0  ;;  %2567 = vmatpush1.bf16.msra.mxu0 %v2566_v35  ;;  %v3386_v60 = vadd.f32 %v494_v62, %v3326_v12  ;;  %v496_v15 = vpop.f32.mrb[13].mxu1  ;;  %v1086_v31 = vsel %vm830_vm11, %v393_v23, %v958_v51  ;;  %v1291_v23 = vld [vmem:[#allocation7 + $0x308] sm:$0xff]  ;;  %v1297_v62 = vld [vmem:[#allocation7 + $0x338] sm:$0xff] }
 0x17c   :  { %v401_v5 = vadd.f32 %v400_v52, %v3330_v17  ;;  %v1087_v6 = vsel %vm831_vm10, %v395_v32, %v959_v27  ;;  %2569 = vmatprep.subr.bf16.mxu0 %v2568_v36  ;;  %v3390_v55 = vadd.f32 %v496_v15, %v3330_v17  ;;  %v2580_v59 = vpack.c.bf16 %v1293_v41, %v1291_v23 }
 0x17d   :  { %v962_v2 = vmul.f32 0.01, %v399_v40  ;;  %1428 = vmatprep.mubr.f32.mxu0 %v1087_v6  ;;  %vm834_vm13 = vcmp.gt.f32.partialorder %v399_v40, 0.0  ;;  %v2582_v15 = vpack.c.bf16 %v1292_v8, %v1290_v1  ;;  %v1305_v1 = vld [vmem:[#allocation7 + $0x378] sm:$0xff] }
 0x17e   :  { %v963_v48 = vmul.f32 0.01, %v401_v5  ;;  %v404_v47 = vpop.f32.mrb[14].mxu0  ;;  %1429 = vmatmul.mubr.f32.gmra.mrb[42].mxu0 %v1086_v31  ;;  %vm835_vm12 = vcmp.gt.f32.partialorder %v401_v5, 0.0  ;;  %v500_v18 = vpop.f32.mrb[14].mxu1 }
 0x17f   :  { %v405_v0 = vadd.f32 %v404_v47, %v3326_v12  ;;  %v406_v4 = vpop.f32.mrb[15].mxu0  ;;  %2571 = vmatpush1.bf16.msra.mxu0 %v2570_v54  ;;  %v3395_v10 = vadd.f32 %v500_v18, %v3326_v12  ;;  %v502_v39 = vpop.f32.mrb[15].mxu1  ;;  %v1090_v49 = vsel %vm834_vm13, %v399_v40, %v962_v2  ;;  %v1295_v54 = vld [vmem:[#allocation7 + $0x328] sm:$0xff]  ;;  %v1296_v47 = vld [vmem:[#allocation7 + $0x330] sm:$0xff] }
 0x180   :  { %v407_v19 = vadd.f32 %v406_v4, %v3330_v17  ;;  %v1091_v61 = vsel %vm835_vm12, %v401_v5, %v963_v48  ;;  %2573 = vmatprep.subr.bf16.mxu0 %v2572_v11  ;;  %v3399_v35 = vadd.f32 %v502_v39, %v3330_v17  ;;  %v2584_v3 = vpack.c.bf16 %v1297_v62, %v1295_v54  ;;  %v1294_v48 = vld [vmem:[#allocation7 + $0x320] sm:$0xff] }
 0x181   :  { %v966_v20 = vmul.f32 0.01, %v405_v0  ;;  %1434 = vmatprep.mubr.f32.mxu0 %v1091_v61  ;;  %vm838_vm15 = vcmp.gt.f32.partialorder %v405_v0, 0.0  ;;  %v1301_v61 = vld [vmem:[#allocation7 + $0x358] sm:$0xff] }
 0x182   :  { %v967_v33 = vmul.f32 0.01, %v407_v19  ;;  %v410_v32 = vpop.f32.mrb[16].mxu0  ;;  %1435 = vmatmul.mubr.f32.gmra.mrb[44].mxu0 %v1090_v49  ;;  %vm839_vm14 = vcmp.gt.f32.partialorder %v407_v19, 0.0  ;;  %v506_v24 = vpop.f32.mrb[16].mxu1  ;;  %v2586_v49 = vpack.c.bf16 %v1296_v47, %v1294_v48  ;;  %v1307_v47 = vld [vmem:[#allocation7 + $0x388] sm:$0xff] }
 0x183   :  { %v411_v42 = vadd.f32 %v410_v32, %v3326_v12  ;;  %v412_v36 = vpop.f32.mrb[17].mxu0  ;;  %2575 = vmatpush1.bf16.msra.mxu0 %v2574_v58  ;;  %v3404_v27 = vadd.f32 %v506_v24, %v3326_v12  ;;  %v508_v34 = vpop.f32.mrb[17].mxu1  ;;  %v1094_v52 = vsel %vm838_vm15, %v405_v0, %v966_v20 }
 0x184   :  { %v413_v43 = vadd.f32 %v412_v36, %v3330_v17  ;;  %v1095_v51 = vsel %vm839_vm14, %v407_v19, %v967_v33  ;;  %2577 = vmatprep.subr.bf16.mxu0 %v2576_v63  ;;  %v3408_v5 = vadd.f32 %v508_v34, %v3330_v17  ;;  %v1299_v19 = vld [vmem:[#allocation7 + $0x348] sm:$0xff]  ;;  %v1300_v36 = vld [vmem:[#allocation7 + $0x350] sm:$0xff] }
 0x185   :  { %v970_v40 = vmul.f32 0.01, %v411_v42  ;;  %1440 = vmatprep.mubr.f32.mxu0 %v1095_v51  ;;  %vm842_vm1 = vcmp.gt.f32.partialorder %v411_v42, 0.0  ;;  %v2588_v32 = vpack.c.bf16 %v1301_v61, %v1299_v19 }
 0x186   :  { %v971_v6 = vmul.f32 0.01, %v413_v43  ;;  %v416_v11 = vpop.f32.mrb[18].mxu0  ;;  %1441 = vmatmul.mubr.f32.gmra.mrb[46].mxu0 %v1094_v52  ;;  %vm843_vm0 = vcmp.gt.f32.partialorder %v413_v43, 0.0  ;;  %v512_v2 = vpop.f32.mrb[18].mxu1 }
 0x187   :  { %v417_v46 = vadd.f32 %v416_v11, %v3326_v12  ;;  %v418_v45 = vpop.f32.mrb[19].mxu0  ;;  %2579 = vmatpush1.bf16.msra.mxu0 %v2578_v13  ;;  %v3413_v0 = vadd.f32 %v512_v2, %v3326_v12  ;;  %v514_v4 = vpop.f32.mrb[19].mxu1  ;;  %v1098_v18 = vsel %vm842_vm1, %v411_v42, %v970_v40  ;;  %v1298_v42 = vld [vmem:[#allocation7 + $0x340] sm:$0xff]  ;;  %v1304_v2 = vld [vmem:[#allocation7 + $0x370] sm:$0xff]  ;;  %vm879_vm1 = vcmp.gt.f32.partialorder %v3345_v44, 0.0 }
 0x188   :  { %v419_v31 = vadd.f32 %v418_v45, %v3330_v17  ;;  %v1099_v9 = vsel %vm843_vm0, %v413_v43, %v971_v6  ;;  %2581 = vmatprep.subr.bf16.mxu0 %v2580_v59  ;;  %v3417_v63 = vadd.f32 %v514_v4, %v3330_v17  ;;  %v1303_v59 = vld [vmem:[#allocation7 + $0x368] sm:$0xff]  ;;  %v2590_v62 = vpack.c.bf16 %v1300_v36, %v1298_v42  ;;  %v1309_v4 = vld [vmem:[#allocation7 + $0x398] sm:$0xff] }
 0x189   :  { %v974_v58 = vmul.f32 0.01, %v417_v46  ;;  %1446 = vmatprep.mubr.f32.mxu0 %v1099_v9  ;;  %vm846_vm3 = vcmp.gt.f32.partialorder %v417_v46, 0.0 }
 0x18a   :  { %v975_v7 = vmul.f32 0.01, %v419_v31  ;;  %v422_v26 = vpop.f32.mrb[20].mxu0  ;;  %1447 = vmatmul.mubr.f32.gmra.mrb[48].mxu0 %v1098_v18  ;;  %vm847_vm2 = vcmp.gt.f32.partialorder %v419_v31, 0.0  ;;  %v518_v23 = vpop.f32.mrb[20].mxu1 }
 0x18b   :  { %v423_v39 = vadd.f32 %v422_v26, %v3326_v12  ;;  %v424_v20 = vpop.f32.mrb[21].mxu0  ;;  %2583 = vmatpush1.bf16.msra.mxu0 %v2582_v15  ;;  %v3422_v13 = vadd.f32 %v518_v23, %v3326_v12  ;;  %v520_v24 = vpop.f32.mrb[21].mxu1  ;;  %v1102_v51 = vsel %vm846_vm3, %v417_v46, %v974_v58  ;;  %v2592_v46 = vpack.c.bf16 %v1305_v1, %v1303_v59  ;;  %v1302_v15 = vld [vmem:[#allocation7 + $0x360] sm:$0xff]  ;;  %v1313_v59 = vld [vmem:[#allocation7 + $0x3b8] sm:$0xff] }
 0x18c   :  { %v425_v41 = vadd.f32 %v424_v20, %v3330_v17  ;;  %v1103_v33 = vsel %vm847_vm2, %v419_v31, %v975_v7  ;;  %2585 = vmatprep.subr.bf16.mxu0 %v2584_v3  ;;  %v3426_v8 = vadd.f32 %v520_v24, %v3330_v17  ;;  %v2594_v26 = vpack.c.bf16 %v1304_v2, %v1302_v15  ;;  %v1312_v15 = vld [vmem:[#allocation7 + $0x3b0] sm:$0xff] }
 0x18d   :  { %v978_v43 = vmul.f32 0.01, %v423_v39  ;;  %1452 = vmatprep.mubr.f32.mxu0 %v1103_v33  ;;  %vm850_vm5 = vcmp.gt.f32.partialorder %v423_v39, 0.0  ;;  %v1308_v33 = vld [vmem:[#allocation7 + $0x390] sm:$0xff]  ;;  %vm874_vm2 = vcmp.gt.f32.partialorder %v3334_v22, 0.0  ;;  %vm883_vm3 = vcmp.gt.f32.partialorder %v3354_v14, 0.0 }
 0x18e   :  { %v979_v34 = vmul.f32 0.01, %v425_v41  ;;  %v428_v40 = vpop.f32.mrb[22].mxu0  ;;  %1453 = vmatmul.mubr.f32.gmra.mrb[50].mxu0 %v1102_v51  ;;  %vm851_vm4 = vcmp.gt.f32.partialorder %v425_v41, 0.0  ;;  %v524_v6 = vpop.f32.mrb[22].mxu1  ;;  %v1311_v51 = vld [vmem:[#allocation7 + $0x3a8] sm:$0xff] }
 0x18f   :  { %v429_v52 = vadd.f32 %v428_v40, %v3326_v12  ;;  %v430_v54 = vpop.f32.mrb[23].mxu0  ;;  %2587 = vmatpush1.bf16.msra.mxu0 %v2586_v49  ;;  %v3431_v31 = vadd.f32 %v524_v6, %v3326_v12  ;;  %v526_v9 = vpop.f32.mrb[23].mxu1  ;;  %v1106_v48 = vsel %vm850_vm5, %v423_v39, %v978_v43  ;;  %v2596_v39 = vpack.c.bf16 %v1309_v4, %v1307_v47  ;;  %v1310_v6 = vld [vmem:[#allocation7 + $0x3a0] sm:$0xff] }
 0x190   :  { %v431_v11 = vadd.f32 %v430_v54, %v3330_v17  ;;  %v1107_v45 = vsel %vm851_vm4, %v425_v41, %v979_v34  ;;  %2589 = vmatprep.subr.bf16.mxu0 %v2588_v32  ;;  %v3435_v58 = vadd.f32 %v526_v9, %v3330_v17  ;;  %v1306_v41 = vld [vmem:[#allocation7 + $0x380] sm:$0xff]  ;;  %vm878_vm4 = vcmp.gt.f32.partialorder %v3342_v16, 0.0 }
 0x191   :  { %v982_v3 = vmul.f32 0.01, %v429_v52  ;;  %1458 = vmatprep.mubr.f32.mxu0 %v1107_v45  ;;  %vm854_vm7 = vcmp.gt.f32.partialorder %v429_v52, 0.0  ;;  %vm887_vm5 = vcmp.gt.f32.partialorder %v3363_v37, 0.0 }
 0x192   :  { %v983_v18 = vmul.f32 0.01, %v431_v11  ;;  %v434_v19 = vpop.f32.mrb[24].mxu0  ;;  %1459 = vmatmul.mubr.f32.gmra.mrb[52].mxu0 %v1106_v48  ;;  %vm855_vm6 = vcmp.gt.f32.partialorder %v431_v11, 0.0  ;;  %v530_v20 = vpop.f32.mrb[24].mxu1  ;;  %v1317_v48 = vld [vmem:[#allocation7 + $0x3d8] sm:$0xff] }
 0x193   :  { %v435_v61 = vadd.f32 %v434_v19, %v3326_v12  ;;  %v436_v7 = vpop.f32.mrb[25].mxu0  ;;  %2591 = vmatpush1.bf16.msra.mxu0 %v2590_v62  ;;  %v3440_v32 = vadd.f32 %v530_v20, %v3326_v12  ;;  %v532_v42 = vpop.f32.mrb[25].mxu1  ;;  %v1110_v24 = vsel %vm854_vm7, %v429_v52, %v982_v3  ;;  %v2598_v62 = vpack.c.bf16 %v1308_v33, %v1306_v41  ;;  %v1315_v3 = vld [vmem:[#allocation7 + $0x3c8] sm:$0xff]  ;;  %v1314_v41 = vld [vmem:[#allocation7 + $0x3c0] sm:$0xff] }
 0x194   :  { %v437_v49 = vadd.f32 %v436_v7, %v3330_v17  ;;  %v1111_v23 = vsel %vm855_vm6, %v431_v11, %v983_v18  ;;  %2593 = vmatprep.subr.bf16.mxu0 %v2592_v46  ;;  %v3444_v43 = vadd.f32 %v532_v42, %v3330_v17  ;;  %v2600_v46 = vpack.c.bf16 %v1313_v59, %v1311_v51  ;;  %v1316_v51 = vld [vmem:[#allocation7 + $0x3d0] sm:$0xff]  ;;  %v1319_v59 = vld [vmem:[#allocation7 + $0x3e8] sm:$0xff] }
 0x195   :  { %v986_v36 = vmul.f32 0.01, %v435_v61  ;;  %1464 = vmatprep.mubr.f32.mxu0 %v1111_v23  ;;  %vm858_vm9 = vcmp.gt.f32.partialorder %v435_v61, 0.0  ;;  %vm882_vm6 = vcmp.gt.f32.partialorder %v3350_v57, 0.0  ;;  %vm891_vm7 = vcmp.gt.f32.partialorder %v3372_v28, 0.0 }
 0x196   :  { %v987_v1 = vmul.f32 0.01, %v437_v49  ;;  %v440_v34 = vpop.f32.mrb[26].mxu0  ;;  %1465 = vmatmul.mubr.f32.gmra.mrb[54].mxu0 %v1110_v24  ;;  %vm859_vm8 = vcmp.gt.f32.partialorder %v437_v49, 0.0  ;;  %v536_v11 = vpop.f32.mrb[26].mxu1 }
 0x197   :  { %v441_v40 = vadd.f32 %v440_v34, %v3326_v12  ;;  %v442_v54 = vpop.f32.mrb[27].mxu0  ;;  %2595 = vmatpush1.bf16.msra.mxu0 %v2594_v26  ;;  %v3449_v2 = vadd.f32 %v536_v11, %v3326_v12  ;;  %v538_v9 = vpop.f32.mrb[27].mxu1  ;;  %v1114_v4 = vsel %vm858_vm9, %v435_v61, %v986_v36  ;;  %v461_v61 = vadd.f32 %v3336_v56, %v3330_v17 }
 0x198   :  { %v443_v45 = vadd.f32 %v442_v54, %v3330_v17  ;;  %v1115_v52 = vsel %vm859_vm8, %v437_v49, %v987_v1  ;;  %2597 = vmatprep.subr.bf16.mxu0 %v2596_v39  ;;  %v3453_v18 = vadd.f32 %v538_v9, %v3330_v17  ;;  %v2602_v49 = vpack.c.bf16 %v1312_v15, %v1310_v6  ;;  %v1321_v1 = vld [vmem:[#allocation7 + $0x3f8] sm:$0xff] }
 0x199   :  { %v990_v47 = vmul.f32 0.01, %v441_v40  ;;  %1470 = vmatprep.mubr.f32.mxu0 %v1115_v52  ;;  %vm862_vm11 = vcmp.gt.f32.partialorder %v441_v40, 0.0  ;;  %v2604_v39 = vpack.c.bf16 %v1317_v48, %v1315_v3  ;;  %v2606_v52 = vpack.c.bf16 %v1316_v51, %v1314_v41 }
 0x19a   :  { %v991_v19 = vmul.f32 0.01, %v443_v45  ;;  %v446_v7 = vpop.f32.mrb[28].mxu0  ;;  %1471 = vmatmul.mubr.f32.gmra.mrb[56].mxu0 %v1114_v4  ;;  %vm863_vm10 = vcmp.gt.f32.partialorder %v443_v45, 0.0  ;;  %v542_v23 = vpop.f32.mrb[28].mxu1  ;;  %v2608_v15 = vpack.c.bf16 %v1321_v1, %v1319_v59  ;;  %v1318_v4 = vld [vmem:[#allocation7 + $0x3e0] sm:$0xff] }
 0x19b   :  { %v447_v26 = vadd.f32 %v446_v7, %v3326_v12  ;;  %v448_v20 = vpop.f32.mrb[29].mxu0  ;;  %2599 = vmatpush1.bf16.msra.mxu0 %v2598_v62  ;;  %v3460_v36 = vadd.f32 %v542_v23, %v3326_v12  ;;  %v544_v24 = vpop.f32.mrb[29].mxu1  ;;  %v1118_v54 = vsel %vm862_vm11, %v441_v40, %v990_v47  ;;  %v1003_v3 = vmul.f32 0.01, %v461_v61 }
 0x19c   :  { %v449_v33 = vadd.f32 %v448_v20, %v3330_v17  ;;  %v1119_v42 = vsel %vm863_vm10, %v443_v45, %v991_v19  ;;  %2601 = vmatprep.subr.bf16.mxu0 %v2600_v46  ;;  %v3464_v62 = vadd.f32 %v544_v24, %v3330_v17  ;;  %v1320_v19 = vld [vmem:[#allocation7 + $0x3f0] sm:$0xff]  ;;  %vm875_vm14 = vcmp.gt.f32.partialorder %v461_v61, 0.0 }
 0x19d   :  { %v994_v34 = vmul.f32 0.01, %v447_v26  ;;  %1476 = vmatprep.mubr.f32.mxu0 %v1119_v42  ;;  %vm866_vm13 = vcmp.gt.f32.partialorder %v447_v26, 0.0  ;;  %v1131_v24 = vsel %vm875_vm14, %v461_v61, %v1003_v3  ;;  %v1011_v1 = vmul.f32 0.01, %v3354_v14 }
 0x19e   :  { %v995_v6 = vmul.f32 0.01, %v449_v33  ;;  %v452_v11 = vpop.f32.mrb[30].mxu0  ;;  %1477 = vmatmul.mubr.f32.gmra.mrb[58].mxu0 %v1118_v54  ;;  %vm867_vm12 = vcmp.gt.f32.partialorder %v449_v33, 0.0  ;;  %v548_v46 = vpop.f32.mrb[30].mxu1  ;;  %vm886_vm8 = vcmp.gt.f32.partialorder %v3359_v38, 0.0 }
 0x19f   :  { %v453_v56 = vadd.f32 %v452_v11, %v3326_v12  ;;  %v454_v45 = vpop.f32.mrb[31].mxu0  ;;  %2603 = vmatpush1.bf16.msra.mxu0 %v2602_v49  ;;  %v3469_v40 = vadd.f32 %v548_v46, %v3326_v12  ;;  %v550_v47 = vpop.f32.mrb[31].mxu1  ;;  %v1122_v20 = vsel %vm866_vm13, %v447_v26, %v994_v34  ;;  %v1002_v26 = vmul.f32 0.01, %v3334_v22 }
 0x1a0   :  { %v455_v9 = vadd.f32 %v454_v45, %v3330_v17  ;;  %v1123_v48 = vsel %vm867_vm12, %v449_v33, %v995_v6  ;;  %2605 = vmatprep.subr.bf16.mxu0 %v2604_v39  ;;  %v3473_v49 = vadd.f32 %v550_v47, %v3330_v17  ;;  %v2610_v39 = vpack.c.bf16 %v1320_v19, %v1318_v4 }
 0x1a1   :  { %v998_v7 = vmul.f32 0.01, %v453_v56  ;;  %1482 = vmatprep.mubr.f32.mxu0 %v1123_v48  ;;  %vm870_vm0 = vcmp.gt.f32.partialorder %v453_v56, 0.0  ;;  %v1007_v33 = vmul.f32 0.01, %v3345_v44  ;;  %v1130_v54 = vsel %vm874_vm2, %v3334_v22, %v1002_v26 }
 0x1a2   :  { %v999_v23 = vmul.f32 0.01, %v455_v9  ;;  %1483 = vmatmul.mubr.f32.gmra.mrb[60].mxu0 %v1122_v20  ;;  %vm871_vm15 = vcmp.gt.f32.partialorder %v455_v9, 0.0  ;;  %v3475_v41 = vpop.f32.mrb[32].mxu1  ;;  %v1006_v34 = vmul.f32 0.01, %v3342_v16  ;;  %v1139_v45 = vsel %vm883_vm3, %v3354_v14, %v1011_v1 }
 0x1a3   :  { %2607 = vmatpush1.bf16.msra.mxu0 %v2606_v52  ;;  %v3477_v12 = vpop.f32.mrb[33].mxu1  ;;  %v1126_v17 = vsel %vm870_vm0, %v453_v56, %v998_v7  ;;  %v1135_v61 = vsel %vm879_vm1, %v3345_v44, %v1007_v33  ;;  %v1015_v56 = vmul.f32 0.01, %v3363_v37  ;;  %v1010_v44 = vmul.f32 0.01, %v3350_v57 }
 0x1a4   :  { %v1127_v42 = vsel %vm871_vm15, %v455_v9, %v999_v23  ;;  %2609 = vmatprep.subr.bf16.mxu0 %v2608_v15  ;;  %v1134_v52 = vsel %vm878_vm4, %v3342_v16, %v1006_v34  ;;  %v1019_v15 = vmul.f32 0.01, %v3372_v28  ;;  %v1014_v14 = vmul.f32 0.01, %v3359_v38 }
 0x1a5   :  { %1488 = vmatprep.mubr.f32.mxu0 %v1127_v42  ;;  %v1143_v9 = vsel %vm887_vm5, %v3363_v37, %v1015_v56  ;;  %v1138_v3 = vsel %vm882_vm6, %v3350_v57, %v1010_v44  ;;  %v1023_v47 = vmul.f32 0.01, %v3381_v21  ;;  %v1018_v37 = vmul.f32 0.01, %v3368_v30  ;;  %v2040_v56 = vld [vmem:[#allocation8] sm:$0xff] }
 0x1a6   :  { %1489 = vmatmul.mubr.f32.gmra.mrb[62].mxu0 %v1126_v17  ;;  %v3483_v51 = vpop.f32.mrb[34].mxu1  ;;  %v1147_v4 = vsel %vm891_vm7, %v3372_v28, %v1019_v15  ;;  %v1142_v19 = vsel %vm886_vm8, %v3359_v38, %v1014_v14  ;;  %vm895_vm9 = vcmp.gt.f32.partialorder %v3381_v21, 0.0  ;;  %vm890_vm10 = vcmp.gt.f32.partialorder %v3368_v30, 0.0 }
 0x1a7   :  { %1494 = vmatprep.mubr.f32.mxu0 %v1131_v24  ;;  %2611 = vmatpush1.bf16.msra.mxu0 %v2610_v39  ;;  %v3485_v59 = vpop.f32.mrb[35].mxu1  ;;  %v1027_v20 = vmul.f32 0.01, %v3390_v55  ;;  %v1151_v23 = vsel %vm895_vm9, %v3381_v21, %v1023_v47  ;;  %v1022_v28 = vmul.f32 0.01, %v3377_v50  ;;  %v1146_v39 = vsel %vm890_vm10, %v3368_v30, %v1018_v37 }
 0x1a8   :  { %vm899_vm11 = vcmp.gt.f32.partialorder %v3390_v55, 0.0  ;;  %vm894_vm12 = vcmp.gt.f32.partialorder %v3377_v50, 0.0  ;;  %v1031_v42 = vmul.f32 0.01, %v3399_v35  ;;  %v1026_v21 = vmul.f32 0.01, %v3386_v60 }
 0x1a9   :  { %v1155_v24 = vsel %vm899_vm11, %v3390_v55, %v1027_v20  ;;  %v1150_v26 = vsel %vm894_vm12, %v3377_v50, %v1022_v28  ;;  %vm903_vm13 = vcmp.gt.f32.partialorder %v3399_v35, 0.0  ;;  %vm898_vm14 = vcmp.gt.f32.partialorder %v3386_v60, 0.0  ;;  %v2042_v20 = vld [vmem:[#allocation8 + $0x10] sm:$0xff] }
 0x1aa   :  { %1495 = vmatmul.mubr.f32.gmra.mrb[64].mxu0 %v1130_v54  ;;  %v3493_v6 = vpop.f32.mrb[36].mxu1  ;;  %v1035_v1 = vmul.f32 0.01, %v3408_v5  ;;  %v1030_v55 = vmul.f32 0.01, %v3395_v10  ;;  %v1154_v34 = vsel %vm898_vm14, %v3386_v60, %v1026_v21  ;;  %vm907_vm15 = vcmp.gt.f32.partialorder %v3408_v5, 0.0 }
 0x1ab   :  { %1500 = vmatprep.mubr.f32.mxu0 %v1135_v61  ;;  %v3495_v11 = vpop.f32.mrb[37].mxu1  ;;  %v1159_v61 = vsel %vm903_vm13, %v3399_v35, %v1031_v42  ;;  %vm902_vm0 = vcmp.gt.f32.partialorder %v3395_v10, 0.0  ;;  %v1039_v44 = vmul.f32 0.01, %v3417_v63  ;;  %v1034_v15 = vmul.f32 0.01, %v3404_v27 }
 0x1ac   :  { %v1163_v35 = vsel %vm907_vm15, %v3408_v5, %v1035_v1  ;;  %vm911_vm1 = vcmp.gt.f32.partialorder %v3417_v63, 0.0  ;;  %vm906_vm2 = vcmp.gt.f32.partialorder %v3404_v27, 0.0  ;;  %v1043_v5 = vmul.f32 0.01, %v3426_v8 }
 0x1ad   :  { %v1167_v47 = vsel %vm911_vm1, %v3417_v63, %v1039_v44  ;;  %vm915_vm3 = vcmp.gt.f32.partialorder %v3426_v8, 0.0  ;;  %vm910_vm4 = vcmp.gt.f32.partialorder %v3413_v0, 0.0  ;;  %v1047_v28 = vmul.f32 0.01, %v3435_v58 }
 0x1ae   :  { %1501 = vmatmul.mubr.f32.gmra.mrb[66].mxu0 %v1134_v52  ;;  %v3503_v22 = vpop.f32.mrb[38].mxu1  ;;  %v2961_v52 = vmov 0.0|0.0   ;;  %v1171_v63 = vsel %vm915_vm3, %v3426_v8, %v1043_v5  ;;  %v1042_v42 = vmul.f32 0.01, %v3422_v13  ;;  %vm919_vm5 = vcmp.gt.f32.partialorder %v3435_v58, 0.0 }
 0x1af   :  { %1506 = vmatprep.mubr.f32.mxu0 %v1139_v45  ;;  %v3505_v46 = vpop.f32.mrb[39].mxu1  ;;  %v2041_v45 = vld [vmem:[#allocation8 + $0x8] sm:$0xff]  ;;  %2612 = vmatprep.subr.bf16.mxu1 %v2961_v52  ;;  %vm914_vm6 = vcmp.gt.f32.partialorder %v3422_v13, 0.0  ;;  %v1051_v8 = vmul.f32 0.01, %v3444_v43  ;;  %vm923_vm7 = vcmp.gt.f32.partialorder %v3444_v43, 0.0 }
 0x1b0   :  { %v2613_v60 = vpack.c.bf16 %v2041_v45, %v2040_v56  ;;  %v1046_v1 = vmul.f32 0.01, %v3431_v31  ;;  %vm918_vm8 = vcmp.gt.f32.partialorder %v3431_v31, 0.0  ;;  %v2045_v56 = vld [vmem:[#allocation8 + $0x28] sm:$0xff]  ;;  %v1055_v45 = vmul.f32 0.01, %v3453_v18 }
 0x1b1   :  { %v290_v44 = vsub.s32 3, %v3317_v25  ;;  %vm927_vm9 = vcmp.gt.f32.partialorder %v3453_v18, 0.0  ;;  %vm922_vm10 = vcmp.gt.f32.partialorder %v3440_v32, 0.0  ;;  %vm931_vm11 = vcmp.gt.f32.partialorder %v3464_v62, 0.0 }
 0x1b2   :  { %1507 = vmatmul.mubr.f32.gmra.mrb[68].mxu0 %v1138_v3  ;;  %v3513_v16 = vpop.f32.mrb[40].mxu1  ;;  %2614 = vmatpush1.bf16.msra.mxu1 %v2613_v60  ;;  %v1174_v60 = vsel %vm918_vm8, %v3431_v31, %v1046_v1  ;;  %v1183_v5 = vsel %vm927_vm9, %v3453_v18, %v1055_v45  ;;  %v2832_v31 = vld [vmem:[%s3978_s2] sm:$0xf]  ;;  %vm926_vm12 = vcmp.gt.f32.partialorder %v3449_v2, 0.0  ;;  %vm935_vm13 = vcmp.gt.f32.partialorder %v3473_v49, 0.0 }
 0x1b3   :  { %1512 = vmatprep.mubr.f32.mxu0 %v1143_v9  ;;  %v3515_v48 = vpop.f32.mrb[41].mxu1  ;;  %v1158_v9 = vsel %vm902_vm0, %v3395_v10, %v1030_v55  ;;  %2615 = vmatprep.subr.bf16.mxu1 %v2961_v52  ;;  %v1162_v10 = vsel %vm906_vm2, %v3404_v27, %v1034_v15  ;;  %vm930_vm14 = vcmp.gt.f32.partialorder %v3460_v36, 0.0  ;;  %vm934_vm0 = vcmp.gt.f32.partialorder %v3469_v40, 0.0 }
 0x1b6   :  { %1513 = vmatmul.mubr.f32.gmra.mrb[70].mxu0 %v1142_v19  ;;  %v3523_v57 = vpop.f32.mrb[42].mxu1 }
 0x1b7   :  { %1518 = vmatprep.mubr.f32.mxu0 %v1147_v4  ;;  %v3525_v7 = vpop.f32.mrb[43].mxu1  ;;  %v1038_v4 = vmul.f32 0.01, %v3413_v0 }
 0x1b9   :  { %v1166_v27 = vsel %vm910_vm4, %v3413_v0, %v1038_v4  ;;  %v1170_v0 = vsel %vm914_vm6, %v3422_v13, %v1042_v42  ;;  %v1050_v13 = vmul.f32 0.01, %v3440_v32  ;;  %v1054_v4 = vmul.f32 0.01, %v3449_v2 }
 0x1ba   :  { %1519 = vmatmul.mubr.f32.gmra.mrb[72].mxu0 %v1146_v39  ;;  %v3533_v38 = vpop.f32.mrb[44].mxu1 }
 0x1bb   :  { %1524 = vmatprep.mubr.f32.mxu0 %v1151_v23  ;;  %v3535_v33 = vpop.f32.mrb[45].mxu1  ;;  %v2043_v23 = vld [vmem:[#allocation8 + $0x18] sm:$0xff] }
 0x1bc   :  { %v2616_v39 = vpack.c.bf16 %v2043_v23, %v2042_v20  ;;  %v286_v20 = vsub.s32 2, %v3317_v25 }
 0x1be   :  { %1525 = vmatmul.mubr.f32.gmra.mrb[74].mxu0 %v1150_v26  ;;  %v3543_v30 = vpop.f32.mrb[46].mxu1  ;;  %2617 = vmatpush1.bf16.msra.mxu1 %v2616_v39  ;;  %v1175_v26 = vsel %vm919_vm5, %v3435_v58, %v1047_v28  ;;  %v1179_v58 = vsel %vm923_vm7, %v3444_v43, %v1051_v8  ;;  %v1059_v43 = vmul.f32 0.01, %v3464_v62  ;;  %v2046_v28 = vld [vmem:[#allocation8 + $0x30] sm:$0xff]  ;;  %v1063_v39 = vmul.f32 0.01, %v3473_v49 }
 0x1bf   :  { %1530 = vmatprep.mubr.f32.mxu0 %v1155_v24  ;;  %v3545_v17 = vpop.f32.mrb[47].mxu1  ;;  %2618 = vmatprep.subr.bf16.mxu1 %v2961_v52  ;;  %v1058_v8 = vmul.f32 0.01, %v3460_v36  ;;  %v3634_v1 = vrot.slane %v2832_v31, %v286_v20  ;;  %v2051_v20 = vld [vmem:[#allocation8 + $0x58] sm:$0xff] }
 0x1c0   :  { %v1187_v42 = vsel %vm931_vm11, %v3464_v62, %v1059_v43 }
 0x1c1   :  { %v620_v45 = vadd.f32 %v3475_v41, %v3634_v1 }
 0x1c2   :  { %1531 = vmatmul.mubr.f32.gmra.mrb[76].mxu0 %v1154_v34  ;;  %v3553_v50 = vpop.f32.mrb[48].mxu1  ;;  %v2044_v34 = vld [vmem:[#allocation8 + $0x20] sm:$0xff] }
 0x1c3   :  { %1536 = vmatprep.mubr.f32.mxu0 %v1159_v61  ;;  %v3555_v54 = vpop.f32.mrb[49].mxu1  ;;  %v940_v41 = vmul.f32 0.01, %v620_v45  ;;  %vm812_vm2 = vcmp.gt.f32.partialorder %v620_v45, 0.0 }
 0x1c6   :  { %1537 = vmatmul.mubr.f32.gmra.mrb[78].mxu0 %v1158_v9  ;;  %v3564_v14 = vpop.f32.mrb[50].mxu1 }
 0x1c7   :  { %1542 = vmatprep.mubr.f32.mxu0 %v1163_v35  ;;  %v3566_v3 = vpop.f32.mrb[51].mxu1  ;;  %v2619_v35 = vpack.c.bf16 %v2045_v56, %v2044_v34  ;;  %v1191_v34 = vsel %vm935_vm13, %v3473_v49, %v1063_v39  ;;  %v1062_v56 = vmul.f32 0.01, %v3469_v40  ;;  %v2048_v49 = vld [vmem:[#allocation8 + $0x40] sm:$0xff]  ;;  %v2053_v39 = vld [vmem:[#allocation8 + $0x68] sm:$0xff] }
 0x1c9   :  { %2620 = vmatpush1.bf16.msra.mxu1 %v2619_v35 }
 0x1ca   :  { %1543 = vmatmul.mubr.f32.gmra.mrb[80].mxu0 %v1162_v10  ;;  %v3575_v37 = vpop.f32.mrb[52].mxu1  ;;  %2621 = vmatprep.subr.bf16.mxu1 %v2961_v52  ;;  %v1178_v10 = vsel %vm922_vm10, %v3440_v32, %v1050_v13  ;;  %v2049_v13 = vld [vmem:[#allocation8 + $0x48] sm:$0xff] }
 0x1cb   :  { %1548 = vmatprep.mubr.f32.mxu0 %v1167_v47  ;;  %v3577_v19 = vpop.f32.mrb[53].mxu1  ;;  %v3617_v47 = vrot.slane %v2832_v31, %v290_v44  ;;  %v1190_v31 = vsel %vm934_vm0, %v3469_v40, %v1062_v56  ;;  %v2055_v56 = vld [vmem:[#allocation8 + $0x78] sm:$0xff] }
 0x1cd   :  { %v622_v32 = vadd.f32 %v3477_v12, %v3617_v47  ;;  %v634_v43 = vadd.f32 %v3495_v11, %v3617_v47  ;;  %v640_v40 = vadd.f32 %v3505_v46, %v3617_v47 }
 0x1ce   :  { %1549 = vmatmul.mubr.f32.gmra.mrb[82].mxu0 %v1166_v27  ;;  %v3585_v24 = vpop.f32.mrb[54].mxu1 }
 0x1cf   :  { %1554 = vmatprep.mubr.f32.mxu0 %v1171_v63  ;;  %v3587_v21 = vpop.f32.mrb[55].mxu1  ;;  %v2047_v63 = vld [vmem:[#allocation8 + $0x38] sm:$0xff]  ;;  %v941_v12 = vmul.f32 0.01, %v622_v32  ;;  %vm813_vm15 = vcmp.gt.f32.partialorder %v622_v32, 0.0  ;;  %vm821_vm3 = vcmp.gt.f32.partialorder %v634_v43, 0.0 }
 0x1d0   :  { %v2622_v27 = vpack.c.bf16 %v2047_v63, %v2046_v28  ;;  %v2052_v63 = vld [vmem:[#allocation8 + $0x60] sm:$0xff]  ;;  %v953_v46 = vmul.f32 0.01, %v640_v40  ;;  %vm825_vm5 = vcmp.gt.f32.partialorder %v640_v40, 0.0 }
 0x1d2   :  { %1555 = vmatmul.mubr.f32.gmra.mrb[84].mxu0 %v1170_v0  ;;  %v3596_v61 = vpop.f32.mrb[56].mxu1  ;;  %2623 = vmatpush1.bf16.msra.mxu1 %v2622_v27 }
 0x1d3   :  { %1560 = vmatprep.mubr.f32.mxu0 %v1175_v26  ;;  %v3598_v55 = vpop.f32.mrb[57].mxu1  ;;  %v1182_v26 = vsel %vm926_vm12, %v3449_v2, %v1054_v4  ;;  %2624 = vmatprep.subr.bf16.mxu1 %v2961_v52  ;;  %v628_v2 = vadd.f32 %v3485_v59, %v3617_v47  ;;  %v1069_v59 = vsel %vm813_vm15, %v622_v32, %v941_v12 }
 0x1d4   :  { %v1068_v32 = vsel %vm812_vm2, %v620_v45, %v940_v41  ;;  %v2631_v12 = vpack.c.bf16 %v2053_v39, %v2052_v63  ;;  %v2057_v41 = vld [vmem:[#allocation8 + $0x88] sm:$0xff] }
 0x1d5   :  { %vm817_vm1 = vcmp.gt.f32.partialorder %v628_v2, 0.0 }
 0x1d6   :  { %1561 = vmatmul.mubr.f32.gmra.mrb[86].mxu0 %v1174_v60  ;;  %v3607_v15 = vpop.f32.mrb[58].mxu1  ;;  %v945_v60 = vmul.f32 0.01, %v628_v2 }
 0x1d7   :  { %1566 = vmatprep.mubr.f32.mxu0 %v1179_v58  ;;  %v3609_v9 = vpop.f32.mrb[59].mxu1  ;;  %v1186_v58 = vsel %vm930_vm14, %v3460_v36, %v1058_v8  ;;  %v626_v36 = vadd.f32 %v3483_v51, %v3634_v1  ;;  %v632_v8 = vadd.f32 %v3493_v6, %v3634_v1 }
 0x1d8   :  { %v1073_v51 = vsel %vm817_vm1, %v628_v2, %v945_v60  ;;  %v2054_v2 = vld [vmem:[#allocation8 + $0x70] sm:$0xff] }
 0x1d9   :  { %v944_v27 = vmul.f32 0.01, %v626_v36  ;;  %vm816_vm4 = vcmp.gt.f32.partialorder %v626_v36, 0.0  ;;  %v948_v6 = vmul.f32 0.01, %v632_v8  ;;  %vm820_vm6 = vcmp.gt.f32.partialorder %v632_v8, 0.0 }
 0x1da   :  { %1567 = vmatmul.mubr.f32.gmra.mrb[88].mxu0 %v1178_v10  ;;  %v3624_v23 = vpop.f32.mrb[60].mxu1  ;;  %v2050_v10 = vld [vmem:[#allocation8 + $0x50] sm:$0xff] }
 0x1db   :  { %1572 = vmatprep.mubr.f32.mxu0 %v1183_v5  ;;  %v3626_v18 = vpop.f32.mrb[61].mxu1  ;;  %v2625_v5 = vpack.c.bf16 %v2049_v13, %v2048_v49  ;;  %v2628_v11 = vpack.c.bf16 %v2051_v20, %v2050_v10  ;;  %v638_v49 = vadd.f32 %v3503_v22, %v3634_v1  ;;  %v1072_v13 = vsel %vm816_vm4, %v626_v36, %v944_v27 }
 0x1dc   :  { %v652_v22 = vadd.f32 %v3525_v7, %v3617_v47  ;;  %v644_v10 = vadd.f32 %v3513_v16, %v3634_v1  ;;  %v1076_v20 = vsel %vm820_vm6, %v632_v8, %v948_v6  ;;  %v658_v16 = vadd.f32 %v3535_v33, %v3617_v47 }
 0x1dd   :  { %2626 = vmatpush1.bf16.msra.mxu1 %v2625_v5  ;;  %v952_v36 = vmul.f32 0.01, %v638_v49  ;;  %vm824_vm8 = vcmp.gt.f32.partialorder %v638_v49, 0.0  ;;  %v650_v27 = vadd.f32 %v3523_v57, %v3634_v1  ;;  %v664_v57 = vadd.f32 %v3545_v17, %v3617_v47 }
 0x1de   :  { %1573 = vmatmul.mubr.f32.gmra.mrb[90].mxu0 %v1182_v26  ;;  %v3638_v0 = vpop.f32.mrb[62].mxu1  ;;  %2627 = vmatprep.subr.bf16.mxu1 %v2961_v52  ;;  %v961_v7 = vmul.f32 0.01, %v652_v22  ;;  %vm833_vm9 = vcmp.gt.f32.partialorder %v652_v22, 0.0  ;;  %vm828_vm10 = vcmp.gt.f32.partialorder %v644_v10, 0.0  ;;  %vm837_vm11 = vcmp.gt.f32.partialorder %v658_v16, 0.0 }
 0x1df   :  { %1578 = vmatprep.mubr.f32.mxu0 %v1187_v42  ;;  %v3640_v62 = vpop.f32.mrb[63].mxu1  ;;  %v949_v42 = vmul.f32 0.01, %v634_v43  ;;  %v1080_v8 = vsel %vm824_vm8, %v638_v49, %v952_v36  ;;  %v965_v33 = vmul.f32 0.01, %v658_v16  ;;  %v656_v49 = vadd.f32 %v3533_v38, %v3634_v1 }
 0x1e0   :  { %v960_v6 = vmul.f32 0.01, %v650_v27  ;;  %vm832_vm12 = vcmp.gt.f32.partialorder %v650_v27, 0.0  ;;  %v969_v17 = vmul.f32 0.01, %v664_v57  ;;  %v670_v38 = vadd.f32 %v3555_v54, %v3617_v47 }
 0x1e1   :  { %2629 = vmatpush1.bf16.msra.mxu1 %v2628_v11  ;;  %v1077_v45 = vsel %vm821_vm3, %v634_v43, %v949_v42  ;;  %v2056_v43 = vld [vmem:[#allocation8 + $0x80] sm:$0xff]  ;;  %v2058_v42 = vld [vmem:[#allocation8 + $0x90] sm:$0xff]  ;;  %v964_v36 = vmul.f32 0.01, %v656_v49  ;;  %vm841_vm13 = vcmp.gt.f32.partialorder %v664_v57, 0.0  ;;  %vm836_vm14 = vcmp.gt.f32.partialorder %v656_v49, 0.0 }
 0x1e2   :  { %1579 = vmatmul.mubr.f32.gmra.mrb[92].mxu0 %v1186_v58  ;;  %v3651_v44 = vpop.f32.mrb[64].mxu1  ;;  %2630 = vmatprep.subr.bf16.mxu1 %v2961_v52  ;;  %v646_v58 = vadd.f32 %v3515_v48, %v3617_v47  ;;  %v2637_v63 = vpack.c.bf16 %v2057_v41, %v2056_v43  ;;  %v973_v54 = vmul.f32 0.01, %v670_v38  ;;  %vm845_vm15 = vcmp.gt.f32.partialorder %v670_v38, 0.0 }
 0x1e3   :  { %1584 = vmatprep.mubr.f32.mxu0 %v1191_v34  ;;  %v3653_v35 = vpop.f32.mrb[65].mxu1 }
 0x1e4   :  { %v957_v48 = vmul.f32 0.01, %v646_v58  ;;  %vm829_vm7 = vcmp.gt.f32.partialorder %v646_v58, 0.0 }
 0x1e5   :  { %2632 = vmatpush1.bf16.msra.mxu1 %v2631_v12 }
 0x1e6   :  { %1585 = vmatmul.mubr.f32.gmra.mrb[94].mxu0 %v1190_v31  ;;  %v3660_v4 = vpop.f32.mrb[66].mxu1  ;;  %2633 = vmatprep.subr.bf16.mxu1 %v2961_v52  ;;  %v1081_v31 = vsel %vm825_vm5, %v640_v40, %v953_v46  ;;  %v1085_v40 = vsel %vm829_vm7, %v646_v58, %v957_v48  ;;  %v2060_v46 = vld [vmem:[#allocation8 + $0xa0] sm:$0xff]  ;;  %v1089_v58 = vsel %vm833_vm9, %v652_v22, %v961_v7  ;;  %v2062_v48 = vld [vmem:[#allocation8 + $0xb0] sm:$0xff] }
 0x1e7   :  { %1655 = vmatprep.mubr.f32.mxu0 %v1069_v59  ;;  %v3662_v28 = vpop.f32.mrb[67].mxu1  ;;  %v2634_v59 = vpack.c.bf16 %v2055_v56, %v2054_v2  ;;  %v1093_v22 = vsel %vm837_vm11, %v658_v16, %v965_v33  ;;  %v2064_v7 = vld [vmem:[#allocation8 + $0xc0] sm:$0xff]  ;;  %v1097_v16 = vsel %vm841_vm13, %v664_v57, %v969_v17  ;;  %v2066_v33 = vld [vmem:[#allocation8 + $0xd0] sm:$0xff]  ;;  %v1101_v57 = vsel %vm845_vm15, %v670_v38, %v973_v54 }
 0x1e8   :  { %v2068_v17 = vld [vmem:[#allocation8 + $0xe0] sm:$0xff] }
 0x1e9   :  { %2635 = vmatpush1.bf16.msra.mxu1 %v2634_v59 }
 0x1ea   :  { %1656 = vmatmul.mubr.f32.vlgmr.msra.gmra.mrb[32].mxu0 %v1068_v32  ;;  %v3669_v26 = vpop.f32.mrb[68].mxu1  ;;  %2636 = vmatprep.subr.bf16.mxu1 %v2961_v52  ;;  %v956_v32 = vmul.f32 0.01, %v644_v10 }
 0x1eb   :  { %1661 = vmatprep.mubr.f32.mxu0 %v1073_v51  ;;  %v3671_v34 = vpop.f32.mrb[69].mxu1  ;;  %v2059_v51 = vld [vmem:[#allocation8 + $0x98] sm:$0xff] }
 0x1ec   :  { %v2640_v2 = vpack.c.bf16 %v2059_v51, %v2058_v42 }
 0x1ed   :  { %2638 = vmatpush1.bf16.msra.mxu1 %v2637_v63 }
 0x1ee   :  { %1662 = vmatmul.mubr.f32.gmra.mrb[34].mxu0 %v1072_v13  ;;  %v3678_v60 = vpop.f32.mrb[70].mxu1  ;;  %2639 = vmatprep.subr.bf16.mxu1 %v2961_v52  ;;  %v1084_v13 = vsel %vm828_vm10, %v644_v10, %v956_v32  ;;  %v662_v10 = vadd.f32 %v3543_v30, %v3634_v1  ;;  %v676_v30 = vadd.f32 %v3566_v3, %v3617_v47 }
 0x1ef   :  { %1667 = vmatprep.mubr.f32.mxu0 %v1077_v45  ;;  %v3680_v5 = vpop.f32.mrb[71].mxu1  ;;  %v2061_v45 = vld [vmem:[#allocation8 + $0xa8] sm:$0xff] }
 0x1f0   :  { %v2643_v43 = vpack.c.bf16 %v2061_v45, %v2060_v46  ;;  %v968_v32 = vmul.f32 0.01, %v662_v10  ;;  %vm840_vm0 = vcmp.gt.f32.partialorder %v662_v10, 0.0  ;;  %v977_v3 = vmul.f32 0.01, %v676_v30 }
 0x1f1   :  { %2641 = vmatpush1.bf16.msra.mxu1 %v2640_v2  ;;  %vm849_vm1 = vcmp.gt.f32.partialorder %v676_v30, 0.0 }
 0x1f2   :  { %1668 = vmatmul.mubr.f32.gmra.mrb[36].mxu0 %v1076_v20  ;;  %v3687_v11 = vpop.f32.mrb[72].mxu1  ;;  %2642 = vmatprep.subr.bf16.mxu1 %v2961_v52  ;;  %v1088_v20 = vsel %vm832_vm12, %v650_v27, %v960_v6  ;;  %v668_v27 = vadd.f32 %v3553_v50, %v3634_v1  ;;  %v682_v50 = vadd.f32 %v3577_v19, %v3617_v47 }
 0x1f3   :  { %1673 = vmatprep.mubr.f32.mxu0 %v1081_v31  ;;  %v3689_v39 = vpop.f32.mrb[73].mxu1  ;;  %v2063_v31 = vld [vmem:[#allocation8 + $0xb8] sm:$0xff]  ;;  %v1105_v38 = vsel %vm849_vm1, %v676_v30, %v977_v3 }
 0x1f4   :  { %v2646_v42 = vpack.c.bf16 %v2063_v31, %v2062_v48  ;;  %v972_v6 = vmul.f32 0.01, %v668_v27  ;;  %vm844_vm2 = vcmp.gt.f32.partialorder %v668_v27, 0.0  ;;  %v981_v19 = vmul.f32 0.01, %v682_v50 }
 0x1f5   :  { %2644 = vmatpush1.bf16.msra.mxu1 %v2643_v43  ;;  %vm853_vm3 = vcmp.gt.f32.partialorder %v682_v50, 0.0 }
 0x1f6   :  { %1674 = vmatmul.mubr.f32.gmra.mrb[38].mxu0 %v1080_v8  ;;  %v3696_v12 = vpop.f32.mrb[74].mxu1  ;;  %2645 = vmatprep.subr.bf16.mxu1 %v2961_v52  ;;  %v1092_v8 = vsel %vm836_vm14, %v656_v49, %v964_v36  ;;  %v674_v49 = vadd.f32 %v3564_v14, %v3634_v1  ;;  %v688_v14 = vadd.f32 %v3587_v21, %v3617_v47 }
 0x1f7   :  { %1679 = vmatprep.mubr.f32.mxu0 %v1085_v40  ;;  %v3698_v56 = vpop.f32.mrb[75].mxu1  ;;  %v2065_v40 = vld [vmem:[#allocation8 + $0xc8] sm:$0xff]  ;;  %v694_v21 = vadd.f32 %v3598_v55, %v3617_v47  ;;  %v700_v55 = vadd.f32 %v3609_v9, %v3617_v47  ;;  %v698_v9 = vadd.f32 %v3607_v15, %v3634_v1 }
 0x1f8   :  { %v2649_v46 = vpack.c.bf16 %v2065_v40, %v2064_v7  ;;  %v976_v36 = vmul.f32 0.01, %v674_v49  ;;  %vm848_vm4 = vcmp.gt.f32.partialorder %v674_v49, 0.0  ;;  %v985_v54 = vmul.f32 0.01, %v688_v14 }
 0x1f9   :  { %2647 = vmatpush1.bf16.msra.mxu1 %v2646_v42  ;;  %vm857_vm5 = vcmp.gt.f32.partialorder %v688_v14, 0.0  ;;  %vm861_vm7 = vcmp.gt.f32.partialorder %v694_v21, 0.0  ;;  %vm865_vm9 = vcmp.gt.f32.partialorder %v700_v55, 0.0  ;;  %vm864_vm12 = vcmp.gt.f32.partialorder %v698_v9, 0.0 }
 0x1fa   :  { %1680 = vmatmul.mubr.f32.gmra.mrb[40].mxu0 %v1084_v13  ;;  %v3705_v59 = vpop.f32.mrb[76].mxu1  ;;  %2648 = vmatprep.subr.bf16.mxu1 %v2961_v52  ;;  %v1096_v13 = vsel %vm840_vm0, %v662_v10, %v968_v32  ;;  %v680_v10 = vadd.f32 %v3575_v37, %v3634_v1  ;;  %v686_v37 = vadd.f32 %v3585_v24, %v3634_v1 }
 0x1fb   :  { %1685 = vmatprep.mubr.f32.mxu0 %v1089_v58  ;;  %v3707_v41 = vpop.f32.mrb[77].mxu1  ;;  %v2067_v58 = vld [vmem:[#allocation8 + $0xd8] sm:$0xff]  ;;  %v1104_v32 = vsel %vm848_vm4, %v674_v49, %v976_v36  ;;  %v692_v24 = vadd.f32 %v3596_v61, %v3634_v1  ;;  %v706_v49 = vadd.f32 %v3626_v18, %v3617_v47  ;;  %v704_v18 = vadd.f32 %v3624_v23, %v3634_v1 }
 0x1fc   :  { %v2652_v48 = vpack.c.bf16 %v2067_v58, %v2066_v33  ;;  %v980_v30 = vmul.f32 0.01, %v680_v10  ;;  %vm852_vm6 = vcmp.gt.f32.partialorder %v680_v10, 0.0  ;;  %v1113_v33 = vsel %vm857_vm5, %v688_v14, %v985_v54 }
 0x1fd   :  { %2650 = vmatpush1.bf16.msra.mxu1 %v2649_v46  ;;  %v989_v46 = vmul.f32 0.01, %v694_v21  ;;  %v984_v58 = vmul.f32 0.01, %v686_v37  ;;  %vm856_vm8 = vcmp.gt.f32.partialorder %v686_v37, 0.0  ;;  %vm860_vm10 = vcmp.gt.f32.partialorder %v692_v24, 0.0 }
 0x1fe   :  { %1686 = vmatmul.mubr.f32.gmra.mrb[42].mxu0 %v1088_v20  ;;  %v3714_v63 = vpop.f32.mrb[78].mxu1  ;;  %2651 = vmatprep.subr.bf16.mxu1 %v2961_v52  ;;  %v1100_v20 = vsel %vm844_vm2, %v668_v27, %v972_v6  ;;  %v1108_v3 = vsel %vm852_vm6, %v680_v10, %v980_v30  ;;  %v993_v6 = vmul.f32 0.01, %v700_v55  ;;  %v992_v14 = vmul.f32 0.01, %v698_v9 }
 0x1ff   :  { %1691 = vmatprep.mubr.f32.mxu0 %v1093_v22  ;;  %v3716_v51 = vpop.f32.mrb[79].mxu1  ;;  %v2069_v22 = vld [vmem:[#allocation8 + $0xe8] sm:$0xff]  ;;  %vm869_vm11 = vcmp.gt.f32.partialorder %v706_v49, 0.0  ;;  %v718_v54 = vadd.f32 %v3653_v35, %v3617_v47  ;;  %vm868_vm14 = vcmp.gt.f32.partialorder %v704_v18, 0.0  ;;  %v716_v35 = vadd.f32 %v3651_v44, %v3634_v1 }
 0x200   :  { %v2655_v7 = vpack.c.bf16 %v2069_v22, %v2068_v17  ;;  %v997_v22 = vmul.f32 0.01, %v706_v49 }
 0x201   :  { %2653 = vmatpush1.bf16.msra.mxu1 %v2652_v48  ;;  %v1112_v48 = vsel %vm856_vm8, %v686_v37, %v984_v58  ;;  %v1005_v37 = vmul.f32 0.01, %v718_v54  ;;  %vm877_vm15 = vcmp.gt.f32.partialorder %v718_v54, 0.0  ;;  %vm876_vm2 = vcmp.gt.f32.partialorder %v716_v35, 0.0 }
 0x202   :  { %1692 = vmatmul.mubr.f32.gmra.mrb[44].mxu0 %v1092_v8  ;;  %v3723_v2 = vpop.f32.mrb[80].mxu1  ;;  %2654 = vmatprep.subr.bf16.mxu1 %v2961_v52 }
 0x203   :  { %1697 = vmatprep.mubr.f32.mxu0 %v1097_v16  ;;  %v3725_v45 = vpop.f32.mrb[81].mxu1  ;;  %v1109_v16 = vsel %vm853_vm3, %v682_v50, %v981_v19  ;;  %v1121_v19 = vsel %vm865_vm9, %v700_v55, %v993_v6  ;;  %v1133_v58 = vsel %vm877_vm15, %v718_v54, %v1005_v37  ;;  %v722_v6 = vadd.f32 %v3660_v4, %v3634_v1 }
 0x204   :  { %v754_v54 = vadd.f32 %v3707_v41, %v3617_v47  ;;  %v760_v37 = vadd.f32 %v3716_v51, %v3617_v47  ;;  %v2071_v51 = vld [vmem:[#allocation8 + $0xf8] sm:$0xff] }
 0x205   :  { %2656 = vmatpush1.bf16.msra.mxu1 %v2655_v7  ;;  %v1125_v7 = vsel %vm869_vm11, %v706_v49, %v997_v22  ;;  %v736_v49 = vadd.f32 %v3680_v5, %v3617_v47  ;;  %vm880_vm4 = vcmp.gt.f32.partialorder %v722_v6, 0.0  ;;  %v742_v22 = vadd.f32 %v3689_v39, %v3617_v47 }
 0x206   :  { %1698 = vmatmul.mubr.f32.gmra.mrb[46].mxu0 %v1096_v13  ;;  %v3732_v43 = vpop.f32.mrb[82].mxu1  ;;  %2657 = vmatprep.subr.bf16.mxu1 %v2961_v52  ;;  %v1117_v52 = vsel %vm861_vm7, %v694_v21, %v989_v46  ;;  %v988_v13 = vmul.f32 0.01, %v692_v24  ;;  %v1120_v21 = vsel %vm864_vm12, %v698_v9, %v992_v14  ;;  %v724_v46 = vadd.f32 %v3662_v28, %v3617_v47 }
 0x207   :  { %1703 = vmatprep.mubr.f32.mxu0 %v1101_v57  ;;  %v3734_v31 = vpop.f32.mrb[83].mxu1  ;;  %v728_v9 = vadd.f32 %v3669_v26, %v3634_v1  ;;  %v1017_v4 = vmul.f32 0.01, %v736_v49  ;;  %vm889_vm5 = vcmp.gt.f32.partialorder %v736_v49, 0.0  ;;  %v1021_v26 = vmul.f32 0.01, %v742_v22 }
 0x208   :  { %v1116_v36 = vsel %vm860_vm10, %v692_v24, %v988_v13  ;;  %v730_v24 = vadd.f32 %v3671_v34, %v3617_v47  ;;  %vm881_vm1 = vcmp.gt.f32.partialorder %v724_v46, 0.0  ;;  %v1008_v13 = vmul.f32 0.01, %v722_v6 }
 0x209   :  { %vm884_vm6 = vcmp.gt.f32.partialorder %v728_v9, 0.0  ;;  %v1145_v5 = vsel %vm889_vm5, %v736_v49, %v1017_v4  ;;  %vm893_vm7 = vcmp.gt.f32.partialorder %v742_v22, 0.0  ;;  %vm901_vm11 = vcmp.gt.f32.partialorder %v754_v54, 0.0 }
 0x20a   :  { %1704 = vmatmul.mubr.f32.gmra.mrb[48].mxu0 %v1100_v20  ;;  %v3741_v42 = vpop.f32.mrb[84].mxu1  ;;  %v1013_v44 = vmul.f32 0.01, %v730_v24  ;;  %vm885_vm3 = vcmp.gt.f32.partialorder %v730_v24, 0.0  ;;  %v1136_v14 = vsel %vm880_vm4, %v722_v6, %v1008_v13  ;;  %v1149_v39 = vsel %vm893_vm7, %v742_v22, %v1021_v26 }
 0x20b   :  { %1709 = vmatprep.mubr.f32.mxu0 %v1105_v38  ;;  %v3743_v40 = vpop.f32.mrb[85].mxu1  ;;  %v712_v38 = vadd.f32 %v3640_v62, %v3617_v47  ;;  %v710_v62 = vadd.f32 %v3638_v0, %v3634_v1  ;;  %v1009_v0 = vmul.f32 0.01, %v724_v46  ;;  %v772_v6 = vadd.f32 %v3734_v31, %v3617_v47 }
 0x20c   :  { %v1141_v34 = vsel %vm885_vm3, %v730_v24, %v1013_v44  ;;  %v778_v13 = vadd.f32 %v3743_v40, %v3617_v47  ;;  %v770_v31 = vadd.f32 %v3732_v43, %v3634_v1 }
 0x20d   :  { %v1001_v20 = vmul.f32 0.01, %v712_v38  ;;  %vm873_vm13 = vcmp.gt.f32.partialorder %v712_v38, 0.0  ;;  %vm872_vm0 = vcmp.gt.f32.partialorder %v710_v62, 0.0  ;;  %v1137_v28 = vsel %vm881_vm1, %v724_v46, %v1009_v0 }
 0x20e   :  { %1710 = vmatmul.mubr.f32.gmra.mrb[50].mxu0 %v1104_v32  ;;  %v3750_v27 = vpop.f32.mrb[86].mxu1  ;;  %v752_v46 = vadd.f32 %v3705_v59, %v3634_v1  ;;  %v758_v0 = vadd.f32 %v3714_v63, %v3634_v1  ;;  %v2070_v59 = vld [vmem:[#allocation8 + $0xf0] sm:$0xff]  ;;  %v1041_v63 = vmul.f32 0.01, %v772_v6  ;;  %vm913_vm1 = vcmp.gt.f32.partialorder %v772_v6, 0.0 }
 0x20f   :  { %1715 = vmatprep.mubr.f32.mxu0 %v1109_v16  ;;  %v3752_v8 = vpop.f32.mrb[87].mxu1  ;;  %v996_v16 = vmul.f32 0.01, %v704_v18  ;;  %v1129_v32 = vsel %vm873_vm13, %v712_v38, %v1001_v20  ;;  %v734_v38 = vadd.f32 %v3678_v60, %v3634_v1  ;;  %v740_v20 = vadd.f32 %v3687_v11, %v3634_v1 }
 0x210   :  { %v1029_v11 = vmul.f32 0.01, %v754_v54  ;;  %vm905_vm13 = vcmp.gt.f32.partialorder %v760_v37, 0.0  ;;  %v1032_v44 = vmul.f32 0.01, %v758_v0  ;;  %v1169_v4 = vsel %vm913_vm1, %v772_v6, %v1041_v63 }
 0x211   :  { %v1124_v55 = vsel %vm868_vm14, %v704_v18, %v996_v16  ;;  %v748_v18 = vadd.f32 %v3698_v56, %v3617_v47  ;;  %vm888_vm8 = vcmp.gt.f32.partialorder %v734_v38, 0.0  ;;  %v1020_v16 = vmul.f32 0.01, %v740_v20 }
 0x212   :  { %1716 = vmatmul.mubr.f32.gmra.mrb[52].mxu0 %v1108_v3  ;;  %v3759_v57 = vpop.f32.mrb[88].mxu1  ;;  %v1004_v3 = vmul.f32 0.01, %v716_v35  ;;  %vm892_vm10 = vcmp.gt.f32.partialorder %v740_v20, 0.0  ;;  %v1157_v41 = vsel %vm901_vm11, %v754_v54, %v1029_v11  ;;  %vm900_vm14 = vcmp.gt.f32.partialorder %v752_v46, 0.0 }
 0x213   :  { %1721 = vmatprep.mubr.f32.mxu0 %v1113_v33  ;;  %v3761_v50 = vpop.f32.mrb[89].mxu1  ;;  %v1000_v33 = vmul.f32 0.01, %v710_v62  ;;  %v1025_v60 = vmul.f32 0.01, %v748_v18  ;;  %vm897_vm9 = vcmp.gt.f32.partialorder %v748_v18, 0.0 }
 0x214   :  { %v1040_v22 = vmul.f32 0.01, %v770_v31  ;;  %vm917_vm3 = vcmp.gt.f32.partialorder %v778_v13, 0.0  ;;  %vm912_vm4 = vcmp.gt.f32.partialorder %v770_v31, 0.0 }
 0x215   :  { %v1153_v56 = vsel %vm897_vm9, %v748_v18, %v1025_v60 }
 0x216   :  { %1722 = vmatmul.mubr.f32.gmra.mrb[54].mxu0 %v1112_v48  ;;  %v3767_v61 = vpop.f32.mrb[90].mxu1  ;;  %v1132_v48 = vsel %vm876_vm2, %v716_v35, %v1004_v3  ;;  %v766_v35 = vadd.f32 %v3725_v45, %v3617_v47  ;;  %v764_v45 = vadd.f32 %v3723_v2, %v3634_v1  ;;  %v1045_v2 = vmul.f32 0.01, %v778_v13 }
 0x217   :  { %1727 = vmatprep.mubr.f32.mxu0 %v1117_v52  ;;  %v3769_v17 = vpop.f32.mrb[91].mxu1  ;;  %v1128_v52 = vsel %vm872_vm0, %v710_v62, %v1000_v33  ;;  %v746_v62 = vadd.f32 %v3696_v12, %v3634_v1  ;;  %v1148_v33 = vsel %vm892_vm10, %v740_v20, %v1020_v16  ;;  %v1033_v12 = vmul.f32 0.01, %v760_v37 }
 0x218   :  { %v1037_v24 = vmul.f32 0.01, %v766_v35  ;;  %vm909_vm15 = vcmp.gt.f32.partialorder %v766_v35, 0.0  ;;  %vm904_vm0 = vcmp.gt.f32.partialorder %v758_v0, 0.0  ;;  %vm908_vm2 = vcmp.gt.f32.partialorder %v764_v45, 0.0 }
 0x219   :  { %vm896_vm12 = vcmp.gt.f32.partialorder %v746_v62, 0.0  ;;  %v1161_v3 = vsel %vm905_vm13, %v760_v37, %v1033_v12  ;;  %v1173_v40 = vsel %vm917_vm3, %v778_v13, %v1045_v2  ;;  %v1168_v18 = vsel %vm912_vm4, %v770_v31, %v1040_v22 }
 0x21a   :  { %1728 = vmatmul.mubr.f32.gmra.mrb[56].mxu0 %v1116_v36  ;;  %v3775_v15 = vpop.f32.mrb[92].mxu1  ;;  %v1016_v36 = vmul.f32 0.01, %v734_v38  ;;  %v1165_v49 = vsel %vm909_vm15, %v766_v35, %v1037_v24  ;;  %v794_v16 = vadd.f32 %v3767_v61, %v3634_v1 }
 0x21b   :  { %1733 = vmatprep.mubr.f32.mxu0 %v1121_v19  ;;  %v3777_v10 = vpop.f32.mrb[93].mxu1  ;;  %v1012_v19 = vmul.f32 0.01, %v728_v9 }
 0x21c   :  { %v1056_v11 = vmul.f32 0.01, %v794_v16 }
 0x21e   :  { %1734 = vmatmul.mubr.f32.gmra.mrb[58].mxu0 %v1120_v21  ;;  %v3783_v23 = vpop.f32.mrb[94].mxu1  ;;  %v1144_v21 = vsel %vm888_vm8, %v734_v38, %v1016_v36  ;;  %v796_v36 = vadd.f32 %v3769_v17, %v3617_v47 }
 0x21f   :  { %1739 = vmatprep.mubr.f32.mxu0 %v1125_v7  ;;  %v3785_v30 = vpop.f32.mrb[95].mxu1  ;;  %v1140_v7 = vsel %vm884_vm6, %v728_v9, %v1012_v19  ;;  %v1036_v9 = vmul.f32 0.01, %v764_v45  ;;  %v776_v19 = vadd.f32 %v3741_v42, %v3634_v1 }
 0x220   :  { %vm929_vm9 = vcmp.gt.f32.partialorder %v796_v36, 0.0 }
 0x221   :  { %v1164_v38 = vsel %vm908_vm2, %v764_v45, %v1036_v9  ;;  %v1044_v26 = vmul.f32 0.01, %v776_v19  ;;  %vm916_vm6 = vcmp.gt.f32.partialorder %v776_v19, 0.0 }
 0x222   :  { %1740 = vmatmul.mubr.f32.gmra.mrb[60].mxu0 %v1124_v55  ;;  %v1028_v55 = vmul.f32 0.01, %v752_v46 }
 0x223   :  { %1745 = vmatprep.mubr.f32.mxu0 %v1129_v32  ;;  %v1024_v32 = vmul.f32 0.01, %v746_v62  ;;  %v1172_v60 = vsel %vm916_vm6, %v776_v19, %v1044_v26 }
 0x226   :  { %1746 = vmatmul.mubr.f32.gmra.mrb[62].mxu0 %v1128_v52  ;;  %v2658_v52 = vpack.c.bf16 %v2071_v51, %v2070_v59 }
 0x227   :  { %1751 = vmatprep.mubr.f32.mxu0 %v1133_v58  ;;  %v1152_v58 = vsel %vm896_vm12, %v746_v62, %v1024_v32  ;;  %vm928_vm12 = vcmp.gt.f32.partialorder %v794_v16, 0.0 }
 0x228   :  { %2659 = vmatpush1.bf16.msra.mxu1 %v2658_v52 }
 0x22a   :  { %1752 = vmatmul.mubr.f32.gmra.mrb[64].mxu0 %v1132_v48  ;;  %v1160_v48 = vsel %vm904_vm0, %v758_v0, %v1032_v44 }
 0x22b   :  { %1757 = vmatprep.mubr.f32.mxu0 %v1137_v28  ;;  %v1156_v28 = vsel %vm900_vm14, %v752_v46, %v1028_v55  ;;  %v806_v46 = vadd.f32 %v3783_v23, %v3634_v1 }
 0x22d   :  { %vm936_vm15 = vcmp.gt.f32.partialorder %v806_v46, 0.0 }
 0x22e   :  { %1758 = vmatmul.mubr.f32.gmra.mrb[66].mxu0 %v1136_v14  ;;  %v790_v14 = vadd.f32 %v3761_v50, %v3617_v47 }
 0x22f   :  { %1763 = vmatprep.mubr.f32.mxu0 %v1141_v34  ;;  %v784_v34 = vadd.f32 %v3752_v8, %v3617_v47 }
 0x230   :  { %v1053_v42 = vmul.f32 0.01, %v790_v14  ;;  %vm925_vm7 = vcmp.gt.f32.partialorder %v790_v14, 0.0 }
 0x231   :  { %v1049_v43 = vmul.f32 0.01, %v784_v34  ;;  %vm921_vm5 = vcmp.gt.f32.partialorder %v784_v34, 0.0 }
 0x232   :  { %1764 = vmatmul.mubr.f32.gmra.mrb[68].mxu0 %v1140_v7  ;;  %v788_v7 = vadd.f32 %v3759_v57, %v3634_v1  ;;  %v1181_v50 = vsel %vm925_vm7, %v790_v14, %v1053_v42 }
 0x233   :  { %1769 = vmatprep.mubr.f32.mxu0 %v1145_v5  ;;  %v782_v5 = vadd.f32 %v3750_v27, %v3634_v1  ;;  %v1177_v8 = vsel %vm921_vm5, %v784_v34, %v1049_v43  ;;  %v1057_v27 = vmul.f32 0.01, %v796_v36 }
 0x234   :  { %v1052_v54 = vmul.f32 0.01, %v788_v7  ;;  %vm924_vm10 = vcmp.gt.f32.partialorder %v788_v7, 0.0 }
 0x235   :  { %v1048_v20 = vmul.f32 0.01, %v782_v5  ;;  %vm920_vm8 = vcmp.gt.f32.partialorder %v782_v5, 0.0  ;;  %v1185_v17 = vsel %vm929_vm9, %v796_v36, %v1057_v27 }
 0x236   :  { %1770 = vmatmul.mubr.f32.gmra.mrb[70].mxu0 %v1144_v21  ;;  %v808_v21 = vadd.f32 %v3785_v30, %v3617_v47  ;;  %v1180_v37 = vsel %vm924_vm10, %v788_v7, %v1052_v54  ;;  %v1064_v30 = vmul.f32 0.01, %v806_v46 }
 0x237   :  { %1775 = vmatprep.mubr.f32.mxu0 %v1149_v39  ;;  %v802_v39 = vadd.f32 %v3777_v10, %v3617_v47  ;;  %v1176_v62 = vsel %vm920_vm8, %v782_v5, %v1048_v20 }
 0x238   :  { %v1065_v61 = vmul.f32 0.01, %v808_v21  ;;  %vm937_vm13 = vcmp.gt.f32.partialorder %v808_v21, 0.0 }
 0x239   :  { %v1061_v57 = vmul.f32 0.01, %v802_v39  ;;  %vm933_vm11 = vcmp.gt.f32.partialorder %v802_v39, 0.0 }
 0x23a   :  { %1776 = vmatmul.mubr.f32.gmra.mrb[72].mxu0 %v1148_v33  ;;  %v1184_v33 = vsel %vm928_vm12, %v794_v16, %v1056_v11  ;;  %v1193_v47 = vsel %vm937_vm13, %v808_v21, %v1065_v61 }
 0x23b   :  { %1781 = vmatprep.mubr.f32.mxu0 %v1153_v56  ;;  %v800_v56 = vadd.f32 %v3775_v15, %v3634_v1  ;;  %v1189_v10 = vsel %vm933_vm11, %v802_v39, %v1061_v57  ;;  %v1192_v15 = vsel %vm936_vm15, %v806_v46, %v1064_v30 }
 0x23d   :  { %v1060_v32 = vmul.f32 0.01, %v800_v56  ;;  %vm932_vm14 = vcmp.gt.f32.partialorder %v800_v56, 0.0 }
 0x23e   :  { %1782 = vmatmul.mubr.f32.gmra.mrb[74].mxu0 %v1152_v58 }
 0x23f   :  { %1787 = vmatprep.mubr.f32.mxu0 %v1157_v41  ;;  %v1188_v12 = vsel %vm932_vm14, %v800_v56, %v1060_v32  ;;  %v1322_v41 = vld [vmem:[%s3980_s4] sm:$0x3] }
 0x240   :  { %v3854_v1 = vrot.slane %v1322_v41, %v278_v29  ;;  %v3858_v23 = vrot.slane %v1322_v41, %v282_v53 }
 0x242   :  { %1788 = vmatmul.mubr.f32.gmra.mrb[76].mxu0 %v1156_v28 }
 0x243   :  { %1793 = vmatprep.mubr.f32.mxu0 %v1161_v3 }
 0x246   :  { %1794 = vmatmul.mubr.f32.gmra.mrb[78].mxu0 %v1160_v48 }
 0x247   :  { %1799 = vmatprep.mubr.f32.mxu0 %v1165_v49 }
 0x24a   :  { %1800 = vmatmul.mubr.f32.gmra.mrb[80].mxu0 %v1164_v38 }
 0x24b   :  { %1805 = vmatprep.mubr.f32.mxu0 %v1169_v4 }
 0x24e   :  { %1806 = vmatmul.mubr.f32.gmra.mrb[82].mxu0 %v1168_v18 }
 0x24f   :  { %1811 = vmatprep.mubr.f32.mxu0 %v1173_v40 }
 0x252   :  { %1812 = vmatmul.mubr.f32.gmra.mrb[84].mxu0 %v1172_v60 }
 0x253   :  { %1817 = vmatprep.mubr.f32.mxu0 %v1177_v8 }
 0x256   :  { %1818 = vmatmul.mubr.f32.gmra.mrb[86].mxu0 %v1176_v62 }
 0x257   :  { %1823 = vmatprep.mubr.f32.mxu0 %v1181_v50 }
 0x25a   :  { %1824 = vmatmul.mubr.f32.gmra.mrb[88].mxu0 %v1180_v37 }
 0x25b   :  { %1829 = vmatprep.mubr.f32.mxu0 %v1185_v17 }
 0x25e   :  { %1830 = vmatmul.mubr.f32.gmra.mrb[90].mxu0 %v1184_v33 }
 0x25f   :  { %1835 = vmatprep.mubr.f32.mxu0 %v1189_v10 }
 0x262   :  { %1836 = vmatmul.mubr.f32.gmra.mrb[92].mxu0 %v1188_v12 }
 0x263   :  { %1841 = vmatprep.mubr.f32.mxu0 %v1193_v47 }
 0x266   :  { %1842 = vmatmul.mubr.f32.gmra.mrb[94].mxu0 %v1192_v15 }
 0x2bd   :  { %v1657_v35 = vpop.f32.mrb[32].mxu0 }
 0x2be   :  { %v2692_v55 = vadd.f32 %v1657_v35, %v3854_v1  ;;  %v1659_v0 = vpop.f32.mrb[33].mxu0 }
 0x2bf   :  { %v2693_v58 = vadd.f32 %v1659_v0, %v3858_v23 }
 0x2c0   :  { %v1912_v59 = vmul.f32 0.01, %v2692_v55  ;;  %vm1848_vm0 = vcmp.gt.f32.partialorder %v2692_v55, 0.0 }
 0x2c1   :  { %v1913_v51 = vmul.f32 0.01, %v2693_v58  ;;  %v1663_v24 = vpop.f32.mrb[34].mxu0  ;;  %vm1849_vm1 = vcmp.gt.f32.partialorder %v2693_v58, 0.0 }
 0x2c2   :  { %v2694_v3 = vadd.f32 %v1663_v24, %v3854_v1  ;;  %v1665_v6 = vpop.f32.mrb[35].mxu0  ;;  %v1976_v25 = vsel %vm1848_vm0, %v2692_v55, %v1912_v59 }
 0x2c3   :  { %v2695_v29 = vadd.f32 %v1665_v6, %v3858_v23  ;;  %v1977_v52 = vsel %vm1849_vm1, %v2693_v58, %v1913_v51 }
 0x2c4   :  { %v1914_v53 = vmul.f32 0.01, %v2694_v3  ;;  %2143 = vmatprep.mubr.f32.mxu1 %v1977_v52  ;;  %vm1850_vm3 = vcmp.gt.f32.partialorder %v2694_v3, 0.0 }
 0x2c5   :  { %v1915_v44 = vmul.f32 0.01, %v2695_v29  ;;  %v1669_v45 = vpop.f32.mrb[36].mxu0  ;;  %2144 = vmatmul.mubr.f32.vlgmr.msra.gmra.mrb[96].mxu1 %v1976_v25  ;;  %vm1851_vm2 = vcmp.gt.f32.partialorder %v2695_v29, 0.0 }
 0x2c6   :  { %v2696_v28 = vadd.f32 %v1669_v45, %v3854_v1  ;;  %v1671_v63 = vpop.f32.mrb[37].mxu0  ;;  %v1978_v31 = vsel %vm1850_vm3, %v2694_v3, %v1914_v53 }
 0x2c7   :  { %v2697_v49 = vadd.f32 %v1671_v63, %v3858_v23  ;;  %v1979_v13 = vsel %vm1851_vm2, %v2695_v29, %v1915_v44 }
 0x2c8   :  { %v1916_v9 = vmul.f32 0.01, %v2696_v28  ;;  %2148 = vmatprep.mubr.f32.mxu1 %v1979_v13  ;;  %vm1852_vm5 = vcmp.gt.f32.partialorder %v2696_v28, 0.0 }
 0x2c9   :  { %v1917_v48 = vmul.f32 0.01, %v2697_v49  ;;  %v1675_v2 = vpop.f32.mrb[38].mxu0  ;;  %2149 = vmatmul.mubr.f32.gmra.mrb[98].mxu1 %v1978_v31  ;;  %vm1853_vm4 = vcmp.gt.f32.partialorder %v2697_v49, 0.0 }
 0x2ca   :  { %v2698_v4 = vadd.f32 %v1675_v2, %v3854_v1  ;;  %v1677_v34 = vpop.f32.mrb[39].mxu0  ;;  %v1980_v43 = vsel %vm1852_vm5, %v2696_v28, %v1916_v9 }
 0x2cb   :  { %v2699_v22 = vadd.f32 %v1677_v34, %v3858_v23  ;;  %v1981_v19 = vsel %vm1853_vm4, %v2697_v49, %v1917_v48 }
 0x2cc   :  { %v1918_v38 = vmul.f32 0.01, %v2698_v4  ;;  %2153 = vmatprep.mubr.f32.mxu1 %v1981_v19  ;;  %vm1854_vm7 = vcmp.gt.f32.partialorder %v2698_v4, 0.0 }
 0x2cd   :  { %v1919_v40 = vmul.f32 0.01, %v2699_v22  ;;  %v1681_v14 = vpop.f32.mrb[40].mxu0  ;;  %2154 = vmatmul.mubr.f32.gmra.mrb[100].mxu1 %v1980_v43  ;;  %vm1855_vm6 = vcmp.gt.f32.partialorder %v2699_v22, 0.0 }
 0x2ce   :  { %v2700_v26 = vadd.f32 %v1681_v14, %v3854_v1  ;;  %v1683_v5 = vpop.f32.mrb[41].mxu0  ;;  %v1982_v36 = vsel %vm1854_vm7, %v2698_v4, %v1918_v38 }
 0x2cf   :  { %v2701_v18 = vadd.f32 %v1683_v5, %v3858_v23  ;;  %v1983_v42 = vsel %vm1855_vm6, %v2699_v22, %v1919_v40 }
 0x2d0   :  { %v1920_v8 = vmul.f32 0.01, %v2700_v26  ;;  %2158 = vmatprep.mubr.f32.mxu1 %v1983_v42  ;;  %vm1856_vm9 = vcmp.gt.f32.partialorder %v2700_v26, 0.0 }
 0x2d1   :  { %v1921_v20 = vmul.f32 0.01, %v2701_v18  ;;  %v1687_v7 = vpop.f32.mrb[42].mxu0  ;;  %2159 = vmatmul.mubr.f32.gmra.mrb[102].mxu1 %v1982_v36  ;;  %vm1857_vm8 = vcmp.gt.f32.partialorder %v2701_v18, 0.0 }
 0x2d2   :  { %v2702_v60 = vadd.f32 %v1687_v7, %v3854_v1  ;;  %v1689_v27 = vpop.f32.mrb[43].mxu0  ;;  %v1984_v16 = vsel %vm1856_vm9, %v2700_v26, %v1920_v8 }
 0x2d3   :  { %v2703_v50 = vadd.f32 %v1689_v27, %v3858_v23  ;;  %v1985_v39 = vsel %vm1857_vm8, %v2701_v18, %v1921_v20 }
 0x2d4   :  { %v1922_v54 = vmul.f32 0.01, %v2702_v60  ;;  %2163 = vmatprep.mubr.f32.mxu1 %v1985_v39  ;;  %vm1858_vm11 = vcmp.gt.f32.partialorder %v2702_v60, 0.0 }
 0x2d5   :  { %v1923_v62 = vmul.f32 0.01, %v2703_v50  ;;  %v1693_v57 = vpop.f32.mrb[44].mxu0  ;;  %2164 = vmatmul.mubr.f32.gmra.mrb[104].mxu1 %v1984_v16  ;;  %vm1859_vm10 = vcmp.gt.f32.partialorder %v2703_v50, 0.0 }
 0x2d6   :  { %v2704_v17 = vadd.f32 %v1693_v57, %v3854_v1  ;;  %v1695_v21 = vpop.f32.mrb[45].mxu0  ;;  %v1986_v61 = vsel %vm1858_vm11, %v2702_v60, %v1922_v54 }
 0x2d7   :  { %v2705_v11 = vadd.f32 %v1695_v21, %v3858_v23  ;;  %v1987_v56 = vsel %vm1859_vm10, %v2703_v50, %v1923_v62 }
 0x2d8   :  { %v1924_v37 = vmul.f32 0.01, %v2704_v17  ;;  %2168 = vmatprep.mubr.f32.mxu1 %v1987_v56  ;;  %vm1860_vm13 = vcmp.gt.f32.partialorder %v2704_v17, 0.0 }
 0x2d9   :  { %v1925_v10 = vmul.f32 0.01, %v2705_v11  ;;  %v1699_v32 = vpop.f32.mrb[46].mxu0  ;;  %2169 = vmatmul.mubr.f32.gmra.mrb[106].mxu1 %v1986_v61  ;;  %vm1861_vm12 = vcmp.gt.f32.partialorder %v2705_v11, 0.0 }
 0x2da   :  { %v2706_v46 = vadd.f32 %v1699_v32, %v3854_v1  ;;  %v1701_v33 = vpop.f32.mrb[47].mxu0  ;;  %v1988_v15 = vsel %vm1860_vm13, %v2704_v17, %v1924_v37 }
 0x2db   :  { %v2707_v47 = vadd.f32 %v1701_v33, %v3858_v23  ;;  %v1989_v30 = vsel %vm1861_vm12, %v2705_v11, %v1925_v10 }
 0x2dc   :  { %v1926_v12 = vmul.f32 0.01, %v2706_v46  ;;  %2173 = vmatprep.mubr.f32.mxu1 %v1989_v30  ;;  %vm1862_vm15 = vcmp.gt.f32.partialorder %v2706_v46, 0.0 }
 0x2dd   :  { %v1927_v41 = vmul.f32 0.01, %v2707_v47  ;;  %v1705_v35 = vpop.f32.mrb[48].mxu0  ;;  %2174 = vmatmul.mubr.f32.gmra.mrb[108].mxu1 %v1988_v15  ;;  %vm1863_vm14 = vcmp.gt.f32.partialorder %v2707_v47, 0.0 }
 0x2de   :  { %v2708_v55 = vadd.f32 %v1705_v35, %v3854_v1  ;;  %v1707_v0 = vpop.f32.mrb[49].mxu0  ;;  %v1990_v24 = vsel %vm1862_vm15, %v2706_v46, %v1926_v12 }
 0x2df   :  { %v2709_v58 = vadd.f32 %v1707_v0, %v3858_v23  ;;  %v1991_v59 = vsel %vm1863_vm14, %v2707_v47, %v1927_v41 }
 0x2e0   :  { %v1928_v51 = vmul.f32 0.01, %v2708_v55  ;;  %2178 = vmatprep.mubr.f32.mxu1 %v1991_v59  ;;  %vm1864_vm1 = vcmp.gt.f32.partialorder %v2708_v55, 0.0 }
 0x2e1   :  { %v1929_v3 = vmul.f32 0.01, %v2709_v58  ;;  %v1711_v6 = vpop.f32.mrb[50].mxu0  ;;  %2179 = vmatmul.mubr.f32.gmra.mrb[110].mxu1 %v1990_v24  ;;  %vm1865_vm0 = vcmp.gt.f32.partialorder %v2709_v58, 0.0 }
 0x2e2   :  { %v2710_v29 = vadd.f32 %v1711_v6, %v3854_v1  ;;  %v1713_v52 = vpop.f32.mrb[51].mxu0  ;;  %v1992_v45 = vsel %vm1864_vm1, %v2708_v55, %v1928_v51 }
 0x2e3   :  { %v2711_v25 = vadd.f32 %v1713_v52, %v3858_v23  ;;  %v1993_v53 = vsel %vm1865_vm0, %v2709_v58, %v1929_v3 }
 0x2e4   :  { %v1930_v44 = vmul.f32 0.01, %v2710_v29  ;;  %2183 = vmatprep.mubr.f32.mxu1 %v1993_v53  ;;  %vm1866_vm3 = vcmp.gt.f32.partialorder %v2710_v29, 0.0 }
 0x2e5   :  { %v1931_v28 = vmul.f32 0.01, %v2711_v25  ;;  %v1717_v63 = vpop.f32.mrb[52].mxu0  ;;  %2184 = vmatmul.mubr.f32.gmra.mrb[112].mxu1 %v1992_v45  ;;  %vm1867_vm2 = vcmp.gt.f32.partialorder %v2711_v25, 0.0 }
 0x2e6   :  { %v2712_v49 = vadd.f32 %v1717_v63, %v3854_v1  ;;  %v1719_v13 = vpop.f32.mrb[53].mxu0  ;;  %v1994_v2 = vsel %vm1866_vm3, %v2710_v29, %v1930_v44 }
 0x2e7   :  { %v2713_v9 = vadd.f32 %v1719_v13, %v3858_v23  ;;  %v1995_v31 = vsel %vm1867_vm2, %v2711_v25, %v1931_v28 }
 0x2e8   :  { %v1932_v48 = vmul.f32 0.01, %v2712_v49  ;;  %2188 = vmatprep.mubr.f32.mxu1 %v1995_v31  ;;  %vm1868_vm5 = vcmp.gt.f32.partialorder %v2712_v49, 0.0 }
 0x2e9   :  { %v1933_v4 = vmul.f32 0.01, %v2713_v9  ;;  %v1723_v34 = vpop.f32.mrb[54].mxu0  ;;  %2189 = vmatmul.mubr.f32.gmra.mrb[114].mxu1 %v1994_v2  ;;  %vm1869_vm4 = vcmp.gt.f32.partialorder %v2713_v9, 0.0 }
 0x2ea   :  { %v2714_v22 = vadd.f32 %v1723_v34, %v3854_v1  ;;  %v1725_v19 = vpop.f32.mrb[55].mxu0  ;;  %v1996_v14 = vsel %vm1868_vm5, %v2712_v49, %v1932_v48 }
 0x2eb   :  { %v2715_v38 = vadd.f32 %v1725_v19, %v3858_v23  ;;  %v1997_v43 = vsel %vm1869_vm4, %v2713_v9, %v1933_v4 }
 0x2ec   :  { %v1934_v40 = vmul.f32 0.01, %v2714_v22  ;;  %2193 = vmatprep.mubr.f32.mxu1 %v1997_v43  ;;  %vm1870_vm7 = vcmp.gt.f32.partialorder %v2714_v22, 0.0 }
 0x2ed   :  { %v1935_v26 = vmul.f32 0.01, %v2715_v38  ;;  %v1729_v5 = vpop.f32.mrb[56].mxu0  ;;  %2194 = vmatmul.mubr.f32.gmra.mrb[116].mxu1 %v1996_v14  ;;  %vm1871_vm6 = vcmp.gt.f32.partialorder %v2715_v38, 0.0 }
 0x2ee   :  { %v2716_v18 = vadd.f32 %v1729_v5, %v3854_v1  ;;  %v1731_v42 = vpop.f32.mrb[57].mxu0  ;;  %v1998_v7 = vsel %vm1870_vm7, %v2714_v22, %v1934_v40 }
 0x2ef   :  { %v2717_v8 = vadd.f32 %v1731_v42, %v3858_v23  ;;  %v1999_v36 = vsel %vm1871_vm6, %v2715_v38, %v1935_v26 }
 0x2f0   :  { %v1936_v20 = vmul.f32 0.01, %v2716_v18  ;;  %2198 = vmatprep.mubr.f32.mxu1 %v1999_v36  ;;  %vm1872_vm9 = vcmp.gt.f32.partialorder %v2716_v18, 0.0 }
 0x2f1   :  { %v1937_v60 = vmul.f32 0.01, %v2717_v8  ;;  %v1735_v27 = vpop.f32.mrb[58].mxu0  ;;  %2199 = vmatmul.mubr.f32.gmra.mrb[118].mxu1 %v1998_v7  ;;  %vm1873_vm8 = vcmp.gt.f32.partialorder %v2717_v8, 0.0 }
 0x2f2   :  { %v2718_v50 = vadd.f32 %v1735_v27, %v3854_v1  ;;  %v1737_v39 = vpop.f32.mrb[59].mxu0  ;;  %v2000_v57 = vsel %vm1872_vm9, %v2716_v18, %v1936_v20 }
 0x2f3   :  { %v2719_v54 = vadd.f32 %v1737_v39, %v3858_v23  ;;  %v2001_v16 = vsel %vm1873_vm8, %v2717_v8, %v1937_v60 }
 0x2f4   :  { %v1938_v62 = vmul.f32 0.01, %v2718_v50  ;;  %2203 = vmatprep.mubr.f32.mxu1 %v2001_v16  ;;  %vm1874_vm11 = vcmp.gt.f32.partialorder %v2718_v50, 0.0 }
 0x2f5   :  { %v1939_v17 = vmul.f32 0.01, %v2719_v54  ;;  %v1741_v21 = vpop.f32.mrb[60].mxu0  ;;  %2204 = vmatmul.mubr.f32.gmra.mrb[120].mxu1 %v2000_v57  ;;  %vm1875_vm10 = vcmp.gt.f32.partialorder %v2719_v54, 0.0 }
 0x2f6   :  { %v2720_v11 = vadd.f32 %v1741_v21, %v3854_v1  ;;  %v1743_v56 = vpop.f32.mrb[61].mxu0  ;;  %v2002_v32 = vsel %vm1874_vm11, %v2718_v50, %v1938_v62 }
 0x2f7   :  { %v2721_v37 = vadd.f32 %v1743_v56, %v3858_v23  ;;  %v2003_v61 = vsel %vm1875_vm10, %v2719_v54, %v1939_v17 }
 0x2f8   :  { %v1940_v10 = vmul.f32 0.01, %v2720_v11  ;;  %2208 = vmatprep.mubr.f32.mxu1 %v2003_v61  ;;  %vm1876_vm13 = vcmp.gt.f32.partialorder %v2720_v11, 0.0 }
 0x2f9   :  { %v1941_v46 = vmul.f32 0.01, %v2721_v37  ;;  %v1747_v33 = vpop.f32.mrb[62].mxu0  ;;  %2209 = vmatmul.mubr.f32.gmra.mrb[122].mxu1 %v2002_v32  ;;  %vm1877_vm12 = vcmp.gt.f32.partialorder %v2721_v37, 0.0 }
 0x2fa   :  { %v2722_v47 = vadd.f32 %v1747_v33, %v3854_v1  ;;  %v1749_v30 = vpop.f32.mrb[63].mxu0  ;;  %v2004_v35 = vsel %vm1876_vm13, %v2720_v11, %v1940_v10 }
 0x2fb   :  { %v2723_v12 = vadd.f32 %v1749_v30, %v3858_v23  ;;  %v2005_v15 = vsel %vm1877_vm12, %v2721_v37, %v1941_v46 }
 0x2fc   :  { %v1942_v41 = vmul.f32 0.01, %v2722_v47  ;;  %2213 = vmatprep.mubr.f32.mxu1 %v2005_v15  ;;  %vm1878_vm15 = vcmp.gt.f32.partialorder %v2722_v47, 0.0 }
 0x2fd   :  { %v1943_v55 = vmul.f32 0.01, %v2723_v12  ;;  %v1753_v0 = vpop.f32.mrb[64].mxu0  ;;  %2214 = vmatmul.mubr.f32.gmra.mrb[124].mxu1 %v2004_v35  ;;  %vm1879_vm14 = vcmp.gt.f32.partialorder %v2723_v12, 0.0 }
 0x2fe   :  { %v2724_v58 = vadd.f32 %v1753_v0, %v3854_v1  ;;  %v1755_v59 = vpop.f32.mrb[65].mxu0  ;;  %v2006_v6 = vsel %vm1878_vm15, %v2722_v47, %v1942_v41 }
 0x2ff   :  { %v2725_v51 = vadd.f32 %v1755_v59, %v3858_v23  ;;  %v2007_v24 = vsel %vm1879_vm14, %v2723_v12, %v1943_v55 }
 0x300   :  { %v1944_v3 = vmul.f32 0.01, %v2724_v58  ;;  %2218 = vmatprep.mubr.f32.mxu1 %v2007_v24  ;;  %vm1880_vm1 = vcmp.gt.f32.partialorder %v2724_v58, 0.0 }
 0x301   :  { %v1945_v29 = vmul.f32 0.01, %v2725_v51  ;;  %v1759_v52 = vpop.f32.mrb[66].mxu0  ;;  %2219 = vmatmul.mubr.f32.gmra.mrb[126].mxu1 %v2006_v6  ;;  %vm1881_vm0 = vcmp.gt.f32.partialorder %v2725_v51, 0.0 }
 0x302   :  { %v2726_v25 = vadd.f32 %v1759_v52, %v3854_v1  ;;  %v1761_v53 = vpop.f32.mrb[67].mxu0  ;;  %v2008_v63 = vsel %vm1880_vm1, %v2724_v58, %v1944_v3 }
 0x303   :  { %v2727_v44 = vadd.f32 %v1761_v53, %v3858_v23  ;;  %v2009_v45 = vsel %vm1881_vm0, %v2725_v51, %v1945_v29 }
 0x304   :  { %v1946_v28 = vmul.f32 0.01, %v2726_v25  ;;  %2223 = vmatprep.mubr.f32.mxu1 %v2009_v45  ;;  %vm1882_vm3 = vcmp.gt.f32.partialorder %v2726_v25, 0.0 }
 0x305   :  { %v1947_v49 = vmul.f32 0.01, %v2727_v44  ;;  %v1765_v13 = vpop.f32.mrb[68].mxu0  ;;  %2224 = vmatmul.mubr.f32.gmra.mrb[128].mxu1 %v2008_v63  ;;  %vm1883_vm2 = vcmp.gt.f32.partialorder %v2727_v44, 0.0 }
 0x306   :  { %v2728_v9 = vadd.f32 %v1765_v13, %v3854_v1  ;;  %v1767_v31 = vpop.f32.mrb[69].mxu0  ;;  %v2010_v34 = vsel %vm1882_vm3, %v2726_v25, %v1946_v28 }
 0x307   :  { %v2729_v48 = vadd.f32 %v1767_v31, %v3858_v23  ;;  %v2011_v2 = vsel %vm1883_vm2, %v2727_v44, %v1947_v49 }
 0x308   :  { %v1948_v4 = vmul.f32 0.01, %v2728_v9  ;;  %2228 = vmatprep.mubr.f32.mxu1 %v2011_v2  ;;  %vm1884_vm5 = vcmp.gt.f32.partialorder %v2728_v9, 0.0 }
 0x309   :  { %v1949_v22 = vmul.f32 0.01, %v2729_v48  ;;  %v1771_v19 = vpop.f32.mrb[70].mxu0  ;;  %2229 = vmatmul.mubr.f32.gmra.mrb[130].mxu1 %v2010_v34  ;;  %vm1885_vm4 = vcmp.gt.f32.partialorder %v2729_v48, 0.0 }
 0x30a   :  { %v2730_v38 = vadd.f32 %v1771_v19, %v3854_v1  ;;  %v1773_v43 = vpop.f32.mrb[71].mxu0  ;;  %v2012_v5 = vsel %vm1884_vm5, %v2728_v9, %v1948_v4 }
 0x30b   :  { %v2731_v40 = vadd.f32 %v1773_v43, %v3858_v23  ;;  %v2013_v14 = vsel %vm1885_vm4, %v2729_v48, %v1949_v22 }
 0x30c   :  { %v1950_v26 = vmul.f32 0.01, %v2730_v38  ;;  %2233 = vmatprep.mubr.f32.mxu1 %v2013_v14  ;;  %vm1886_vm7 = vcmp.gt.f32.partialorder %v2730_v38, 0.0 }
 0x30d   :  { %v1951_v18 = vmul.f32 0.01, %v2731_v40  ;;  %v1777_v42 = vpop.f32.mrb[72].mxu0  ;;  %2234 = vmatmul.mubr.f32.gmra.mrb[132].mxu1 %v2012_v5  ;;  %vm1887_vm6 = vcmp.gt.f32.partialorder %v2731_v40, 0.0 }
 0x30e   :  { %v2732_v8 = vadd.f32 %v1777_v42, %v3854_v1  ;;  %v1779_v36 = vpop.f32.mrb[73].mxu0  ;;  %v2014_v27 = vsel %vm1886_vm7, %v2730_v38, %v1950_v26 }
 0x30f   :  { %v2733_v20 = vadd.f32 %v1779_v36, %v3858_v23  ;;  %v2015_v7 = vsel %vm1887_vm6, %v2731_v40, %v1951_v18 }
 0x310   :  { %v1952_v60 = vmul.f32 0.01, %v2732_v8  ;;  %2238 = vmatprep.mubr.f32.mxu1 %v2015_v7  ;;  %vm1888_vm9 = vcmp.gt.f32.partialorder %v2732_v8, 0.0 }
 0x311   :  { %v1953_v50 = vmul.f32 0.01, %v2733_v20  ;;  %v1783_v39 = vpop.f32.mrb[74].mxu0  ;;  %2239 = vmatmul.mubr.f32.gmra.mrb[134].mxu1 %v2014_v27  ;;  %vm1889_vm8 = vcmp.gt.f32.partialorder %v2733_v20, 0.0 }
 0x312   :  { %v2734_v54 = vadd.f32 %v1783_v39, %v3854_v1  ;;  %v1785_v16 = vpop.f32.mrb[75].mxu0  ;;  %v2016_v21 = vsel %vm1888_vm9, %v2732_v8, %v1952_v60 }
 0x313   :  { %v2735_v62 = vadd.f32 %v1785_v16, %v3858_v23  ;;  %v2017_v57 = vsel %vm1889_vm8, %v2733_v20, %v1953_v50 }
 0x314   :  { %v1954_v17 = vmul.f32 0.01, %v2734_v54  ;;  %2243 = vmatprep.mubr.f32.mxu1 %v2017_v57  ;;  %vm1890_vm11 = vcmp.gt.f32.partialorder %v2734_v54, 0.0 }
 0x315   :  { %v1955_v11 = vmul.f32 0.01, %v2735_v62  ;;  %v1789_v56 = vpop.f32.mrb[76].mxu0  ;;  %2244 = vmatmul.mubr.f32.gmra.mrb[136].mxu1 %v2016_v21  ;;  %vm1891_vm10 = vcmp.gt.f32.partialorder %v2735_v62, 0.0 }
 0x316   :  { %v2736_v37 = vadd.f32 %v1789_v56, %v3854_v1  ;;  %v1791_v61 = vpop.f32.mrb[77].mxu0  ;;  %v2018_v33 = vsel %vm1890_vm11, %v2734_v54, %v1954_v17 }
 0x317   :  { %v2737_v10 = vadd.f32 %v1791_v61, %v3858_v23  ;;  %v2019_v32 = vsel %vm1891_vm10, %v2735_v62, %v1955_v11 }
 0x318   :  { %v1956_v46 = vmul.f32 0.01, %v2736_v37  ;;  %2248 = vmatprep.mubr.f32.mxu1 %v2019_v32  ;;  %vm1892_vm13 = vcmp.gt.f32.partialorder %v2736_v37, 0.0 }
 0x319   :  { %v1957_v47 = vmul.f32 0.01, %v2737_v10  ;;  %v1795_v30 = vpop.f32.mrb[78].mxu0  ;;  %2249 = vmatmul.mubr.f32.gmra.mrb[138].mxu1 %v2018_v33  ;;  %vm1893_vm12 = vcmp.gt.f32.partialorder %v2737_v10, 0.0 }
 0x31a   :  { %v2738_v12 = vadd.f32 %v1795_v30, %v3854_v1  ;;  %v1797_v15 = vpop.f32.mrb[79].mxu0  ;;  %v2020_v0 = vsel %vm1892_vm13, %v2736_v37, %v1956_v46 }
 0x31b   :  { %v2739_v41 = vadd.f32 %v1797_v15, %v3858_v23  ;;  %v2021_v35 = vsel %vm1893_vm12, %v2737_v10, %v1957_v47 }
 0x31c   :  { %v1958_v55 = vmul.f32 0.01, %v2738_v12  ;;  %2253 = vmatprep.mubr.f32.mxu1 %v2021_v35  ;;  %vm1894_vm15 = vcmp.gt.f32.partialorder %v2738_v12, 0.0 }
 0x31d   :  { %v1959_v58 = vmul.f32 0.01, %v2739_v41  ;;  %v1801_v59 = vpop.f32.mrb[80].mxu0  ;;  %2254 = vmatmul.mubr.f32.gmra.mrb[140].mxu1 %v2020_v0  ;;  %vm1895_vm14 = vcmp.gt.f32.partialorder %v2739_v41, 0.0 }
 0x31e   :  { %v2740_v51 = vadd.f32 %v1801_v59, %v3854_v1  ;;  %v1803_v24 = vpop.f32.mrb[81].mxu0  ;;  %v2022_v52 = vsel %vm1894_vm15, %v2738_v12, %v1958_v55 }
 0x31f   :  { %v2741_v3 = vadd.f32 %v1803_v24, %v3858_v23  ;;  %v2023_v6 = vsel %vm1895_vm14, %v2739_v41, %v1959_v58 }
 0x320   :  { %v1960_v29 = vmul.f32 0.01, %v2740_v51  ;;  %2258 = vmatprep.mubr.f32.mxu1 %v2023_v6  ;;  %vm1896_vm1 = vcmp.gt.f32.partialorder %v2740_v51, 0.0  ;;  %v3927_v6 = vld [vmem:[%s3982_s6] ss:$0 sm:$0xff]  ;;  %s2962_s6 = smov [#allocation10]  }
 0x321   :  { %v1961_v25 = vmul.f32 0.01, %v2741_v3  ;;  %v1807_v53 = vpop.f32.mrb[82].mxu0  ;;  %2259 = vmatmul.mubr.f32.gmra.mrb[142].mxu1 %v2022_v52  ;;  %vm1897_vm0 = vcmp.gt.f32.partialorder %v2741_v3, 0.0  ;;  %s2341_s10 = sshll.u32 %s2962_s6, 4  ;;  %s2342_s10 = int_to_ptr.vmem [resolvable:$true] %s2341_s10 }
 0x322   :  { %v2742_v44 = vadd.f32 %v1807_v53, %v3854_v1  ;;  %v1809_v45 = vpop.f32.mrb[83].mxu0  ;;  %v2024_v13 = vsel %vm1896_vm1, %v2740_v51, %v1960_v29  ;;  %s2921_s11 = scalar_lea.vmem %s2342_s10, 4096  ;;  %p2926_p5 = scmp.lt.s32.totalorder %s2342_s10, %s2342_s10 }
 0x323   :  { %v2743_v28 = vadd.f32 %v1809_v45, %v3858_v23  ;;  %v2025_v63 = vsel %vm1897_vm0, %v2741_v3, %v1961_v25  ;;  %p2922_p4 = scmp.ne.s32.totalorder %s2342_s10, %s2921_s11  ;;  %p2927_p6 = scmp.lt.s32.totalorder %s2921_s11, %s2921_s11 }
 0x324   :  { %v1962_v49 = vmul.f32 0.01, %v2742_v44  ;;  %2263 = vmatprep.mubr.f32.mxu1 %v2025_v63  ;;  %vm1898_vm3 = vcmp.gt.f32.partialorder %v2742_v44, 0.0 }
 0x325   :  { %v1963_v9 = vmul.f32 0.01, %v2743_v28  ;;  %v1813_v31 = vpop.f32.mrb[84].mxu0  ;;  %2264 = vmatmul.mubr.f32.gmra.mrb[144].mxu1 %v2024_v13  ;;  %vm1899_vm2 = vcmp.gt.f32.partialorder %v2743_v28, 0.0  ;;  %p2928_p7 = por %p2927_p6, %p2926_p5 }
 0x326   :  { %v2744_v48 = vadd.f32 %v1813_v31, %v3854_v1  ;;  %v1815_v2 = vpop.f32.mrb[85].mxu0  ;;  %v2026_v19 = vsel %vm1898_vm3, %v2742_v44, %v1962_v49 }
 0x327   :  { %v2745_v4 = vadd.f32 %v1815_v2, %v3858_v23  ;;  %v2027_v34 = vsel %vm1899_vm2, %v2743_v28, %v1963_v9  ;;  %p2929_p8 = pnand %p2928_p7, %p2922_p4 }
 0x328   :  { %v1964_v22 = vmul.f32 0.01, %v2744_v48  ;;  %2268 = vmatprep.mubr.f32.mxu1 %v2027_v34  ;;  %vm1900_vm5 = vcmp.gt.f32.partialorder %v2744_v48, 0.0 }
 0x329   :  { %v1965_v38 = vmul.f32 0.01, %v2745_v4  ;;  %v1819_v43 = vpop.f32.mrb[86].mxu0  ;;  %2269 = vmatmul.mubr.f32.gmra.mrb[146].mxu1 %v2026_v19  ;;  %vm1901_vm4 = vcmp.gt.f32.partialorder %v2745_v4, 0.0 }
 0x32a   :  { %v2746_v40 = vadd.f32 %v1819_v43, %v3854_v1  ;;  %v1821_v14 = vpop.f32.mrb[87].mxu0  ;;  %v2028_v42 = vsel %vm1900_vm5, %v2744_v48, %v1964_v22 }
 0x32b   :  { %v2747_v26 = vadd.f32 %v1821_v14, %v3858_v23  ;;  %v2029_v5 = vsel %vm1901_vm4, %v2745_v4, %v1965_v38 }
 0x32c   :  { %v1966_v18 = vmul.f32 0.01, %v2746_v40  ;;  %2273 = vmatprep.mubr.f32.mxu1 %v2029_v5  ;;  %vm1902_vm7 = vcmp.gt.f32.partialorder %v2746_v40, 0.0 }
 0x32d   :  { %v1967_v8 = vmul.f32 0.01, %v2747_v26  ;;  %v1825_v36 = vpop.f32.mrb[88].mxu0  ;;  %2274 = vmatmul.mubr.f32.gmra.mrb[148].mxu1 %v2028_v42  ;;  %vm1903_vm6 = vcmp.gt.f32.partialorder %v2747_v26, 0.0 }
 0x32e   :  { %v2748_v20 = vadd.f32 %v1825_v36, %v3854_v1  ;;  %v1827_v7 = vpop.f32.mrb[89].mxu0  ;;  %v2030_v39 = vsel %vm1902_vm7, %v2746_v40, %v1966_v18 }
 0x32f   :  { %v2749_v60 = vadd.f32 %v1827_v7, %v3858_v23  ;;  %v2031_v27 = vsel %vm1903_vm6, %v2747_v26, %v1967_v8 }
 0x330   :  { %v1968_v50 = vmul.f32 0.01, %v2748_v20  ;;  %2278 = vmatprep.mubr.f32.mxu1 %v2031_v27  ;;  %vm1904_vm9 = vcmp.gt.f32.partialorder %v2748_v20, 0.0 }
 0x331   :  { %v1969_v54 = vmul.f32 0.01, %v2749_v60  ;;  %v1831_v16 = vpop.f32.mrb[90].mxu0  ;;  %2279 = vmatmul.mubr.f32.gmra.mrb[150].mxu1 %v2030_v39  ;;  %vm1905_vm8 = vcmp.gt.f32.partialorder %v2749_v60, 0.0 }
 0x332   :  { %v2750_v62 = vadd.f32 %v1831_v16, %v3854_v1  ;;  %v1833_v57 = vpop.f32.mrb[91].mxu0  ;;  %v2032_v56 = vsel %vm1904_vm9, %v2748_v20, %v1968_v50 }
 0x333   :  { %v2751_v17 = vadd.f32 %v1833_v57, %v3858_v23  ;;  %v2033_v21 = vsel %vm1905_vm8, %v2749_v60, %v1969_v54 }
 0x334   :  { %v1970_v11 = vmul.f32 0.01, %v2750_v62  ;;  %2283 = vmatprep.mubr.f32.mxu1 %v2033_v21  ;;  %vm1906_vm11 = vcmp.gt.f32.partialorder %v2750_v62, 0.0 }
 0x335   :  { %v1971_v37 = vmul.f32 0.01, %v2751_v17  ;;  %v1837_v61 = vpop.f32.mrb[92].mxu0  ;;  %2284 = vmatmul.mubr.f32.gmra.mrb[152].mxu1 %v2032_v56  ;;  %vm1907_vm10 = vcmp.gt.f32.partialorder %v2751_v17, 0.0 }
 0x336   :  { %v2752_v10 = vadd.f32 %v1837_v61, %v3854_v1  ;;  %v1839_v32 = vpop.f32.mrb[93].mxu0  ;;  %v2034_v30 = vsel %vm1906_vm11, %v2750_v62, %v1970_v11 }
 0x337   :  { %v2753_v46 = vadd.f32 %v1839_v32, %v3858_v23  ;;  %v2035_v33 = vsel %vm1907_vm10, %v2751_v17, %v1971_v37 }
 0x338   :  { %v1972_v47 = vmul.f32 0.01, %v2752_v10  ;;  %2288 = vmatprep.mubr.f32.mxu1 %v2035_v33  ;;  %vm1908_vm13 = vcmp.gt.f32.partialorder %v2752_v10, 0.0 }
 0x339   :  { %v1973_v12 = vmul.f32 0.01, %v2753_v46  ;;  %v1843_v15 = vpop.f32.mrb[94].mxu0  ;;  %2289 = vmatmul.mubr.f32.gmra.mrb[154].mxu1 %v2034_v30  ;;  %vm1909_vm12 = vcmp.gt.f32.partialorder %v2753_v46, 0.0 }
 0x33a   :  { %v2754_v41 = vadd.f32 %v1843_v15, %v3854_v1  ;;  %v1845_v35 = vpop.f32.mrb[95].mxu0  ;;  %v2036_v59 = vsel %vm1908_vm13, %v2752_v10, %v1972_v47 }
 0x33b   :  { %v2755_v55 = vadd.f32 %v1845_v35, %v3858_v23  ;;  %v2037_v0 = vsel %vm1909_vm12, %v2753_v46, %v1973_v12 }
 0x33c   :  { %v1974_v58 = vmul.f32 0.01, %v2754_v41  ;;  %2293 = vmatprep.mubr.f32.mxu1 %v2037_v0  ;;  %vm1910_vm15 = vcmp.gt.f32.partialorder %v2754_v41, 0.0 }
 0x33d   :  { %v1975_v51 = vmul.f32 0.01, %v2755_v55  ;;  %2294 = vmatmul.mubr.f32.gmra.mrb[156].mxu1 %v2036_v59  ;;  %vm1911_vm14 = vcmp.gt.f32.partialorder %v2755_v55, 0.0 }
 0x33e   :  { %v2038_v3 = vsel %vm1910_vm15, %v2754_v41, %v1974_v58 }
 0x33f   :  { %v2039_v24 = vsel %vm1911_vm14, %v2755_v55, %v1975_v51 }
 0x340   :  { %2298 = vmatprep.mubr.f32.mxu1 %v2039_v24 }
 0x341   :  { %2299 = vmatmul.mubr.f32.gmra.mrb[158].mxu1 %v2038_v3 }
 0x398   :  { %v2145_v1 = vpop.f32.mrb[96].mxu1 }
 0x399   :  { %v2146_v23 = vadd.f32 %v3927_v6, %v2145_v1  ;;  %v2147_v29 = vpop.f32.mrb[97].mxu1 }
 0x39b   :  { %2304 = vst [vmem:[#allocation10] sm:$0xff] %v2146_v23 }
 0x39c   :  { %v2150_v52 = vpop.f32.mrb[98].mxu1 }
 0x39d   :  { %v2151_v25 = vadd.f32 %v3927_v6, %v2150_v52  ;;  %v2152_v53 = vpop.f32.mrb[99].mxu1 }
 0x39f   :  { %2305 = vst [vmem:[#allocation10 + $0x8] sm:$0xff] %v2151_v25 }
 0x3a0   :  { %v2155_v44 = vpop.f32.mrb[100].mxu1 }
 0x3a1   :  { %v2156_v45 = vadd.f32 %v3927_v6, %v2155_v44  ;;  %v2157_v28 = vpop.f32.mrb[101].mxu1 }
 0x3a3   :  { %2306 = vst [vmem:[#allocation10 + $0x10] sm:$0xff] %v2156_v45 }
 0x3a4   :  { %v2160_v63 = vpop.f32.mrb[102].mxu1 }
 0x3a5   :  { %v2161_v49 = vadd.f32 %v3927_v6, %v2160_v63  ;;  %v2162_v13 = vpop.f32.mrb[103].mxu1 }
 0x3a7   :  { %2307 = vst [vmem:[#allocation10 + $0x18] sm:$0xff] %v2161_v49 }
 0x3a8   :  { %v2165_v9 = vpop.f32.mrb[104].mxu1 }
 0x3a9   :  { %v2166_v31 = vadd.f32 %v3927_v6, %v2165_v9  ;;  %v2167_v48 = vpop.f32.mrb[105].mxu1 }
 0x3ab   :  { %2308 = vst [vmem:[#allocation10 + $0x20] sm:$0xff] %v2166_v31 }
 0x3ac   :  { %v2170_v2 = vpop.f32.mrb[106].mxu1 }
 0x3ad   :  { %v2171_v4 = vadd.f32 %v3927_v6, %v2170_v2  ;;  %v2172_v34 = vpop.f32.mrb[107].mxu1 }
 0x3af   :  { %2309 = vst [vmem:[#allocation10 + $0x28] sm:$0xff] %v2171_v4 }
 0x3b0   :  { %v2175_v22 = vpop.f32.mrb[108].mxu1 }
 0x3b1   :  { %v2176_v19 = vadd.f32 %v3927_v6, %v2175_v22  ;;  %v2177_v38 = vpop.f32.mrb[109].mxu1 }
 0x3b3   :  { %2310 = vst [vmem:[#allocation10 + $0x30] sm:$0xff] %v2176_v19 }
 0x3b4   :  { %v2180_v43 = vpop.f32.mrb[110].mxu1 }
 0x3b5   :  { %v2181_v40 = vadd.f32 %v3927_v6, %v2180_v43  ;;  %v2182_v14 = vpop.f32.mrb[111].mxu1 }
 0x3b7   :  { %2311 = vst [vmem:[#allocation10 + $0x38] sm:$0xff] %v2181_v40 }
 0x3b8   :  { %v2185_v26 = vpop.f32.mrb[112].mxu1 }
 0x3b9   :  { %v2186_v5 = vadd.f32 %v3927_v6, %v2185_v26  ;;  %v2187_v18 = vpop.f32.mrb[113].mxu1 }
 0x3bb   :  { %2312 = vst [vmem:[#allocation10 + $0x40] sm:$0xff] %v2186_v5 }
 0x3bc   :  { %v2190_v42 = vpop.f32.mrb[114].mxu1 }
 0x3bd   :  { %v2191_v8 = vadd.f32 %v3927_v6, %v2190_v42  ;;  %v2192_v36 = vpop.f32.mrb[115].mxu1 }
 0x3bf   :  { %2313 = vst [vmem:[#allocation10 + $0x48] sm:$0xff] %v2191_v8 }
 0x3c0   :  { %v2195_v20 = vpop.f32.mrb[116].mxu1 }
 0x3c1   :  { %v2196_v7 = vadd.f32 %v3927_v6, %v2195_v20  ;;  %v2197_v60 = vpop.f32.mrb[117].mxu1 }
 0x3c3   :  { %2314 = vst [vmem:[#allocation10 + $0x50] sm:$0xff] %v2196_v7 }
 0x3c4   :  { %v2200_v27 = vpop.f32.mrb[118].mxu1 }
 0x3c5   :  { %v2201_v50 = vadd.f32 %v3927_v6, %v2200_v27  ;;  %v2202_v39 = vpop.f32.mrb[119].mxu1 }
 0x3c7   :  { %2315 = vst [vmem:[#allocation10 + $0x58] sm:$0xff] %v2201_v50 }
 0x3c8   :  { %v2205_v54 = vpop.f32.mrb[120].mxu1 }
 0x3c9   :  { %v2206_v16 = vadd.f32 %v3927_v6, %v2205_v54  ;;  %v2207_v62 = vpop.f32.mrb[121].mxu1 }
 0x3cb   :  { %2316 = vst [vmem:[#allocation10 + $0x60] sm:$0xff] %v2206_v16 }
 0x3cc   :  { %v2210_v57 = vpop.f32.mrb[122].mxu1 }
 0x3cd   :  { %v2211_v17 = vadd.f32 %v3927_v6, %v2210_v57  ;;  %v2212_v21 = vpop.f32.mrb[123].mxu1 }
 0x3cf   :  { %2317 = vst [vmem:[#allocation10 + $0x68] sm:$0xff] %v2211_v17 }
 0x3d0   :  { %v2215_v11 = vpop.f32.mrb[124].mxu1 }
 0x3d1   :  { %v2216_v56 = vadd.f32 %v3927_v6, %v2215_v11  ;;  %v2217_v37 = vpop.f32.mrb[125].mxu1 }
 0x3d3   :  { %2318 = vst [vmem:[#allocation10 + $0x70] sm:$0xff] %v2216_v56 }
 0x3d4   :  { %v2220_v61 = vpop.f32.mrb[126].mxu1 }
 0x3d5   :  { %v2221_v10 = vadd.f32 %v3927_v6, %v2220_v61  ;;  %v2222_v32 = vpop.f32.mrb[127].mxu1 }
 0x3d7   :  { %2319 = vst [vmem:[#allocation10 + $0x78] sm:$0xff] %v2221_v10 }
 0x3d8   :  { %v2225_v46 = vpop.f32.mrb[128].mxu1 }
 0x3d9   :  { %v2226_v33 = vadd.f32 %v3927_v6, %v2225_v46  ;;  %v2227_v47 = vpop.f32.mrb[129].mxu1 }
 0x3db   :  { %2320 = vst [vmem:[#allocation10 + $0x80] sm:$0xff] %v2226_v33 }
 0x3dc   :  { %v2230_v30 = vpop.f32.mrb[130].mxu1 }
 0x3dd   :  { %v2231_v12 = vadd.f32 %v3927_v6, %v2230_v30  ;;  %v2232_v15 = vpop.f32.mrb[131].mxu1 }
 0x3df   :  { %2321 = vst [vmem:[#allocation10 + $0x88] sm:$0xff] %v2231_v12 }
 0x3e0   :  { %v2235_v41 = vpop.f32.mrb[132].mxu1 }
 0x3e1   :  { %v2236_v35 = vadd.f32 %v3927_v6, %v2235_v41  ;;  %v2237_v55 = vpop.f32.mrb[133].mxu1 }
 0x3e3   :  { %2322 = vst [vmem:[#allocation10 + $0x90] sm:$0xff] %v2236_v35 }
 0x3e4   :  { %v2240_v0 = vpop.f32.mrb[134].mxu1 }
 0x3e5   :  { %v2241_v58 = vadd.f32 %v3927_v6, %v2240_v0  ;;  %v2242_v59 = vpop.f32.mrb[135].mxu1 }
 0x3e7   :  { %2323 = vst [vmem:[#allocation10 + $0x98] sm:$0xff] %v2241_v58 }
 0x3e8   :  { %v2245_v51 = vpop.f32.mrb[136].mxu1 }
 0x3e9   :  { %v2246_v24 = vadd.f32 %v3927_v6, %v2245_v51  ;;  %v2247_v3 = vpop.f32.mrb[137].mxu1 }
 0x3eb   :  { %2324 = vst [vmem:[#allocation10 + $0xa0] sm:$0xff] %v2246_v24 }
 0x3ec   :  { %v2250_v1 = vpop.f32.mrb[138].mxu1 }
 0x3ed   :  { %v2251_v23 = vadd.f32 %v3927_v6, %v2250_v1  ;;  %v2252_v29 = vpop.f32.mrb[139].mxu1 }
 0x3ef   :  { %2325 = vst [vmem:[#allocation10 + $0xa8] sm:$0xff] %v2251_v23 }
 0x3f0   :  { %v2255_v52 = vpop.f32.mrb[140].mxu1 }
 0x3f1   :  { %v2256_v25 = vadd.f32 %v3927_v6, %v2255_v52  ;;  %v2257_v53 = vpop.f32.mrb[141].mxu1 }
 0x3f3   :  { %2326 = vst [vmem:[#allocation10 + $0xb0] sm:$0xff] %v2256_v25 }
 0x3f4   :  { %v2260_v44 = vpop.f32.mrb[142].mxu1 }
 0x3f5   :  { %v2261_v45 = vadd.f32 %v3927_v6, %v2260_v44  ;;  %v2262_v28 = vpop.f32.mrb[143].mxu1 }
 0x3f7   :  { %2327 = vst [vmem:[#allocation10 + $0xb8] sm:$0xff] %v2261_v45 }
 0x3f8   :  { %v2265_v63 = vpop.f32.mrb[144].mxu1 }
 0x3f9   :  { %v2266_v49 = vadd.f32 %v3927_v6, %v2265_v63  ;;  %v2267_v13 = vpop.f32.mrb[145].mxu1 }
 0x3fb   :  { %2328 = vst [vmem:[#allocation10 + $0xc0] sm:$0xff] %v2266_v49 }
 0x3fc   :  { %v2270_v9 = vpop.f32.mrb[146].mxu1 }
 0x3fd   :  { %v2271_v31 = vadd.f32 %v3927_v6, %v2270_v9  ;;  %v2272_v48 = vpop.f32.mrb[147].mxu1 }
 0x3ff   :  { %2329 = vst [vmem:[#allocation10 + $0xc8] sm:$0xff] %v2271_v31 }
 0x400   :  { %v2275_v2 = vpop.f32.mrb[148].mxu1 }
 0x401   :  { %v2276_v4 = vadd.f32 %v3927_v6, %v2275_v2  ;;  %v2277_v34 = vpop.f32.mrb[149].mxu1 }
 0x403   :  { %2330 = vst [vmem:[#allocation10 + $0xd0] sm:$0xff] %v2276_v4 }
 0x404   :  { %v2280_v22 = vpop.f32.mrb[150].mxu1 }
 0x405   :  { %v2281_v19 = vadd.f32 %v3927_v6, %v2280_v22  ;;  %v2282_v38 = vpop.f32.mrb[151].mxu1 }
 0x407   :  { %2331 = vst [vmem:[#allocation10 + $0xd8] sm:$0xff] %v2281_v19 }
 0x408   :  { %v2285_v43 = vpop.f32.mrb[152].mxu1 }
 0x409   :  { %v2286_v40 = vadd.f32 %v3927_v6, %v2285_v43  ;;  %v2287_v14 = vpop.f32.mrb[153].mxu1 }
 0x40b   :  { %2332 = vst [vmem:[#allocation10 + $0xe0] sm:$0xff] %v2286_v40 }
 0x40c   :  { %v2290_v26 = vpop.f32.mrb[154].mxu1 }
 0x40d   :  { %v2291_v5 = vadd.f32 %v3927_v6, %v2290_v26  ;;  %v2292_v18 = vpop.f32.mrb[155].mxu1 }
 0x40f   :  { %2333 = vst [vmem:[#allocation10 + $0xe8] sm:$0xff] %v2291_v5 }
 0x410   :  { %v2295_v42 = vpop.f32.mrb[156].mxu1 }
 0x411   :  { %v2296_v8 = vadd.f32 %v3927_v6, %v2295_v42  ;;  %v2297_v36 = vpop.f32.mrb[157].mxu1 }
 0x413   :  { %2334 = vst [vmem:[#allocation10 + $0xf0] sm:$0xff] %v2296_v8 }
 0x414   :  { %v2300_v20 = vpop.f32.mrb[158].mxu1 }
 0x415   :  { %v2301_v7 = vadd.f32 %v3927_v6, %v2300_v20  ;;  %v2302_v60 = vpop.f32.mrb[159].mxu1 }
 0x417   :  { %2335 = vst [vmem:[#allocation10 + $0xf8] sm:$0xff] %v2301_v7 }
 0x418   :  { %2932 = shalt.err (!%p2929_p8)
}
 0x419   :  { %s2933_s14 = scalar_lea.hbm %s3983_s7, 4096 }
 0x41a   :  { %p2934_p9 = scmp.ne.s32.totalorder %s3983_s7, %s2933_s14  ;;  %p2937_p10 = scmp.lt.u32.totalorder %s2933_s14, %s3983_s7 }
 0x41c   :  { %p2939_p11 = pnand %p2937_p10, %p2934_p9 }
 0x41e   :  { %2942 = shalt.err (!%p2939_p11)
}
 0x41f   :  { %2347 = dma.vmem_to_hbm [thread:$0]  %s2342_s10, 4096, %s3983_s7, [#allocation4], %s2959_s3, %s2959_s3, %s2960_s1  }
 0x420   :  { %2949 = dma.done.wait [#allocation4], 4096  }
 0x421   :  { %2950 = vsyncadd [#allocation4], 4294963200 }
 0x422   :  { %2351 = vsyncpa [#allocation3], 1 }
 0x423   :  { %2352 = vsyncpa [#allocation6], 1 }
 0x424   :  { %2353 = vsyncpa [#allocation9], 1 }
 0x425   :  { %2354 = vsyncpa [#allocation4], 1 }

</bundles_post_ra>
